<compile_context>
chip_gen: v7x
topology: tpu7x:2x2x1
jax: 0.10.0
libtpu: 0.0.40
codegen_flags: <defaults>
</compile_context>

<pallas_src>
import functools

import jax
import jax.numpy as jnp
from jax.experimental import pallas as pl
from jax.experimental.pallas import tpu as pltpu

EPS = 1e-5          # torch.nn.InstanceNorm2d default eps
_P_TILE = 1024      # max spatial-tile rows for the im2col kernel
_VMEM_LIMIT = 64 * 1024 * 1024


def _round_up(x, m):
    return ((x + m - 1) // m) * m


def _pad_kc(kc):
    # Pad the contraction dim to 128 when it costs <15% extra traffic,
    # otherwise just to the sublane multiple of 8.
    kc128 = _round_up(kc, 128)
    if kc128 <= int(kc * 1.15):
        return kc128
    return _round_up(kc, 8)


def _p_tiling(p):
    n_chunks = -(-p // _P_TILE)
    tp = _round_up(-(-p // n_chunks), 8)
    n_pt = -(-p // tp)
    return tp, n_pt, tp * n_pt


# ---------------------------------------------------------------------------
# Kernel 1: im2col matmul + InstanceNorm + ReLU, P-tiled with resident stats.
#   grid = (N, P_tiles); stats + pre-norm activation live in VMEM scratch and
#   the output block (same index for every P tile) is written on the last tile.
# ---------------------------------------------------------------------------
def _matmul_in_kernel(x_ref, w_ref, gb_ref, o_ref, sum_ref, sq_ref, acc_ref,
                      *, inv_cnt, relu):
    pt = pl.program_id(1)
    n_pt = pl.num_programs(1)

    @pl.when(pt == 0)
    def _():
        sum_ref[...] = jnp.zeros_like(sum_ref)
        sq_ref[...] = jnp.zeros_like(sq_ref)

    # (TP, Kc) bf16 x (Kc, Cout) bf16 -> f32 accumulator.
    acc = jnp.dot(x_ref[0], w_ref[...], preferred_element_type=jnp.float32)

    # One-pass statistics (zero-padded P rows contribute exactly 0 to both).
    sum_ref[...] += jnp.sum(acc, axis=0, keepdims=True)
    sq_ref[...] += jnp.sum(acc * acc, axis=0, keepdims=True)

    tp = acc.shape[0]
    start = pl.multiple_of(pt * tp, 8)
    acc_ref[pl.ds(start, tp), :] = acc

    @pl.when(pt == n_pt - 1)
    def _():
        mean = sum_ref[...] * inv_cnt
        var = jnp.maximum(sq_ref[...] * inv_cnt - mean * mean, 0.0)
        scale = gb_ref[0:1, :] * jax.lax.rsqrt(var + EPS)
        shift = gb_ref[1:2, :] - mean * scale
        y = acc_ref[...] * scale + shift
        if relu:
            y = jnp.maximum(y, 0.0)
        o_ref[0, :, :] = y.astype(o_ref.dtype)


# ---------------------------------------------------------------------------
# Kernel 2: shifted-window 3x3/stride-1 conv + InstanceNorm (+ReLU | +residual).
#   Input is the reflection-padded image flattened to (Hp*Wp (+1 zero row), C).
#   For each tap (dy, dx) the needed pixels of ALL "full-width" outputs form one
#   contiguous slice, so the conv is 9 plain 2D matmuls.  Junk columns (x >= Wo)
#   are masked out of the statistics and cropped by the caller.
# ---------------------------------------------------------------------------
def _shifted_conv3_in_kernel(x_ref, w_ref, gb_ref, m_ref, *rest,
                             wp, m_rows, inv_cnt, relu, has_res):
    if has_res:
        r_ref, o_ref = rest
    else:
        (o_ref,) = rest

    acc = None
    for dy in range(3):
        for dx in range(3):
            off = dy * wp + dx
            term = jnp.dot(x_ref[0, pl.ds(off, m_rows), :],
                           w_ref[3 * dy + dx],
                           preferred_element_type=jnp.float32)
            acc = term if acc is None else acc + term

    mask = m_ref[...]                                   # (M, 1) f32, 1 on valid cols
    s = jnp.sum(acc * mask, axis=0, keepdims=True)
    ss = jnp.sum(acc * acc * mask, axis=0, keepdims=True)
    mean = s * inv_cnt
    var = jnp.maximum(ss * inv_cnt - mean * mean, 0.0)
    scale = gb_ref[0:1, :] * jax.lax.rsqrt(var + EPS)
    shift = gb_ref[1:2, :] - mean * scale
    y = acc * scale + shift
    if relu:
        y = jnp.maximum(y, 0.0)
    if has_res:
        y = y + r_ref[0].astype(jnp.float32)
    o_ref[0, :, :] = y.astype(o_ref.dtype)


# ---------------------------------------------------------------------------
# Plain-JAX glue: reflection padding + im2col patches (layout plumbing only).
# ---------------------------------------------------------------------------
def _reflect_pad(x_nhwc, pad):
    if pad == 0:
        return x_nhwc
    return jnp.pad(x_nhwc, ((0, 0), (pad, pad), (pad, pad), (0, 0)),
                   mode="reflect")


def _im2col(xp, k, stride):
    # xp: padded (N, Hp, Wp, C) -> (N, Ho*Wo, k*k*C), ordered (dy, dx, cin)
    n, hp, wp, c = xp.shape
    ho = (hp - k) // stride + 1
    wo = (wp - k) // stride + 1
    cols = []
    for dy in range(k):
        for dx in range(k):
            cols.append(xp[:, dy:dy + (ho - 1) * stride + 1:stride,
                              dx:dx + (wo - 1) * stride + 1:stride, :])
    patches = jnp.stack(cols, axis=3)                    # (N, Ho, Wo, k*k, C)
    return patches.reshape(n, ho * wo, k * k * c), ho, wo


def _conv_im2col_layer(x_nhwc, p, *, k, stride):
    """ConvLayer(reflect pad + conv) + InstanceNorm(affine) + ReLU via im2col."""
    pad = k // 2
    xp = _reflect_pad(x_nhwc, pad)
    patches, ho, wo = _im2col(xp, k, stride)             # (N, P, Kc0)
    n, pcount, kc0 = patches.shape
    kc, cout = p["w"].shape

    tp, n_pt, p_pad = _p_tiling(pcount)
    patches = jnp.pad(patches, ((0, 0), (0, p_pad - pcount), (0, kc - kc0)))
    patches = patches.astype(jnp.bfloat16)

    kernel = functools.partial(_matmul_in_kernel,
                               inv_cnt=1.0 / float(pcount), relu=True)
    out = pl.pallas_call(
        kernel,
        out_shape=jax.ShapeDtypeStruct((n, p_pad, cout), jnp.bfloat16),
        grid=(n, n_pt),
        in_specs=[
            pl.BlockSpec((1, tp, kc), lambda i, t: (i, t, 0)),
            pl.BlockSpec((kc, cout), lambda i, t: (0, 0)),
            pl.BlockSpec((2, cout), lambda i, t: (0, 0)),
        ],
        out_specs=pl.BlockSpec((1, p_pad, cout), lambda i, t: (i, 0, 0)),
        scratch_shapes=[
            pltpu.VMEM((1, cout), jnp.float32),          # running sum
            pltpu.VMEM((1, cout), jnp.float32),          # running sum of squares
            pltpu.VMEM((p_pad, cout), jnp.float32),      # pre-norm activations
        ],
        compiler_params=pltpu.CompilerParams(
            dimension_semantics=("parallel", "arbitrary"),
            vmem_limit_bytes=_VMEM_LIMIT),
    )(patches, p["w"], p["gb"])

    return out[:, :pcount, :].reshape(n, ho, wo, cout)


def _conv3x3_flat_layer(x_nhwc, p, *, relu, residual=None):
    """3x3 stride-1 ConvLayer + IN(affine) [+ReLU] [+residual], no im2col."""
    n, h, w, c = x_nhwc.shape
    cout = p["w"].shape[-1]
    hp, wp = h + 2, w + 2
    ho, wo = h, w
    m_rows = ho * wp                                     # "full-width" output rows
    flat_len = hp * wp + wp                              # +1 zero row: slice safety

    xp = _reflect_pad(x_nhwc, 1)
    xflat = jnp.pad(xp.reshape(n, hp * wp, c), ((0, 0), (0, wp), (0, 0)))
    xflat = xflat.astype(jnp.bfloat16)

    # Column-validity mask: excludes the (wp - wo) wrap-around junk columns
    # from the InstanceNorm statistics.  Precomputed in XLA (tiny) to avoid
    # in-kernel integer-mod lowering.
    col = jnp.arange(m_rows, dtype=jnp.int32) % wp
    mask = (col < wo).astype(jnp.float32).reshape(m_rows, 1)

    args = [xflat, p["w"], p["gb"], mask]
    in_specs = [
        pl.BlockSpec((1, flat_len, c), lambda i: (i, 0, 0)),
        pl.BlockSpec((9, c, cout), lambda i: (0, 0, 0)),
        pl.BlockSpec((2, cout), lambda i: (0, 0)),
        pl.BlockSpec((m_rows, 1), lambda i: (0, 0)),
    ]
    has_res = residual is not None
    if has_res:
        r = jnp.pad(residual, ((0, 0), (0, 0), (0, wp - wo), (0, 0)))
        r = r.reshape(n, m_rows, cout).astype(jnp.bfloat16)
        args.append(r)
        in_specs.append(pl.BlockSpec((1, m_rows, cout), lambda i: (i, 0, 0)))

    kernel = functools.partial(_shifted_conv3_in_kernel,
                               wp=wp, m_rows=m_rows,
                               inv_cnt=1.0 / float(ho * wo),
                               relu=relu, has_res=has_res)
    out = pl.pallas_call(
        kernel,
        out_shape=jax.ShapeDtypeStruct((n, m_rows, cout), jnp.bfloat16),
        grid=(n,),
        in_specs=in_specs,
        out_specs=pl.BlockSpec((1, m_rows, cout), lambda i: (i, 0, 0)),
        compiler_params=pltpu.CompilerParams(
            dimension_semantics=("parallel",),
            vmem_limit_bytes=_VMEM_LIMIT),
    )(*args)

    return out.reshape(n, ho, wp, cout)[:, :, :wo, :]


# ---------------------------------------------------------------------------
# Parameter initialization (deterministic, synthetic).  No conv bias: it is
# exactly cancelled by the InstanceNorm mean subtraction that follows each conv.
# ---------------------------------------------------------------------------
def _affine_params(cout):
    return jnp.concatenate([jnp.ones((1, cout), jnp.float32),     # gamma
                            jnp.zeros((1, cout), jnp.float32)],   # beta
                           axis=0)


def _init_im2col(key, k, cin, cout, scale=0.05):
    w = scale * jax.random.normal(key, (k, k, cin, cout), jnp.float32)
    kc0 = k * k * cin
    kc = _pad_kc(kc0)
    w = jnp.pad(w.reshape(kc0, cout), ((0, kc - kc0), (0, 0)))
    return {"w": w.astype(jnp.bfloat16), "gb": _affine_params(cout)}


def _init_flat3(key, cin, cout, scale=0.05):
    w = scale * jax.random.normal(key, (3, 3, cin, cout), jnp.float32)
    return {"w": w.reshape(9, cin, cout).astype(jnp.bfloat16),
            "gb": _affine_params(cout)}


def init_rgb_block_params(seed=42):
    key = jax.random.PRNGKey(seed)
    ks = jax.random.split(key, 9)
    return {
        "conv1": _init_im2col(ks[0], 9, 3, 16),
        "conv2": _init_im2col(ks[1], 3, 16, 32),
        "conv3": _init_im2col(ks[2], 3, 32, 64),
        "res1_a": _init_flat3(ks[3], 64, 64),
        "res1_b": _init_flat3(ks[4], 64, 64),
        "res2_a": _init_flat3(ks[5], 64, 64),
        "res2_b": _init_flat3(ks[6], 64, 64),
        "res3_a": _init_flat3(ks[7], 64, 64),
        "res3_b": _init_flat3(ks[8], 64, 64),
    }


# ---------------------------------------------------------------------------
# RGB_Block forward
# ---------------------------------------------------------------------------
def _residual_block(y, pa, pb):
    h = _conv3x3_flat_layer(y, pa, relu=True)
    return _conv3x3_flat_layer(h, pb, relu=False, residual=y)


def rgb_block_forward(x_nchw, params):
    # x: (N, 3, H, W) -> (N, 64, H//4, W//4), matching the PyTorch module.
    x = jnp.transpose(x_nchw, (0, 2, 3, 1))                  # NCHW -> NHWC
    y = _conv_im2col_layer(x, params["conv1"], k=9, stride=1)
    y = _conv_im2col_layer(y, params["conv2"], k=3, stride=2)
    y = _conv_im2col_layer(y, params["conv3"], k=3, stride=2)
    y = _residual_block(y, params["res1_a"], params["res1_b"])
    y = _residual_block(y, params["res2_a"], params["res2_b"])
    y = _residual_block(y, params["res3_a"], params["res3_b"])
    return jnp.transpose(y.astype(jnp.float32), (0, 3, 1, 2))  # NHWC -> NCHW


if __name__ == "__main__":
    key = jax.random.PRNGKey(0)
    x = jax.random.normal(key, (2, 3, 16, 16), jnp.float32)

    params = init_rgb_block_params(seed=42)
    fwd = jax.jit(rgb_block_forward)
    out = jax.block_until_ready(fwd(x, params))

    assert out.shape == (2, 64, 4, 4), out.shape
    assert bool(jnp.all(jnp.isfinite(out)))
    print("KERNEL_OK")
</pallas_src>

<mosaic_0001>
module attributes {stable_mosaic.version = 11 : i64} {
  func.func @_matmul_in_kernel(%arg0: i32, %arg1: i32, %arg2: memref<1x256x256xbf16, #tpu.memory_space<vmem>>, %arg3: memref<256x16xbf16, #tpu.memory_space<vmem>>, %arg4: memref<2x16xf32, #tpu.memory_space<vmem>>, %arg5: memref<1x256x16xbf16, #tpu.memory_space<vmem>>, %arg6: memref<1x16xf32, #tpu.memory_space<vmem>>, %arg7: memref<1x16xf32, #tpu.memory_space<vmem>>, %arg8: memref<256x16xf32, #tpu.memory_space<vmem>>) attributes {dimension_semantics = [#tpu.dimension_semantics<parallel>, #tpu.dimension_semantics<arbitrary>], iteration_bounds = array<i64: 2, 1>, scalar_prefetch = 0 : i64, scratch_operands = 3 : i64, tpu.core_type = #tpu.core_type<tc>, window_params = [{transform_indices = @transform_0, window_bounds = array<i64: 1, 256, 256>}, {pipeline_mode = #tpu.pipeline_mode<synchronous>, transform_indices = @transform_1, window_bounds = array<i64: 256, 16>}, {pipeline_mode = #tpu.pipeline_mode<synchronous>, transform_indices = @transform_2, window_bounds = array<i64: 2, 16>}, {transform_indices = @transform_3, window_bounds = array<i64: 1, 256, 16>}]} {
    %c0_i32 = arith.constant 0 : i32
    %0 = arith.cmpi eq, %arg1, %c0_i32 : i32
    %1 = arith.extui %0 : i1 to i32
    %c0_i32_0 = arith.constant 0 : i32
    %2 = arith.cmpi ne, %1, %c0_i32_0 : i32
    scf.if %2 {
      %cst_18 = arith.constant 0.000000e+00 : f32
      %25 = vector.broadcast %cst_18 : f32 to vector<1x16xf32>
      %c0_19 = arith.constant 0 : index
      %c0_20 = arith.constant 0 : index
      %26 = vector.load %arg6[%c0_19, %c0_20] : memref<1x16xf32, #tpu.memory_space<vmem>>, vector<1x16xf32>
      tpu.vector_store %arg6[%c0_19, %c0_20], %25 {strides = array<i32>} : memref<1x16xf32, #tpu.memory_space<vmem>>, vector<1x16xf32>,
      %cst_21 = arith.constant 0.000000e+00 : f32
      %27 = vector.broadcast %cst_21 : f32 to vector<1x16xf32>
      %c0_22 = arith.constant 0 : index
      %c0_23 = arith.constant 0 : index
      %28 = vector.load %arg7[%c0_22, %c0_23] : memref<1x16xf32, #tpu.memory_space<vmem>>, vector<1x16xf32>
      tpu.vector_store %arg7[%c0_22, %c0_23], %27 {strides = array<i32>} : memref<1x16xf32, #tpu.memory_space<vmem>>, vector<1x16xf32>,
    } else {
    }
    %c0 = arith.constant 0 : index
    %c0_1 = arith.constant 0 : index
    %c0_2 = arith.constant 0 : index
    %3 = vector.load %arg2[%c0, %c0_1, %c0_2] : memref<1x256x256xbf16, #tpu.memory_space<vmem>>, vector<1x256x256xbf16>
    %4 = vector.shape_cast %3 : vector<1x256x256xbf16> to vector<256x256xbf16>
    %c0_3 = arith.constant 0 : index
    %c0_4 = arith.constant 0 : index
    %5 = vector.load %arg3[%c0_3, %c0_4] : memref<256x16xbf16, #tpu.memory_space<vmem>>, vector<256x16xbf16>
    %cst = arith.constant dense<0.000000e+00> : vector<256x16xf32>
    %6 = tpu.matmul %4, %5, %cst {dimension_numbers = #tpu.dot_dimension_numbers<[1], [0], [0], [1], [0, 0, 1, 1], [], []>} : vector<256x256xbf16>, vector<256x16xbf16>, vector<256x16xf32> -> vector<256x16xf32>
    %c0_5 = arith.constant 0 : index
    %c0_6 = arith.constant 0 : index
    %7 = vector.load %arg6[%c0_5, %c0_6] : memref<1x16xf32, #tpu.memory_space<vmem>>, vector<1x16xf32>
    %cst_7 = arith.constant dense<0.000000e+00> : vector<16xf32>
    %8 = vector.multi_reduction <add>, %6, %cst_7 [0] : vector<256x16xf32> to vector<16xf32>
    %9 = vector.shape_cast %8 : vector<16xf32> to vector<1x16xf32>
    %10 = arith.addf %7, %9 : vector<1x16xf32>
    %c0_8 = arith.constant 0 : index
    %c0_9 = arith.constant 0 : index
    %11 = vector.load %arg6[%c0_8, %c0_9] : memref<1x16xf32, #tpu.memory_space<vmem>>, vector<1x16xf32>
    tpu.vector_store %arg6[%c0_8, %c0_9], %10 {strides = array<i32>} : memref<1x16xf32, #tpu.memory_space<vmem>>, vector<1x16xf32>,
    %c0_10 = arith.constant 0 : index
    %c0_11 = arith.constant 0 : index
    %12 = vector.load %arg7[%c0_10, %c0_11] : memref<1x16xf32, #tpu.memory_space<vmem>>, vector<1x16xf32>
    %13 = arith.mulf %6, %6 : vector<256x16xf32>
    %cst_12 = arith.constant dense<0.000000e+00> : vector<16xf32>
    %14 = vector.multi_reduction <add>, %13, %cst_12 [0] : vector<256x16xf32> to vector<16xf32>
    %15 = vector.shape_cast %14 : vector<16xf32> to vector<1x16xf32>
    %16 = arith.addf %12, %15 : vector<1x16xf32>
    %c0_13 = arith.constant 0 : index
    %c0_14 = arith.constant 0 : index
    %17 = vector.load %arg7[%c0_13, %c0_14] : memref<1x16xf32, #tpu.memory_space<vmem>>, vector<1x16xf32>
    tpu.vector_store %arg7[%c0_13, %c0_14], %16 {strides = array<i32>} : memref<1x16xf32, #tpu.memory_space<vmem>>, vector<1x16xf32>,
    %c256_i32 = arith.constant 256 : i32
    %18 = arith.muli %arg1, %c256_i32 : i32
    %19 = tpu.assume_multiple %18, 8 : i32
    %20 = arith.index_cast %19 : i32 to index
    %c0_15 = arith.constant 0 : index
    %21 = vector.load %arg8[%20, %c0_15] : memref<256x16xf32, #tpu.memory_space<vmem>>, vector<256x16xf32>
    tpu.vector_store %arg8[%20, %c0_15], %6 {strides = array<i32>} : memref<256x16xf32, #tpu.memory_space<vmem>>, vector<256x16xf32>,
    %c0_i32_16 = arith.constant 0 : i32
    %22 = arith.cmpi eq, %arg1, %c0_i32_16 : i32
    %23 = arith.extui %22 : i1 to i32
    %c0_i32_17 = arith.constant 0 : i32
    %24 = arith.cmpi ne, %23, %c0_i32_17 : i32
    scf.if %24 {
      %c0_18 = arith.constant 0 : index
      %c0_19 = arith.constant 0 : index
      %25 = vector.load %arg6[%c0_18, %c0_19] : memref<1x16xf32, #tpu.memory_space<vmem>>, vector<1x16xf32>
      %cst_20 = arith.constant 3.906250e-03 : f32
      %26 = vector.broadcast %cst_20 : f32 to vector<1x16xf32>
      %27 = arith.mulf %25, %26 : vector<1x16xf32>
      %c0_21 = arith.constant 0 : index
      %c0_22 = arith.constant 0 : index
      %28 = vector.load %arg7[%c0_21, %c0_22] : memref<1x16xf32, #tpu.memory_space<vmem>>, vector<1x16xf32>
      %cst_23 = arith.constant 3.906250e-03 : f32
      %29 = vector.broadcast %cst_23 : f32 to vector<1x16xf32>
      %30 = arith.mulf %28, %29 : vector<1x16xf32>
      %31 = arith.mulf %27, %27 : vector<1x16xf32>
      %32 = arith.subf %30, %31 : vector<1x16xf32>
      %cst_24 = arith.constant 0.000000e+00 : f32
      %33 = vector.broadcast %cst_24 : f32 to vector<1x16xf32>
      %34 = arith.maximumf %32, %33 : vector<1x16xf32>
      %c0_25 = arith.constant 0 : index
      %c0_26 = arith.constant 0 : index
      %35 = vector.load %arg4[%c0_25, %c0_26] : memref<2x16xf32, #tpu.memory_space<vmem>>, vector<1x16xf32>
      %cst_27 = arith.constant 9.99999974E-6 : f32
      %36 = vector.broadcast %cst_27 : f32 to vector<1x16xf32>
      %37 = arith.addf %34, %36 : vector<1x16xf32>
      %38 = math.rsqrt %37 : vector<1x16xf32>
      %39 = arith.mulf %35, %38 : vector<1x16xf32>
      %c1 = arith.constant 1 : index
      %c0_28 = arith.constant 0 : index
      %40 = vector.load %arg4[%c1, %c0_28] : memref<2x16xf32, #tpu.memory_space<vmem>>, vector<1x16xf32>
      %41 = arith.mulf %27, %39 : vector<1x16xf32>
      %42 = arith.subf %40, %41 : vector<1x16xf32>
      %c0_29 = arith.constant 0 : index
      %c0_30 = arith.constant 0 : index
      %43 = vector.load %arg8[%c0_29, %c0_30] : memref<256x16xf32, #tpu.memory_space<vmem>>, vector<256x16xf32>
      %44 = vector.broadcast %39 : vector<1x16xf32> to vector<256x16xf32>
      %45 = arith.mulf %43, %44 : vector<256x16xf32>
      %46 = vector.broadcast %42 : vector<1x16xf32> to vector<256x16xf32>
      %47 = arith.addf %45, %46 : vector<256x16xf32>
      %cst_31 = arith.constant 0.000000e+00 : f32
      %48 = vector.broadcast %cst_31 : f32 to vector<256x16xf32>
      %49 = arith.maximumf %47, %48 : vector<256x16xf32>
      %50 = arith.truncf %49 : vector<256x16xf32> to vector<256x16xbf16>
      %c0_32 = arith.constant 0 : index
      %c0_33 = arith.constant 0 : index
      %c0_34 = arith.constant 0 : index
      %51 = vector.load %arg5[%c0_32, %c0_33, %c0_34] : memref<1x256x16xbf16, #tpu.memory_space<vmem>>, vector<1x256x16xbf16>
      %52 = vector.shape_cast %51 : vector<1x256x16xbf16> to vector<256x16xbf16>
      %53 = vector.shape_cast %50 : vector<256x16xbf16> to vector<1x256x16xbf16>
      tpu.vector_store %arg5[%c0_32, %c0_33, %c0_34], %53 {strides = array<i32>} : memref<1x256x16xbf16, #tpu.memory_space<vmem>>, vector<1x256x16xbf16>,
    } else {
    }
    return
  }
  func.func @transform_0(%arg0: i32, %arg1: i32) -> (i32, i32, i32) {
    %c0_i32 = arith.constant 0 : i32
    %c0_i32_0 = arith.constant 0 : i32
    return %arg0, %arg1, %c0_i32 : i32, i32, i32
  }
  func.func @transform_1(%arg0: i32, %arg1: i32) -> (i32, i32) {
    %c0_i32 = arith.constant 0 : i32
    %c0_i32_0 = arith.constant 0 : i32
    %c0_i32_1 = arith.constant 0 : i32
    return %c0_i32, %c0_i32_0 : i32, i32
  }
  func.func @transform_2(%arg0: i32, %arg1: i32) -> (i32, i32) {
    %c0_i32 = arith.constant 0 : i32
    %c0_i32_0 = arith.constant 0 : i32
    %c0_i32_1 = arith.constant 0 : i32
    return %c0_i32, %c0_i32_0 : i32, i32
  }
  func.func @transform_3(%arg0: i32, %arg1: i32) -> (i32, i32, i32) {
    %c0_i32 = arith.constant 0 : i32
    %c0_i32_0 = arith.constant 0 : i32
    %c0_i32_1 = arith.constant 0 : i32
    return %arg0, %c0_i32, %c0_i32_0 : i32, i32, i32
  }
}

module attributes {stable_mosaic.version = 11 : i64} {
  func.func @_matmul_in_kernel(%arg0: i32, %arg1: i32, %arg2: memref<1x64x144xbf16, #tpu.memory_space<vmem>>, %arg3: memref<144x32xbf16, #tpu.memory_space<vmem>>, %arg4: memref<2x32xf32, #tpu.memory_space<vmem>>, %arg5: memref<1x64x32xbf16, #tpu.memory_space<vmem>>, %arg6: memref<1x32xf32, #tpu.memory_space<vmem>>, %arg7: memref<1x32xf32, #tpu.memory_space<vmem>>, %arg8: memref<64x32xf32, #tpu.memory_space<vmem>>) attributes {dimension_semantics = [#tpu.dimension_semantics<parallel>, #tpu.dimension_semantics<arbitrary>], iteration_bounds = array<i64: 2, 1>, scalar_prefetch = 0 : i64, scratch_operands = 3 : i64, tpu.core_type = #tpu.core_type<tc>, window_params = [{transform_indices = @transform_0, window_bounds = array<i64: 1, 64, 144>}, {pipeline_mode = #tpu.pipeline_mode<synchronous>, transform_indices = @transform_1, window_bounds = array<i64: 144, 32>}, {pipeline_mode = #tpu.pipeline_mode<synchronous>, transform_indices = @transform_2, window_bounds = array<i64: 2, 32>}, {transform_indices = @transform_3, window_bounds = array<i64: 1, 64, 32>}]} {
    %c0_i32 = arith.constant 0 : i32
    %0 = arith.cmpi eq, %arg1, %c0_i32 : i32
    %1 = arith.extui %0 : i1 to i32
    %c0_i32_0 = arith.constant 0 : i32
    %2 = arith.cmpi ne, %1, %c0_i32_0 : i32
    scf.if %2 {
      %cst_18 = arith.constant 0.000000e+00 : f32
      %25 = vector.broadcast %cst_18 : f32 to vector<1x32xf32>
      %c0_19 = arith.constant 0 : index
      %c0_20 = arith.constant 0 : index
      %26 = vector.load %arg6[%c0_19, %c0_20] : memref<1x32xf32, #tpu.memory_space<vmem>>, vector<1x32xf32>
      tpu.vector_store %arg6[%c0_19, %c0_20], %25 {strides = array<i32>} : memref<1x32xf32, #tpu.memory_space<vmem>>, vector<1x32xf32>,
      %cst_21 = arith.constant 0.000000e+00 : f32
      %27 = vector.broadcast %cst_21 : f32 to vector<1x32xf32>
      %c0_22 = arith.constant 0 : index
      %c0_23 = arith.constant 0 : index
      %28 = vector.load %arg7[%c0_22, %c0_23] : memref<1x32xf32, #tpu.memory_space<vmem>>, vector<1x32xf32>
      tpu.vector_store %arg7[%c0_22, %c0_23], %27 {strides = array<i32>} : memref<1x32xf32, #tpu.memory_space<vmem>>, vector<1x32xf32>,
    } else {
    }
    %c0 = arith.constant 0 : index
    %c0_1 = arith.constant 0 : index
    %c0_2 = arith.constant 0 : index
    %3 = vector.load %arg2[%c0, %c0_1, %c0_2] : memref<1x64x144xbf16, #tpu.memory_space<vmem>>, vector<1x64x144xbf16>
    %4 = vector.shape_cast %3 : vector<1x64x144xbf16> to vector<64x144xbf16>
    %c0_3 = arith.constant 0 : index
    %c0_4 = arith.constant 0 : index
    %5 = vector.load %arg3[%c0_3, %c0_4] : memref<144x32xbf16, #tpu.memory_space<vmem>>, vector<144x32xbf16>
    %cst = arith.constant dense<0.000000e+00> : vector<64x32xf32>
    %6 = tpu.matmul %4, %5, %cst {dimension_numbers = #tpu.dot_dimension_numbers<[1], [0], [0], [1], [0, 0, 1, 1], [], []>} : vector<64x144xbf16>, vector<144x32xbf16>, vector<64x32xf32> -> vector<64x32xf32>
    %c0_5 = arith.constant 0 : index
    %c0_6 = arith.constant 0 : index
    %7 = vector.load %arg6[%c0_5, %c0_6] : memref<1x32xf32, #tpu.memory_space<vmem>>, vector<1x32xf32>
    %cst_7 = arith.constant dense<0.000000e+00> : vector<32xf32>
    %8 = vector.multi_reduction <add>, %6, %cst_7 [0] : vector<64x32xf32> to vector<32xf32>
    %9 = vector.shape_cast %8 : vector<32xf32> to vector<1x32xf32>
    %10 = arith.addf %7, %9 : vector<1x32xf32>
    %c0_8 = arith.constant 0 : index
    %c0_9 = arith.constant 0 : index
    %11 = vector.load %arg6[%c0_8, %c0_9] : memref<1x32xf32, #tpu.memory_space<vmem>>, vector<1x32xf32>
    tpu.vector_store %arg6[%c0_8, %c0_9], %10 {strides = array<i32>} : memref<1x32xf32, #tpu.memory_space<vmem>>, vector<1x32xf32>,
    %c0_10 = arith.constant 0 : index
    %c0_11 = arith.constant 0 : index
    %12 = vector.load %arg7[%c0_10, %c0_11] : memref<1x32xf32, #tpu.memory_space<vmem>>, vector<1x32xf32>
    %13 = arith.mulf %6, %6 : vector<64x32xf32>
    %cst_12 = arith.constant dense<0.000000e+00> : vector<32xf32>
    %14 = vector.multi_reduction <add>, %13, %cst_12 [0] : vector<64x32xf32> to vector<32xf32>
    %15 = vector.shape_cast %14 : vector<32xf32> to vector<1x32xf32>
    %16 = arith.addf %12, %15 : vector<1x32xf32>
    %c0_13 = arith.constant 0 : index
    %c0_14 = arith.constant 0 : index
    %17 = vector.load %arg7[%c0_13, %c0_14] : memref<1x32xf32, #tpu.memory_space<vmem>>, vector<1x32xf32>
    tpu.vector_store %arg7[%c0_13, %c0_14], %16 {strides = array<i32>} : memref<1x32xf32, #tpu.memory_space<vmem>>, vector<1x32xf32>,
    %c64_i32 = arith.constant 64 : i32
    %18 = arith.muli %arg1, %c64_i32 : i32
    %19 = tpu.assume_multiple %18, 8 : i32
    %20 = arith.index_cast %19 : i32 to index
    %c0_15 = arith.constant 0 : index
    %21 = vector.load %arg8[%20, %c0_15] : memref<64x32xf32, #tpu.memory_space<vmem>>, vector<64x32xf32>
    tpu.vector_store %arg8[%20, %c0_15], %6 {strides = array<i32>} : memref<64x32xf32, #tpu.memory_space<vmem>>, vector<64x32xf32>,
    %c0_i32_16 = arith.constant 0 : i32
    %22 = arith.cmpi eq, %arg1, %c0_i32_16 : i32
    %23 = arith.extui %22 : i1 to i32
    %c0_i32_17 = arith.constant 0 : i32
    %24 = arith.cmpi ne, %23, %c0_i32_17 : i32
    scf.if %24 {
      %c0_18 = arith.constant 0 : index
      %c0_19 = arith.constant 0 : index
      %25 = vector.load %arg6[%c0_18, %c0_19] : memref<1x32xf32, #tpu.memory_space<vmem>>, vector<1x32xf32>
      %cst_20 = arith.constant 1.562500e-02 : f32
      %26 = vector.broadcast %cst_20 : f32 to vector<1x32xf32>
      %27 = arith.mulf %25, %26 : vector<1x32xf32>
      %c0_21 = arith.constant 0 : index
      %c0_22 = arith.constant 0 : index
      %28 = vector.load %arg7[%c0_21, %c0_22] : memref<1x32xf32, #tpu.memory_space<vmem>>, vector<1x32xf32>
      %cst_23 = arith.constant 1.562500e-02 : f32
      %29 = vector.broadcast %cst_23 : f32 to vector<1x32xf32>
      %30 = arith.mulf %28, %29 : vector<1x32xf32>
      %31 = arith.mulf %27, %27 : vector<1x32xf32>
      %32 = arith.subf %30, %31 : vector<1x32xf32>
      %cst_24 = arith.constant 0.000000e+00 : f32
      %33 = vector.broadcast %cst_24 : f32 to vector<1x32xf32>
      %34 = arith.maximumf %32, %33 : vector<1x32xf32>
      %c0_25 = arith.constant 0 : index
      %c0_26 = arith.constant 0 : index
      %35 = vector.load %arg4[%c0_25, %c0_26] : memref<2x32xf32, #tpu.memory_space<vmem>>, vector<1x32xf32>
      %cst_27 = arith.constant 9.99999974E-6 : f32
      %36 = vector.broadcast %cst_27 : f32 to vector<1x32xf32>
      %37 = arith.addf %34, %36 : vector<1x32xf32>
      %38 = math.rsqrt %37 : vector<1x32xf32>
      %39 = arith.mulf %35, %38 : vector<1x32xf32>
      %c1 = arith.constant 1 : index
      %c0_28 = arith.constant 0 : index
      %40 = vector.load %arg4[%c1, %c0_28] : memref<2x32xf32, #tpu.memory_space<vmem>>, vector<1x32xf32>
      %41 = arith.mulf %27, %39 : vector<1x32xf32>
      %42 = arith.subf %40, %41 : vector<1x32xf32>
      %c0_29 = arith.constant 0 : index
      %c0_30 = arith.constant 0 : index
      %43 = vector.load %arg8[%c0_29, %c0_30] : memref<64x32xf32, #tpu.memory_space<vmem>>, vector<64x32xf32>
      %44 = vector.broadcast %39 : vector<1x32xf32> to vector<64x32xf32>
      %45 = arith.mulf %43, %44 : vector<64x32xf32>
      %46 = vector.broadcast %42 : vector<1x32xf32> to vector<64x32xf32>
      %47 = arith.addf %45, %46 : vector<64x32xf32>
      %cst_31 = arith.constant 0.000000e+00 : f32
      %48 = vector.broadcast %cst_31 : f32 to vector<64x32xf32>
      %49 = arith.maximumf %47, %48 : vector<64x32xf32>
      %50 = arith.truncf %49 : vector<64x32xf32> to vector<64x32xbf16>
      %c0_32 = arith.constant 0 : index
      %c0_33 = arith.constant 0 : index
      %c0_34 = arith.constant 0 : index
      %51 = vector.load %arg5[%c0_32, %c0_33, %c0_34] : memref<1x64x32xbf16, #tpu.memory_space<vmem>>, vector<1x64x32xbf16>
      %52 = vector.shape_cast %51 : vector<1x64x32xbf16> to vector<64x32xbf16>
      %53 = vector.shape_cast %50 : vector<64x32xbf16> to vector<1x64x32xbf16>
      tpu.vector_store %arg5[%c0_32, %c0_33, %c0_34], %53 {strides = array<i32>} : memref<1x64x32xbf16, #tpu.memory_space<vmem>>, vector<1x64x32xbf16>,
    } else {
    }
    return
  }
  func.func @transform_0(%arg0: i32, %arg1: i32) -> (i32, i32, i32) {
    %c0_i32 = arith.constant 0 : i32
    %c0_i32_0 = arith.constant 0 : i32
    return %arg0, %arg1, %c0_i32 : i32, i32, i32
  }
  func.func @transform_1(%arg0: i32, %arg1: i32) -> (i32, i32) {
    %c0_i32 = arith.constant 0 : i32
    %c0_i32_0 = arith.constant 0 : i32
    %c0_i32_1 = arith.constant 0 : i32
    return %c0_i32, %c0_i32_0 : i32, i32
  }
  func.func @transform_2(%arg0: i32, %arg1: i32) -> (i32, i32) {
    %c0_i32 = arith.constant 0 : i32
    %c0_i32_0 = arith.constant 0 : i32
    %c0_i32_1 = arith.constant 0 : i32
    return %c0_i32, %c0_i32_0 : i32, i32
  }
  func.func @transform_3(%arg0: i32, %arg1: i32) -> (i32, i32, i32) {
    %c0_i32 = arith.constant 0 : i32
    %c0_i32_0 = arith.constant 0 : i32
    %c0_i32_1 = arith.constant 0 : i32
    return %arg0, %c0_i32, %c0_i32_0 : i32, i32, i32
  }
}

module attributes {stable_mosaic.version = 11 : i64} {
  func.func @_matmul_in_kernel(%arg0: i32, %arg1: i32, %arg2: memref<1x16x288xbf16, #tpu.memory_space<vmem>>, %arg3: memref<288x64xbf16, #tpu.memory_space<vmem>>, %arg4: memref<2x64xf32, #tpu.memory_space<vmem>>, %arg5: memref<1x16x64xbf16, #tpu.memory_space<vmem>>, %arg6: memref<1x64xf32, #tpu.memory_space<vmem>>, %arg7: memref<1x64xf32, #tpu.memory_space<vmem>>, %arg8: memref<16x64xf32, #tpu.memory_space<vmem>>) attributes {dimension_semantics = [#tpu.dimension_semantics<parallel>, #tpu.dimension_semantics<arbitrary>], iteration_bounds = array<i64: 2, 1>, scalar_prefetch = 0 : i64, scratch_operands = 3 : i64, tpu.core_type = #tpu.core_type<tc>, window_params = [{transform_indices = @transform_0, window_bounds = array<i64: 1, 16, 288>}, {pipeline_mode = #tpu.pipeline_mode<synchronous>, transform_indices = @transform_1, window_bounds = array<i64: 288, 64>}, {pipeline_mode = #tpu.pipeline_mode<synchronous>, transform_indices = @transform_2, window_bounds = array<i64: 2, 64>}, {transform_indices = @transform_3, window_bounds = array<i64: 1, 16, 64>}]} {
    %c0_i32 = arith.constant 0 : i32
    %0 = arith.cmpi eq, %arg1, %c0_i32 : i32
    %1 = arith.extui %0 : i1 to i32
    %c0_i32_0 = arith.constant 0 : i32
    %2 = arith.cmpi ne, %1, %c0_i32_0 : i32
    scf.if %2 {
      %cst_18 = arith.constant 0.000000e+00 : f32
      %25 = vector.broadcast %cst_18 : f32 to vector<1x64xf32>
      %c0_19 = arith.constant 0 : index
      %c0_20 = arith.constant 0 : index
      %26 = vector.load %arg6[%c0_19, %c0_20] : memref<1x64xf32, #tpu.memory_space<vmem>>, vector<1x64xf32>
      tpu.vector_store %arg6[%c0_19, %c0_20], %25 {strides = array<i32>} : memref<1x64xf32, #tpu.memory_space<vmem>>, vector<1x64xf32>,
      %cst_21 = arith.constant 0.000000e+00 : f32
      %27 = vector.broadcast %cst_21 : f32 to vector<1x64xf32>
      %c0_22 = arith.constant 0 : index
      %c0_23 = arith.constant 0 : index
      %28 = vector.load %arg7[%c0_22, %c0_23] : memref<1x64xf32, #tpu.memory_space<vmem>>, vector<1x64xf32>
      tpu.vector_store %arg7[%c0_22, %c0_23], %27 {strides = array<i32>} : memref<1x64xf32, #tpu.memory_space<vmem>>, vector<1x64xf32>,
    } else {
    }
    %c0 = arith.constant 0 : index
    %c0_1 = arith.constant 0 : index
    %c0_2 = arith.constant 0 : index
    %3 = vector.load %arg2[%c0, %c0_1, %c0_2] : memref<1x16x288xbf16, #tpu.memory_space<vmem>>, vector<1x16x288xbf16>
    %4 = vector.shape_cast %3 : vector<1x16x288xbf16> to vector<16x288xbf16>
    %c0_3 = arith.constant 0 : index
    %c0_4 = arith.constant 0 : index
    %5 = vector.load %arg3[%c0_3, %c0_4] : memref<288x64xbf16, #tpu.memory_space<vmem>>, vector<288x64xbf16>
    %cst = arith.constant dense<0.000000e+00> : vector<16x64xf32>
    %6 = tpu.matmul %4, %5, %cst {dimension_numbers = #tpu.dot_dimension_numbers<[1], [0], [0], [1], [0, 0, 1, 1], [], []>} : vector<16x288xbf16>, vector<288x64xbf16>, vector<16x64xf32> -> vector<16x64xf32>
    %c0_5 = arith.constant 0 : index
    %c0_6 = arith.constant 0 : index
    %7 = vector.load %arg6[%c0_5, %c0_6] : memref<1x64xf32, #tpu.memory_space<vmem>>, vector<1x64xf32>
    %cst_7 = arith.constant dense<0.000000e+00> : vector<64xf32>
    %8 = vector.multi_reduction <add>, %6, %cst_7 [0] : vector<16x64xf32> to vector<64xf32>
    %9 = vector.shape_cast %8 : vector<64xf32> to vector<1x64xf32>
    %10 = arith.addf %7, %9 : vector<1x64xf32>
    %c0_8 = arith.constant 0 : index
    %c0_9 = arith.constant 0 : index
    %11 = vector.load %arg6[%c0_8, %c0_9] : memref<1x64xf32, #tpu.memory_space<vmem>>, vector<1x64xf32>
    tpu.vector_store %arg6[%c0_8, %c0_9], %10 {strides = array<i32>} : memref<1x64xf32, #tpu.memory_space<vmem>>, vector<1x64xf32>,
    %c0_10 = arith.constant 0 : index
    %c0_11 = arith.constant 0 : index
    %12 = vector.load %arg7[%c0_10, %c0_11] : memref<1x64xf32, #tpu.memory_space<vmem>>, vector<1x64xf32>
    %13 = arith.mulf %6, %6 : vector<16x64xf32>
    %cst_12 = arith.constant dense<0.000000e+00> : vector<64xf32>
    %14 = vector.multi_reduction <add>, %13, %cst_12 [0] : vector<16x64xf32> to vector<64xf32>
    %15 = vector.shape_cast %14 : vector<64xf32> to vector<1x64xf32>
    %16 = arith.addf %12, %15 : vector<1x64xf32>
    %c0_13 = arith.constant 0 : index
    %c0_14 = arith.constant 0 : index
    %17 = vector.load %arg7[%c0_13, %c0_14] : memref<1x64xf32, #tpu.memory_space<vmem>>, vector<1x64xf32>
    tpu.vector_store %arg7[%c0_13, %c0_14], %16 {strides = array<i32>} : memref<1x64xf32, #tpu.memory_space<vmem>>, vector<1x64xf32>,
    %c16_i32 = arith.constant 16 : i32
    %18 = arith.muli %arg1, %c16_i32 : i32
    %19 = tpu.assume_multiple %18, 8 : i32
    %20 = arith.index_cast %19 : i32 to index
    %c0_15 = arith.constant 0 : index
    %21 = vector.load %arg8[%20, %c0_15] : memref<16x64xf32, #tpu.memory_space<vmem>>, vector<16x64xf32>
    tpu.vector_store %arg8[%20, %c0_15], %6 {strides = array<i32>} : memref<16x64xf32, #tpu.memory_space<vmem>>, vector<16x64xf32>,
    %c0_i32_16 = arith.constant 0 : i32
    %22 = arith.cmpi eq, %arg1, %c0_i32_16 : i32
    %23 = arith.extui %22 : i1 to i32
    %c0_i32_17 = arith.constant 0 : i32
    %24 = arith.cmpi ne, %23, %c0_i32_17 : i32
    scf.if %24 {
      %c0_18 = arith.constant 0 : index
      %c0_19 = arith.constant 0 : index
      %25 = vector.load %arg6[%c0_18, %c0_19] : memref<1x64xf32, #tpu.memory_space<vmem>>, vector<1x64xf32>
      %cst_20 = arith.constant 6.250000e-02 : f32
      %26 = vector.broadcast %cst_20 : f32 to vector<1x64xf32>
      %27 = arith.mulf %25, %26 : vector<1x64xf32>
      %c0_21 = arith.constant 0 : index
      %c0_22 = arith.constant 0 : index
      %28 = vector.load %arg7[%c0_21, %c0_22] : memref<1x64xf32, #tpu.memory_space<vmem>>, vector<1x64xf32>
      %cst_23 = arith.constant 6.250000e-02 : f32
      %29 = vector.broadcast %cst_23 : f32 to vector<1x64xf32>
      %30 = arith.mulf %28, %29 : vector<1x64xf32>
      %31 = arith.mulf %27, %27 : vector<1x64xf32>
      %32 = arith.subf %30, %31 : vector<1x64xf32>
      %cst_24 = arith.constant 0.000000e+00 : f32
      %33 = vector.broadcast %cst_24 : f32 to vector<1x64xf32>
      %34 = arith.maximumf %32, %33 : vector<1x64xf32>
      %c0_25 = arith.constant 0 : index
      %c0_26 = arith.constant 0 : index
      %35 = vector.load %arg4[%c0_25, %c0_26] : memref<2x64xf32, #tpu.memory_space<vmem>>, vector<1x64xf32>
      %cst_27 = arith.constant 9.99999974E-6 : f32
      %36 = vector.broadcast %cst_27 : f32 to vector<1x64xf32>
      %37 = arith.addf %34, %36 : vector<1x64xf32>
      %38 = math.rsqrt %37 : vector<1x64xf32>
      %39 = arith.mulf %35, %38 : vector<1x64xf32>
      %c1 = arith.constant 1 : index
      %c0_28 = arith.constant 0 : index
      %40 = vector.load %arg4[%c1, %c0_28] : memref<2x64xf32, #tpu.memory_space<vmem>>, vector<1x64xf32>
      %41 = arith.mulf %27, %39 : vector<1x64xf32>
      %42 = arith.subf %40, %41 : vector<1x64xf32>
      %c0_29 = arith.constant 0 : index
      %c0_30 = arith.constant 0 : index
      %43 = vector.load %arg8[%c0_29, %c0_30] : memref<16x64xf32, #tpu.memory_space<vmem>>, vector<16x64xf32>
      %44 = vector.broadcast %39 : vector<1x64xf32> to vector<16x64xf32>
      %45 = arith.mulf %43, %44 : vector<16x64xf32>
      %46 = vector.broadcast %42 : vector<1x64xf32> to vector<16x64xf32>
      %47 = arith.addf %45, %46 : vector<16x64xf32>
      %cst_31 = arith.constant 0.000000e+00 : f32
      %48 = vector.broadcast %cst_31 : f32 to vector<16x64xf32>
      %49 = arith.maximumf %47, %48 : vector<16x64xf32>
      %50 = arith.truncf %49 : vector<16x64xf32> to vector<16x64xbf16>
      %c0_32 = arith.constant 0 : index
      %c0_33 = arith.constant 0 : index
      %c0_34 = arith.constant 0 : index
      %51 = vector.load %arg5[%c0_32, %c0_33, %c0_34] : memref<1x16x64xbf16, #tpu.memory_space<vmem>>, vector<1x16x64xbf16>
      %52 = vector.shape_cast %51 : vector<1x16x64xbf16> to vector<16x64xbf16>
      %53 = vector.shape_cast %50 : vector<16x64xbf16> to vector<1x16x64xbf16>
      tpu.vector_store %arg5[%c0_32, %c0_33, %c0_34], %53 {strides = array<i32>} : memref<1x16x64xbf16, #tpu.memory_space<vmem>>, vector<1x16x64xbf16>,
    } else {
    }
    return
  }
  func.func @transform_0(%arg0: i32, %arg1: i32) -> (i32, i32, i32) {
    %c0_i32 = arith.constant 0 : i32
    %c0_i32_0 = arith.constant 0 : i32
    return %arg0, %arg1, %c0_i32 : i32, i32, i32
  }
  func.func @transform_1(%arg0: i32, %arg1: i32) -> (i32, i32) {
    %c0_i32 = arith.constant 0 : i32
    %c0_i32_0 = arith.constant 0 : i32
    %c0_i32_1 = arith.constant 0 : i32
    return %c0_i32, %c0_i32_0 : i32, i32
  }
  func.func @transform_2(%arg0: i32, %arg1: i32) -> (i32, i32) {
    %c0_i32 = arith.constant 0 : i32
    %c0_i32_0 = arith.constant 0 : i32
    %c0_i32_1 = arith.constant 0 : i32
    return %c0_i32, %c0_i32_0 : i32, i32
  }
  func.func @transform_3(%arg0: i32, %arg1: i32) -> (i32, i32, i32) {
    %c0_i32 = arith.constant 0 : i32
    %c0_i32_0 = arith.constant 0 : i32
    %c0_i32_1 = arith.constant 0 : i32
    return %arg0, %c0_i32, %c0_i32_0 : i32, i32, i32
  }
}

module attributes {stable_mosaic.version = 11 : i64} {
  func.func @_shifted_conv3_in_kernel(%arg0: i32, %arg1: memref<1x42x64xbf16, #tpu.memory_space<vmem>>, %arg2: memref<9x64x64xbf16, #tpu.memory_space<vmem>>, %arg3: memref<2x64xf32, #tpu.memory_space<vmem>>, %arg4: memref<24x1xf32, #tpu.memory_space<vmem>>, %arg5: memref<1x24x64xbf16, #tpu.memory_space<vmem>>) attributes {dimension_semantics = [#tpu.dimension_semantics<parallel>], iteration_bounds = array<i64: 2>, scalar_prefetch = 0 : i64, scratch_operands = 0 : i64, tpu.core_type = #tpu.core_type<tc>, window_params = [{transform_indices = @transform_0, window_bounds = array<i64: 1, 42, 64>}, {pipeline_mode = #tpu.pipeline_mode<synchronous>, transform_indices = @transform_1, window_bounds = array<i64: 9, 64, 64>}, {pipeline_mode = #tpu.pipeline_mode<synchronous>, transform_indices = @transform_2, window_bounds = array<i64: 2, 64>}, {pipeline_mode = #tpu.pipeline_mode<synchronous>, transform_indices = @transform_3, window_bounds = array<i64: 24, 1>}, {transform_indices = @transform_4, window_bounds = array<i64: 1, 24, 64>}]} {
    %c0 = arith.constant 0 : index
    %c0_0 = arith.constant 0 : index
    %c0_1 = arith.constant 0 : index
    %0 = vector.load %arg1[%c0, %c0_0, %c0_1] : memref<1x42x64xbf16, #tpu.memory_space<vmem>>, vector<1x24x64xbf16>
    %1 = vector.shape_cast %0 : vector<1x24x64xbf16> to vector<24x64xbf16>
    %c0_2 = arith.constant 0 : index
    %c0_3 = arith.constant 0 : index
    %c0_4 = arith.constant 0 : index
    %2 = vector.load %arg2[%c0_2, %c0_3, %c0_4] : memref<9x64x64xbf16, #tpu.memory_space<vmem>>, vector<1x64x64xbf16>
    %3 = vector.shape_cast %2 : vector<1x64x64xbf16> to vector<64x64xbf16>
    %cst = arith.constant dense<0.000000e+00> : vector<24x64xf32>
    %4 = tpu.matmul %1, %3, %cst {dimension_numbers = #tpu.dot_dimension_numbers<[1], [0], [0], [1], [0, 0, 1, 1], [], []>} : vector<24x64xbf16>, vector<64x64xbf16>, vector<24x64xf32> -> vector<24x64xf32>
    %c0_5 = arith.constant 0 : index
    %c1 = arith.constant 1 : index
    %c0_6 = arith.constant 0 : index
    %5 = vector.load %arg1[%c0_5, %c1, %c0_6] : memref<1x42x64xbf16, #tpu.memory_space<vmem>>, vector<1x24x64xbf16>
    %6 = vector.shape_cast %5 : vector<1x24x64xbf16> to vector<24x64xbf16>
    %c1_7 = arith.constant 1 : index
    %c0_8 = arith.constant 0 : index
    %c0_9 = arith.constant 0 : index
    %7 = vector.load %arg2[%c1_7, %c0_8, %c0_9] : memref<9x64x64xbf16, #tpu.memory_space<vmem>>, vector<1x64x64xbf16>
    %8 = vector.shape_cast %7 : vector<1x64x64xbf16> to vector<64x64xbf16>
    %cst_10 = arith.constant dense<0.000000e+00> : vector<24x64xf32>
    %9 = tpu.matmul %6, %8, %cst_10 {dimension_numbers = #tpu.dot_dimension_numbers<[1], [0], [0], [1], [0, 0, 1, 1], [], []>} : vector<24x64xbf16>, vector<64x64xbf16>, vector<24x64xf32> -> vector<24x64xf32>
    %10 = arith.addf %4, %9 : vector<24x64xf32>
    %c0_11 = arith.constant 0 : index
    %c2 = arith.constant 2 : index
    %c0_12 = arith.constant 0 : index
    %11 = vector.load %arg1[%c0_11, %c2, %c0_12] : memref<1x42x64xbf16, #tpu.memory_space<vmem>>, vector<1x24x64xbf16>
    %12 = vector.shape_cast %11 : vector<1x24x64xbf16> to vector<24x64xbf16>
    %c2_13 = arith.constant 2 : index
    %c0_14 = arith.constant 0 : index
    %c0_15 = arith.constant 0 : index
    %13 = vector.load %arg2[%c2_13, %c0_14, %c0_15] : memref<9x64x64xbf16, #tpu.memory_space<vmem>>, vector<1x64x64xbf16>
    %14 = vector.shape_cast %13 : vector<1x64x64xbf16> to vector<64x64xbf16>
    %cst_16 = arith.constant dense<0.000000e+00> : vector<24x64xf32>
    %15 = tpu.matmul %12, %14, %cst_16 {dimension_numbers = #tpu.dot_dimension_numbers<[1], [0], [0], [1], [0, 0, 1, 1], [], []>} : vector<24x64xbf16>, vector<64x64xbf16>, vector<24x64xf32> -> vector<24x64xf32>
    %16 = arith.addf %10, %15 : vector<24x64xf32>
    %c0_17 = arith.constant 0 : index
    %c6 = arith.constant 6 : index
    %c0_18 = arith.constant 0 : index
    %17 = vector.load %arg1[%c0_17, %c6, %c0_18] : memref<1x42x64xbf16, #tpu.memory_space<vmem>>, vector<1x24x64xbf16>
    %18 = vector.shape_cast %17 : vector<1x24x64xbf16> to vector<24x64xbf16>
    %c3 = arith.constant 3 : index
    %c0_19 = arith.constant 0 : index
    %c0_20 = arith.constant 0 : index
    %19 = vector.load %arg2[%c3, %c0_19, %c0_20] : memref<9x64x64xbf16, #tpu.memory_space<vmem>>, vector<1x64x64xbf16>
    %20 = vector.shape_cast %19 : vector<1x64x64xbf16> to vector<64x64xbf16>
    %cst_21 = arith.constant dense<0.000000e+00> : vector<24x64xf32>
    %21 = tpu.matmul %18, %20, %cst_21 {dimension_numbers = #tpu.dot_dimension_numbers<[1], [0], [0], [1], [0, 0, 1, 1], [], []>} : vector<24x64xbf16>, vector<64x64xbf16>, vector<24x64xf32> -> vector<24x64xf32>
    %22 = arith.addf %16, %21 : vector<24x64xf32>
    %c0_22 = arith.constant 0 : index
    %c7 = arith.constant 7 : index
    %c0_23 = arith.constant 0 : index
    %23 = vector.load %arg1[%c0_22, %c7, %c0_23] : memref<1x42x64xbf16, #tpu.memory_space<vmem>>, vector<1x24x64xbf16>
    %24 = vector.shape_cast %23 : vector<1x24x64xbf16> to vector<24x64xbf16>
    %c4 = arith.constant 4 : index
    %c0_24 = arith.constant 0 : index
    %c0_25 = arith.constant 0 : index
    %25 = vector.load %arg2[%c4, %c0_24, %c0_25] : memref<9x64x64xbf16, #tpu.memory_space<vmem>>, vector<1x64x64xbf16>
    %26 = vector.shape_cast %25 : vector<1x64x64xbf16> to vector<64x64xbf16>
    %cst_26 = arith.constant dense<0.000000e+00> : vector<24x64xf32>
    %27 = tpu.matmul %24, %26, %cst_26 {dimension_numbers = #tpu.dot_dimension_numbers<[1], [0], [0], [1], [0, 0, 1, 1], [], []>} : vector<24x64xbf16>, vector<64x64xbf16>, vector<24x64xf32> -> vector<24x64xf32>
    %28 = arith.addf %22, %27 : vector<24x64xf32>
    %c0_27 = arith.constant 0 : index
    %c8 = arith.constant 8 : index
    %c0_28 = arith.constant 0 : index
    %29 = vector.load %arg1[%c0_27, %c8, %c0_28] : memref<1x42x64xbf16, #tpu.memory_space<vmem>>, vector<1x24x64xbf16>
    %30 = vector.shape_cast %29 : vector<1x24x64xbf16> to vector<24x64xbf16>
    %c5 = arith.constant 5 : index
    %c0_29 = arith.constant 0 : index
    %c0_30 = arith.constant 0 : index
    %31 = vector.load %arg2[%c5, %c0_29, %c0_30] : memref<9x64x64xbf16, #tpu.memory_space<vmem>>, vector<1x64x64xbf16>
    %32 = vector.shape_cast %31 : vector<1x64x64xbf16> to vector<64x64xbf16>
    %cst_31 = arith.constant dense<0.000000e+00> : vector<24x64xf32>
    %33 = tpu.matmul %30, %32, %cst_31 {dimension_numbers = #tpu.dot_dimension_numbers<[1], [0], [0], [1], [0, 0, 1, 1], [], []>} : vector<24x64xbf16>, vector<64x64xbf16>, vector<24x64xf32> -> vector<24x64xf32>
    %34 = arith.addf %28, %33 : vector<24x64xf32>
    %c0_32 = arith.constant 0 : index
    %c12 = arith.constant 12 : index
    %c0_33 = arith.constant 0 : index
    %35 = vector.load %arg1[%c0_32, %c12, %c0_33] : memref<1x42x64xbf16, #tpu.memory_space<vmem>>, vector<1x24x64xbf16>
    %36 = vector.shape_cast %35 : vector<1x24x64xbf16> to vector<24x64xbf16>
    %c6_34 = arith.constant 6 : index
    %c0_35 = arith.constant 0 : index
    %c0_36 = arith.constant 0 : index
    %37 = vector.load %arg2[%c6_34, %c0_35, %c0_36] : memref<9x64x64xbf16, #tpu.memory_space<vmem>>, vector<1x64x64xbf16>
    %38 = vector.shape_cast %37 : vector<1x64x64xbf16> to vector<64x64xbf16>
    %cst_37 = arith.constant dense<0.000000e+00> : vector<24x64xf32>
    %39 = tpu.matmul %36, %38, %cst_37 {dimension_numbers = #tpu.dot_dimension_numbers<[1], [0], [0], [1], [0, 0, 1, 1], [], []>} : vector<24x64xbf16>, vector<64x64xbf16>, vector<24x64xf32> -> vector<24x64xf32>
    %40 = arith.addf %34, %39 : vector<24x64xf32>
    %c0_38 = arith.constant 0 : index
    %c13 = arith.constant 13 : index
    %c0_39 = arith.constant 0 : index
    %41 = vector.load %arg1[%c0_38, %c13, %c0_39] : memref<1x42x64xbf16, #tpu.memory_space<vmem>>, vector<1x24x64xbf16>
    %42 = vector.shape_cast %41 : vector<1x24x64xbf16> to vector<24x64xbf16>
    %c7_40 = arith.constant 7 : index
    %c0_41 = arith.constant 0 : index
    %c0_42 = arith.constant 0 : index
    %43 = vector.load %arg2[%c7_40, %c0_41, %c0_42] : memref<9x64x64xbf16, #tpu.memory_space<vmem>>, vector<1x64x64xbf16>
    %44 = vector.shape_cast %43 : vector<1x64x64xbf16> to vector<64x64xbf16>
    %cst_43 = arith.constant dense<0.000000e+00> : vector<24x64xf32>
    %45 = tpu.matmul %42, %44, %cst_43 {dimension_numbers = #tpu.dot_dimension_numbers<[1], [0], [0], [1], [0, 0, 1, 1], [], []>} : vector<24x64xbf16>, vector<64x64xbf16>, vector<24x64xf32> -> vector<24x64xf32>
    %46 = arith.addf %40, %45 : vector<24x64xf32>
    %c0_44 = arith.constant 0 : index
    %c14 = arith.constant 14 : index
    %c0_45 = arith.constant 0 : index
    %47 = vector.load %arg1[%c0_44, %c14, %c0_45] : memref<1x42x64xbf16, #tpu.memory_space<vmem>>, vector<1x24x64xbf16>
    %48 = vector.shape_cast %47 : vector<1x24x64xbf16> to vector<24x64xbf16>
    %c8_46 = arith.constant 8 : index
    %c0_47 = arith.constant 0 : index
    %c0_48 = arith.constant 0 : index
    %49 = vector.load %arg2[%c8_46, %c0_47, %c0_48] : memref<9x64x64xbf16, #tpu.memory_space<vmem>>, vector<1x64x64xbf16>
    %50 = vector.shape_cast %49 : vector<1x64x64xbf16> to vector<64x64xbf16>
    %cst_49 = arith.constant dense<0.000000e+00> : vector<24x64xf32>
    %51 = tpu.matmul %48, %50, %cst_49 {dimension_numbers = #tpu.dot_dimension_numbers<[1], [0], [0], [1], [0, 0, 1, 1], [], []>} : vector<24x64xbf16>, vector<64x64xbf16>, vector<24x64xf32> -> vector<24x64xf32>
    %52 = arith.addf %46, %51 : vector<24x64xf32>
    %c0_50 = arith.constant 0 : index
    %c0_51 = arith.constant 0 : index
    %53 = vector.load %arg4[%c0_50, %c0_51] : memref<24x1xf32, #tpu.memory_space<vmem>>, vector<24x1xf32>
    %54 = vector.broadcast %53 : vector<24x1xf32> to vector<24x64xf32>
    %55 = arith.mulf %52, %54 : vector<24x64xf32>
    %cst_52 = arith.constant dense<0.000000e+00> : vector<64xf32>
    %56 = vector.multi_reduction <add>, %55, %cst_52 [0] : vector<24x64xf32> to vector<64xf32>
    %57 = vector.shape_cast %56 : vector<64xf32> to vector<1x64xf32>
    %58 = arith.mulf %52, %52 : vector<24x64xf32>
    %59 = vector.broadcast %53 : vector<24x1xf32> to vector<24x64xf32>
    %60 = arith.mulf %58, %59 : vector<24x64xf32>
    %cst_53 = arith.constant dense<0.000000e+00> : vector<64xf32>
    %61 = vector.multi_reduction <add>, %60, %cst_53 [0] : vector<24x64xf32> to vector<64xf32>
    %62 = vector.shape_cast %61 : vector<64xf32> to vector<1x64xf32>
    %cst_54 = arith.constant 6.250000e-02 : f32
    %63 = vector.broadcast %cst_54 : f32 to vector<1x64xf32>
    %64 = arith.mulf %57, %63 : vector<1x64xf32>
    %cst_55 = arith.constant 6.250000e-02 : f32
    %65 = vector.broadcast %cst_55 : f32 to vector<1x64xf32>
    %66 = arith.mulf %62, %65 : vector<1x64xf32>
    %67 = arith.mulf %64, %64 : vector<1x64xf32>
    %68 = arith.subf %66, %67 : vector<1x64xf32>
    %cst_56 = arith.constant 0.000000e+00 : f32
    %69 = vector.broadcast %cst_56 : f32 to vector<1x64xf32>
    %70 = arith.maximumf %68, %69 : vector<1x64xf32>
    %c0_57 = arith.constant 0 : index
    %c0_58 = arith.constant 0 : index
    %71 = vector.load %arg3[%c0_57, %c0_58] : memref<2x64xf32, #tpu.memory_space<vmem>>, vector<1x64xf32>
    %cst_59 = arith.constant 9.99999974E-6 : f32
    %72 = vector.broadcast %cst_59 : f32 to vector<1x64xf32>
    %73 = arith.addf %70, %72 : vector<1x64xf32>
    %74 = math.rsqrt %73 : vector<1x64xf32>
    %75 = arith.mulf %71, %74 : vector<1x64xf32>
    %c1_60 = arith.constant 1 : index
    %c0_61 = arith.constant 0 : index
    %76 = vector.load %arg3[%c1_60, %c0_61] : memref<2x64xf32, #tpu.memory_space<vmem>>, vector<1x64xf32>
    %77 = arith.mulf %64, %75 : vector<1x64xf32>
    %78 = arith.subf %76, %77 : vector<1x64xf32>
    %79 = vector.broadcast %75 : vector<1x64xf32> to vector<24x64xf32>
    %80 = arith.mulf %52, %79 : vector<24x64xf32>
    %81 = vector.broadcast %78 : vector<1x64xf32> to vector<24x64xf32>
    %82 = arith.addf %80, %81 : vector<24x64xf32>
    %cst_62 = arith.constant 0.000000e+00 : f32
    %83 = vector.broadcast %cst_62 : f32 to vector<24x64xf32>
    %84 = arith.maximumf %82, %83 : vector<24x64xf32>
    %85 = arith.truncf %84 : vector<24x64xf32> to vector<24x64xbf16>
    %c0_63 = arith.constant 0 : index
    %c0_64 = arith.constant 0 : index
    %c0_65 = arith.constant 0 : index
    %86 = vector.load %arg5[%c0_63, %c0_64, %c0_65] : memref<1x24x64xbf16, #tpu.memory_space<vmem>>, vector<1x24x64xbf16>
    %87 = vector.shape_cast %86 : vector<1x24x64xbf16> to vector<24x64xbf16>
    %88 = vector.shape_cast %85 : vector<24x64xbf16> to vector<1x24x64xbf16>
    tpu.vector_store %arg5[%c0_63, %c0_64, %c0_65], %88 {strides = array<i32>} : memref<1x24x64xbf16, #tpu.memory_space<vmem>>, vector<1x24x64xbf16>,
    return
  }
  func.func @transform_0(%arg0: i32) -> (i32, i32, i32) {
    %c0_i32 = arith.constant 0 : i32
    %c0_i32_0 = arith.constant 0 : i32
    %c0_i32_1 = arith.constant 0 : i32
    return %arg0, %c0_i32, %c0_i32_0 : i32, i32, i32
  }
  func.func @transform_1(%arg0: i32) -> (i32, i32, i32) {
    %c0_i32 = arith.constant 0 : i32
    %c0_i32_0 = arith.constant 0 : i32
    %c0_i32_1 = arith.constant 0 : i32
    %c0_i32_2 = arith.constant 0 : i32
    return %c0_i32, %c0_i32_0, %c0_i32_1 : i32, i32, i32
  }
  func.func @transform_2(%arg0: i32) -> (i32, i32) {
    %c0_i32 = arith.constant 0 : i32
    %c0_i32_0 = arith.constant 0 : i32
    %c0_i32_1 = arith.constant 0 : i32
    return %c0_i32, %c0_i32_0 : i32, i32
  }
  func.func @transform_3(%arg0: i32) -> (i32, i32) {
    %c0_i32 = arith.constant 0 : i32
    %c0_i32_0 = arith.constant 0 : i32
    %c0_i32_1 = arith.constant 0 : i32
    return %c0_i32, %c0_i32_0 : i32, i32
  }
  func.func @transform_4(%arg0: i32) -> (i32, i32, i32) {
    %c0_i32 = arith.constant 0 : i32
    %c0_i32_0 = arith.constant 0 : i32
    %c0_i32_1 = arith.constant 0 : i32
    return %arg0, %c0_i32, %c0_i32_0 : i32, i32, i32
  }
}

module attributes {stable_mosaic.version = 11 : i64} {
  func.func @_shifted_conv3_in_kernel(%arg0: i32, %arg1: memref<1x42x64xbf16, #tpu.memory_space<vmem>>, %arg2: memref<9x64x64xbf16, #tpu.memory_space<vmem>>, %arg3: memref<2x64xf32, #tpu.memory_space<vmem>>, %arg4: memref<24x1xf32, #tpu.memory_space<vmem>>, %arg5: memref<1x24x64xbf16, #tpu.memory_space<vmem>>, %arg6: memref<1x24x64xbf16, #tpu.memory_space<vmem>>) attributes {dimension_semantics = [#tpu.dimension_semantics<parallel>], iteration_bounds = array<i64: 2>, scalar_prefetch = 0 : i64, scratch_operands = 0 : i64, tpu.core_type = #tpu.core_type<tc>, window_params = [{transform_indices = @transform_0, window_bounds = array<i64: 1, 42, 64>}, {pipeline_mode = #tpu.pipeline_mode<synchronous>, transform_indices = @transform_1, window_bounds = array<i64: 9, 64, 64>}, {pipeline_mode = #tpu.pipeline_mode<synchronous>, transform_indices = @transform_2, window_bounds = array<i64: 2, 64>}, {pipeline_mode = #tpu.pipeline_mode<synchronous>, transform_indices = @transform_3, window_bounds = array<i64: 24, 1>}, {transform_indices = @transform_4, window_bounds = array<i64: 1, 24, 64>}, {transform_indices = @transform_5, window_bounds = array<i64: 1, 24, 64>}]} {
    %c0 = arith.constant 0 : index
    %c0_0 = arith.constant 0 : index
    %c0_1 = arith.constant 0 : index
    %0 = vector.load %arg1[%c0, %c0_0, %c0_1] : memref<1x42x64xbf16, #tpu.memory_space<vmem>>, vector<1x24x64xbf16>
    %1 = vector.shape_cast %0 : vector<1x24x64xbf16> to vector<24x64xbf16>
    %c0_2 = arith.constant 0 : index
    %c0_3 = arith.constant 0 : index
    %c0_4 = arith.constant 0 : index
    %2 = vector.load %arg2[%c0_2, %c0_3, %c0_4] : memref<9x64x64xbf16, #tpu.memory_space<vmem>>, vector<1x64x64xbf16>
    %3 = vector.shape_cast %2 : vector<1x64x64xbf16> to vector<64x64xbf16>
    %cst = arith.constant dense<0.000000e+00> : vector<24x64xf32>
    %4 = tpu.matmul %1, %3, %cst {dimension_numbers = #tpu.dot_dimension_numbers<[1], [0], [0], [1], [0, 0, 1, 1], [], []>} : vector<24x64xbf16>, vector<64x64xbf16>, vector<24x64xf32> -> vector<24x64xf32>
    %c0_5 = arith.constant 0 : index
    %c1 = arith.constant 1 : index
    %c0_6 = arith.constant 0 : index
    %5 = vector.load %arg1[%c0_5, %c1, %c0_6] : memref<1x42x64xbf16, #tpu.memory_space<vmem>>, vector<1x24x64xbf16>
    %6 = vector.shape_cast %5 : vector<1x24x64xbf16> to vector<24x64xbf16>
    %c1_7 = arith.constant 1 : index
    %c0_8 = arith.constant 0 : index
    %c0_9 = arith.constant 0 : index
    %7 = vector.load %arg2[%c1_7, %c0_8, %c0_9] : memref<9x64x64xbf16, #tpu.memory_space<vmem>>, vector<1x64x64xbf16>
    %8 = vector.shape_cast %7 : vector<1x64x64xbf16> to vector<64x64xbf16>
    %cst_10 = arith.constant dense<0.000000e+00> : vector<24x64xf32>
    %9 = tpu.matmul %6, %8, %cst_10 {dimension_numbers = #tpu.dot_dimension_numbers<[1], [0], [0], [1], [0, 0, 1, 1], [], []>} : vector<24x64xbf16>, vector<64x64xbf16>, vector<24x64xf32> -> vector<24x64xf32>
    %10 = arith.addf %4, %9 : vector<24x64xf32>
    %c0_11 = arith.constant 0 : index
    %c2 = arith.constant 2 : index
    %c0_12 = arith.constant 0 : index
    %11 = vector.load %arg1[%c0_11, %c2, %c0_12] : memref<1x42x64xbf16, #tpu.memory_space<vmem>>, vector<1x24x64xbf16>
    %12 = vector.shape_cast %11 : vector<1x24x64xbf16> to vector<24x64xbf16>
    %c2_13 = arith.constant 2 : index
    %c0_14 = arith.constant 0 : index
    %c0_15 = arith.constant 0 : index
    %13 = vector.load %arg2[%c2_13, %c0_14, %c0_15] : memref<9x64x64xbf16, #tpu.memory_space<vmem>>, vector<1x64x64xbf16>
    %14 = vector.shape_cast %13 : vector<1x64x64xbf16> to vector<64x64xbf16>
    %cst_16 = arith.constant dense<0.000000e+00> : vector<24x64xf32>
    %15 = tpu.matmul %12, %14, %cst_16 {dimension_numbers = #tpu.dot_dimension_numbers<[1], [0], [0], [1], [0, 0, 1, 1], [], []>} : vector<24x64xbf16>, vector<64x64xbf16>, vector<24x64xf32> -> vector<24x64xf32>
    %16 = arith.addf %10, %15 : vector<24x64xf32>
    %c0_17 = arith.constant 0 : index
    %c6 = arith.constant 6 : index
    %c0_18 = arith.constant 0 : index
    %17 = vector.load %arg1[%c0_17, %c6, %c0_18] : memref<1x42x64xbf16, #tpu.memory_space<vmem>>, vector<1x24x64xbf16>
    %18 = vector.shape_cast %17 : vector<1x24x64xbf16> to vector<24x64xbf16>
    %c3 = arith.constant 3 : index
    %c0_19 = arith.constant 0 : index
    %c0_20 = arith.constant 0 : index
    %19 = vector.load %arg2[%c3, %c0_19, %c0_20] : memref<9x64x64xbf16, #tpu.memory_space<vmem>>, vector<1x64x64xbf16>
    %20 = vector.shape_cast %19 : vector<1x64x64xbf16> to vector<64x64xbf16>
    %cst_21 = arith.constant dense<0.000000e+00> : vector<24x64xf32>
    %21 = tpu.matmul %18, %20, %cst_21 {dimension_numbers = #tpu.dot_dimension_numbers<[1], [0], [0], [1], [0, 0, 1, 1], [], []>} : vector<24x64xbf16>, vector<64x64xbf16>, vector<24x64xf32> -> vector<24x64xf32>
    %22 = arith.addf %16, %21 : vector<24x64xf32>
    %c0_22 = arith.constant 0 : index
    %c7 = arith.constant 7 : index
    %c0_23 = arith.constant 0 : index
    %23 = vector.load %arg1[%c0_22, %c7, %c0_23] : memref<1x42x64xbf16, #tpu.memory_space<vmem>>, vector<1x24x64xbf16>
    %24 = vector.shape_cast %23 : vector<1x24x64xbf16> to vector<24x64xbf16>
    %c4 = arith.constant 4 : index
    %c0_24 = arith.constant 0 : index
    %c0_25 = arith.constant 0 : index
    %25 = vector.load %arg2[%c4, %c0_24, %c0_25] : memref<9x64x64xbf16, #tpu.memory_space<vmem>>, vector<1x64x64xbf16>
    %26 = vector.shape_cast %25 : vector<1x64x64xbf16> to vector<64x64xbf16>
    %cst_26 = arith.constant dense<0.000000e+00> : vector<24x64xf32>
    %27 = tpu.matmul %24, %26, %cst_26 {dimension_numbers = #tpu.dot_dimension_numbers<[1], [0], [0], [1], [0, 0, 1, 1], [], []>} : vector<24x64xbf16>, vector<64x64xbf16>, vector<24x64xf32> -> vector<24x64xf32>
    %28 = arith.addf %22, %27 : vector<24x64xf32>
    %c0_27 = arith.constant 0 : index
    %c8 = arith.constant 8 : index
    %c0_28 = arith.constant 0 : index
    %29 = vector.load %arg1[%c0_27, %c8, %c0_28] : memref<1x42x64xbf16, #tpu.memory_space<vmem>>, vector<1x24x64xbf16>
    %30 = vector.shape_cast %29 : vector<1x24x64xbf16> to vector<24x64xbf16>
    %c5 = arith.constant 5 : index
    %c0_29 = arith.constant 0 : index
    %c0_30 = arith.constant 0 : index
    %31 = vector.load %arg2[%c5, %c0_29, %c0_30] : memref<9x64x64xbf16, #tpu.memory_space<vmem>>, vector<1x64x64xbf16>
    %32 = vector.shape_cast %31 : vector<1x64x64xbf16> to vector<64x64xbf16>
    %cst_31 = arith.constant dense<0.000000e+00> : vector<24x64xf32>
    %33 = tpu.matmul %30, %32, %cst_31 {dimension_numbers = #tpu.dot_dimension_numbers<[1], [0], [0], [1], [0, 0, 1, 1], [], []>} : vector<24x64xbf16>, vector<64x64xbf16>, vector<24x64xf32> -> vector<24x64xf32>
    %34 = arith.addf %28, %33 : vector<24x64xf32>
    %c0_32 = arith.constant 0 : index
    %c12 = arith.constant 12 : index
    %c0_33 = arith.constant 0 : index
    %35 = vector.load %arg1[%c0_32, %c12, %c0_33] : memref<1x42x64xbf16, #tpu.memory_space<vmem>>, vector<1x24x64xbf16>
    %36 = vector.shape_cast %35 : vector<1x24x64xbf16> to vector<24x64xbf16>
    %c6_34 = arith.constant 6 : index
    %c0_35 = arith.constant 0 : index
    %c0_36 = arith.constant 0 : index
    %37 = vector.load %arg2[%c6_34, %c0_35, %c0_36] : memref<9x64x64xbf16, #tpu.memory_space<vmem>>, vector<1x64x64xbf16>
    %38 = vector.shape_cast %37 : vector<1x64x64xbf16> to vector<64x64xbf16>
    %cst_37 = arith.constant dense<0.000000e+00> : vector<24x64xf32>
    %39 = tpu.matmul %36, %38, %cst_37 {dimension_numbers = #tpu.dot_dimension_numbers<[1], [0], [0], [1], [0, 0, 1, 1], [], []>} : vector<24x64xbf16>, vector<64x64xbf16>, vector<24x64xf32> -> vector<24x64xf32>
    %40 = arith.addf %34, %39 : vector<24x64xf32>
    %c0_38 = arith.constant 0 : index
    %c13 = arith.constant 13 : index
    %c0_39 = arith.constant 0 : index
    %41 = vector.load %arg1[%c0_38, %c13, %c0_39] : memref<1x42x64xbf16, #tpu.memory_space<vmem>>, vector<1x24x64xbf16>
    %42 = vector.shape_cast %41 : vector<1x24x64xbf16> to vector<24x64xbf16>
    %c7_40 = arith.constant 7 : index
    %c0_41 = arith.constant 0 : index
    %c0_42 = arith.constant 0 : index
    %43 = vector.load %arg2[%c7_40, %c0_41, %c0_42] : memref<9x64x64xbf16, #tpu.memory_space<vmem>>, vector<1x64x64xbf16>
    %44 = vector.shape_cast %43 : vector<1x64x64xbf16> to vector<64x64xbf16>
    %cst_43 = arith.constant dense<0.000000e+00> : vector<24x64xf32>
    %45 = tpu.matmul %42, %44, %cst_43 {dimension_numbers = #tpu.dot_dimension_numbers<[1], [0], [0], [1], [0, 0, 1, 1], [], []>} : vector<24x64xbf16>, vector<64x64xbf16>, vector<24x64xf32> -> vector<24x64xf32>
    %46 = arith.addf %40, %45 : vector<24x64xf32>
    %c0_44 = arith.constant 0 : index
    %c14 = arith.constant 14 : index
    %c0_45 = arith.constant 0 : index
    %47 = vector.load %arg1[%c0_44, %c14, %c0_45] : memref<1x42x64xbf16, #tpu.memory_space<vmem>>, vector<1x24x64xbf16>
    %48 = vector.shape_cast %47 : vector<1x24x64xbf16> to vector<24x64xbf16>
    %c8_46 = arith.constant 8 : index
    %c0_47 = arith.constant 0 : index
    %c0_48 = arith.constant 0 : index
    %49 = vector.load %arg2[%c8_46, %c0_47, %c0_48] : memref<9x64x64xbf16, #tpu.memory_space<vmem>>, vector<1x64x64xbf16>
    %50 = vector.shape_cast %49 : vector<1x64x64xbf16> to vector<64x64xbf16>
    %cst_49 = arith.constant dense<0.000000e+00> : vector<24x64xf32>
    %51 = tpu.matmul %48, %50, %cst_49 {dimension_numbers = #tpu.dot_dimension_numbers<[1], [0], [0], [1], [0, 0, 1, 1], [], []>} : vector<24x64xbf16>, vector<64x64xbf16>, vector<24x64xf32> -> vector<24x64xf32>
    %52 = arith.addf %46, %51 : vector<24x64xf32>
    %c0_50 = arith.constant 0 : index
    %c0_51 = arith.constant 0 : index
    %53 = vector.load %arg4[%c0_50, %c0_51] : memref<24x1xf32, #tpu.memory_space<vmem>>, vector<24x1xf32>
    %54 = vector.broadcast %53 : vector<24x1xf32> to vector<24x64xf32>
    %55 = arith.mulf %52, %54 : vector<24x64xf32>
    %cst_52 = arith.constant dense<0.000000e+00> : vector<64xf32>
    %56 = vector.multi_reduction <add>, %55, %cst_52 [0] : vector<24x64xf32> to vector<64xf32>
    %57 = vector.shape_cast %56 : vector<64xf32> to vector<1x64xf32>
    %58 = arith.mulf %52, %52 : vector<24x64xf32>
    %59 = vector.broadcast %53 : vector<24x1xf32> to vector<24x64xf32>
    %60 = arith.mulf %58, %59 : vector<24x64xf32>
    %cst_53 = arith.constant dense<0.000000e+00> : vector<64xf32>
    %61 = vector.multi_reduction <add>, %60, %cst_53 [0] : vector<24x64xf32> to vector<64xf32>
    %62 = vector.shape_cast %61 : vector<64xf32> to vector<1x64xf32>
    %cst_54 = arith.constant 6.250000e-02 : f32
    %63 = vector.broadcast %cst_54 : f32 to vector<1x64xf32>
    %64 = arith.mulf %57, %63 : vector<1x64xf32>
    %cst_55 = arith.constant 6.250000e-02 : f32
    %65 = vector.broadcast %cst_55 : f32 to vector<1x64xf32>
    %66 = arith.mulf %62, %65 : vector<1x64xf32>
    %67 = arith.mulf %64, %64 : vector<1x64xf32>
    %68 = arith.subf %66, %67 : vector<1x64xf32>
    %cst_56 = arith.constant 0.000000e+00 : f32
    %69 = vector.broadcast %cst_56 : f32 to vector<1x64xf32>
    %70 = arith.maximumf %68, %69 : vector<1x64xf32>
    %c0_57 = arith.constant 0 : index
    %c0_58 = arith.constant 0 : index
    %71 = vector.load %arg3[%c0_57, %c0_58] : memref<2x64xf32, #tpu.memory_space<vmem>>, vector<1x64xf32>
    %cst_59 = arith.constant 9.99999974E-6 : f32
    %72 = vector.broadcast %cst_59 : f32 to vector<1x64xf32>
    %73 = arith.addf %70, %72 : vector<1x64xf32>
    %74 = math.rsqrt %73 : vector<1x64xf32>
    %75 = arith.mulf %71, %74 : vector<1x64xf32>
    %c1_60 = arith.constant 1 : index
    %c0_61 = arith.constant 0 : index
    %76 = vector.load %arg3[%c1_60, %c0_61] : memref<2x64xf32, #tpu.memory_space<vmem>>, vector<1x64xf32>
    %77 = arith.mulf %64, %75 : vector<1x64xf32>
    %78 = arith.subf %76, %77 : vector<1x64xf32>
    %79 = vector.broadcast %75 : vector<1x64xf32> to vector<24x64xf32>
    %80 = arith.mulf %52, %79 : vector<24x64xf32>
    %81 = vector.broadcast %78 : vector<1x64xf32> to vector<24x64xf32>
    %82 = arith.addf %80, %81 : vector<24x64xf32>
    %c0_62 = arith.constant 0 : index
    %c0_63 = arith.constant 0 : index
    %c0_64 = arith.constant 0 : index
    %83 = vector.load %arg5[%c0_62, %c0_63, %c0_64] : memref<1x24x64xbf16, #tpu.memory_space<vmem>>, vector<1x24x64xbf16>
    %84 = vector.shape_cast %83 : vector<1x24x64xbf16> to vector<24x64xbf16>
    %85 = arith.extf %84 : vector<24x64xbf16> to vector<24x64xf32>
    %86 = arith.addf %82, %85 : vector<24x64xf32>
    %87 = arith.truncf %86 : vector<24x64xf32> to vector<24x64xbf16>
    %c0_65 = arith.constant 0 : index
    %c0_66 = arith.constant 0 : index
    %c0_67 = arith.constant 0 : index
    %88 = vector.load %arg6[%c0_65, %c0_66, %c0_67] : memref<1x24x64xbf16, #tpu.memory_space<vmem>>, vector<1x24x64xbf16>
    %89 = vector.shape_cast %88 : vector<1x24x64xbf16> to vector<24x64xbf16>
    %90 = vector.shape_cast %87 : vector<24x64xbf16> to vector<1x24x64xbf16>
    tpu.vector_store %arg6[%c0_65, %c0_66, %c0_67], %90 {strides = array<i32>} : memref<1x24x64xbf16, #tpu.memory_space<vmem>>, vector<1x24x64xbf16>,
    return
  }
  func.func @transform_0(%arg0: i32) -> (i32, i32, i32) {
    %c0_i32 = arith.constant 0 : i32
    %c0_i32_0 = arith.constant 0 : i32
    %c0_i32_1 = arith.constant 0 : i32
    return %arg0, %c0_i32, %c0_i32_0 : i32, i32, i32
  }
  func.func @transform_1(%arg0: i32) -> (i32, i32, i32) {
    %c0_i32 = arith.constant 0 : i32
    %c0_i32_0 = arith.constant 0 : i32
    %c0_i32_1 = arith.constant 0 : i32
    %c0_i32_2 = arith.constant 0 : i32
    return %c0_i32, %c0_i32_0, %c0_i32_1 : i32, i32, i32
  }
  func.func @transform_2(%arg0: i32) -> (i32, i32) {
    %c0_i32 = arith.constant 0 : i32
    %c0_i32_0 = arith.constant 0 : i32
    %c0_i32_1 = arith.constant 0 : i32
    return %c0_i32, %c0_i32_0 : i32, i32
  }
  func.func @transform_3(%arg0: i32) -> (i32, i32) {
    %c0_i32 = arith.constant 0 : i32
    %c0_i32_0 = arith.constant 0 : i32
    %c0_i32_1 = arith.constant 0 : i32
    return %c0_i32, %c0_i32_0 : i32, i32
  }
  func.func @transform_4(%arg0: i32) -> (i32, i32, i32) {
    %c0_i32 = arith.constant 0 : i32
    %c0_i32_0 = arith.constant 0 : i32
    %c0_i32_1 = arith.constant 0 : i32
    return %arg0, %c0_i32, %c0_i32_0 : i32, i32, i32
  }
  func.func @transform_5(%arg0: i32) -> (i32, i32, i32) {
    %c0_i32 = arith.constant 0 : i32
    %c0_i32_0 = arith.constant 0 : i32
    %c0_i32_1 = arith.constant 0 : i32
    return %arg0, %c0_i32, %c0_i32_0 : i32, i32, i32
  }
}

</mosaic_0001>

<bundles_post_ra>
// kernel: rgb_block_forward.9
= control target key start
LH: loop header
LB: loop body
LE: loop exit
PB: predicated region body
PF: predicated region fallthrough
CT: control target
= control target key end

     0   :  { %8 = vsyncpa [#allocation6], 0  ;;  %s2694_s0 = inlined_call_operand.hbm [shape: bf16[2,256,256], index: 0, kind: input, shape index: {}]   ;;  %s2695_s1 = inlined_call_operand.hbm [shape: bf16[256,16], index: 1, kind: input, shape index: {}]   ;;  %s2696_s2 = inlined_call_operand.hbm [shape: f32[2,16], index: 2, kind: input, shape index: {}]   ;;  %s2697_s3 = inlined_call_operand.hbm [shape: bf16[2,256,16], index: 3, kind: output, shape index: {}]  }
   0x1   :  { %10 = vsyncpa [#allocation6 + $0x1], 0 }
   0x2   :  { %11 = vsyncpa [#allocation9], 0 }
   0x3   :  { %12 = vsyncpa [#allocation7], 0 }
   0x4   :  { %14 = vsyncpa [#allocation7 + $0x1], 0  ;;  %s1990_s12 = smov 0   ;;  %s1992_s13 = smov 0  }
   0x5   :  { %s1994_s14 = smov 0   ;;  %s1996_s15 = smov 0  }
   0x6   :  { %s1998_s16 = smov 0   ;;  %s2000_s17 = smov 0  }
   0x7 LB: > { %s1368_s18 = sadd.s32 4294967295, %s1957_s17   ;;  %s1369_s19 = sadd.s32 4294967294, %s1957_s17   ;;  %s1957_s17 = sphi %s2000_s17, %s20_s17   ;;  %s1953_s16 = sphi %s1998_s16, %s2719_s16   ;;  %s1949_s15 = sphi %s1996_s15, %s2718_s15   ;;  %s1945_s14 = sphi %s1994_s14, %s2717_s14   ;;  %s1941_s13 = sphi %s1992_s13, %s2716_s13   ;;  %s1937_s12 = sphi %s1990_s12, %s2715_s12  }
   0x8   : > { %p54_p0 = scmp.ne.s32.totalorder %s1941_s13, %s1937_s12  ;;  %p2024_p1 = scmp.eq.s32.totalorder %s1368_s18, 0 }
   0x9   : > { %p2028_p2 = scmp.eq.s32.totalorder %s1368_s18, 1  ;;  %p126_p3 = scmp.eq.s32.totalorder %s1369_s19, 1 }
   0xa   : > { %s2702_s20 = scalar_select %p2024_p1, 1, 0 }
   0xb   : > { %p2034_p4 = por %p2024_p1, %p54_p0  ;;  %p1370_p5 = scmp.ge.s32.totalorder %s1957_s17, 1 }
   0xc   : > { %p2039_p6 = por %p126_p3, %p54_p0  ;;  %p133_p7 = scmp.lt.s32.totalorder %s1957_s17, 3 }
   0xd   : > { %s2704_s22 = scalar_select %p2034_p4, 1, 0 }
   0xe   : > { %s2705_s23 = scalar_select %p2039_p6, 1, 0 }
   0xf   : > { %p2044_p8 = pnand %p1370_p5, %p133_p7  ;;  %s1959_s25 = smov [#allocation8]  }
  0x10   : > { %s145_s26 = sshll.u32 %s1959_s25, 4  ;;  %s1960_s28 = smov [#allocation10]   ;;  %s2048_s26 = int_to_ptr.vmem [resolvable:$true] %s145_s26 }
  0x11   : > { %p1641_p9 = pneg %p2044_p8  ;;  %s159_s29 = sshll.u32 %s1960_s28, 4  ;;  %s2059_s29 = int_to_ptr.vmem [resolvable:$true] %s159_s29 }
  0x12   : > { %s1785_s5 = scalar_lea.hbm %s2695_s1, 2048 }
  0x13   : > { %p2055_p11 = pnand %p1641_p9, %p2024_p1  ;;  %p1786_p12 = scmp.ne.s32.totalorder %s2695_s1, %s1785_s5 }
  0x14   : > { %p1792_p5 = scmp.lt.u32.totalorder %s1785_s5, %s2695_s1 }
  0x15   : > { %p1787_p13 = pneg %p2055_p11 }
  0x17   : > { %p1788_p0 = pnand %p1787_p13, %p1786_p12 }
  0x19   : > { %p1789_p3 = pneg %p1788_p0 }
  0x1b   : > { %p1794_p7 = pnand %p1792_p5, %p1789_p3 }
  0x1d   : > { %1797 = shalt.err (!%p1794_p7)
}
  0x1e   : > { %s1798_s10 = scalar_lea.vmem %s2048_s26, 2048  ;;  %p1806_p1 = scmp.lt.s32.totalorder %s2048_s26, %s2048_s26 }
  0x1f   : > { %p1799_p9 = scmp.ne.s32.totalorder %s2048_s26, %s1798_s10  ;;  %p1807_p12 = scmp.lt.s32.totalorder %s1798_s10, %s1798_s10 }
  0x21   : > { %p1801_p10 = pnand %p1799_p9, %p1787_p13  ;;  %p1808_p0 = por %p1807_p12, %p1806_p1 }
  0x23   : > { %p1802_p6 = pneg %p1801_p10 }
  0x25   : > { %p1809_p4 = pnand %p1808_p0, %p1802_p6 }
  0x27   : > { %1812 = shalt.err (!%p1809_p4)
}
  0x28   : > { %s1961_s11 = smov 64   ;;  %s1962_s18 = smov 4  }
  0x29   : > { %1644 = dma.hbm_to_vmem [thread:$0]  (!%p2055_p11), %s2695_s1, 2048, %s2048_s26, [#allocation9], %s1961_s11, %s1961_s11, %s1962_s18  }
  0x2a   : > { %s1813_s4 = scalar_lea.hbm %s2696_s2, 32 }
  0x2b   : > { %p1814_p1 = scmp.ne.s32.totalorder %s2696_s2, %s1813_s4  ;;  %p1820_p10 = scmp.lt.u32.totalorder %s1813_s4, %s2696_s2 }
  0x2d   : > { %p1816_p4 = pnand %p1814_p1, %p1787_p13 }
  0x2f   : > { %p1817_p6 = pneg %p1816_p4 }
  0x31   : > { %p1822_p3 = pnand %p1820_p10, %p1817_p6 }
  0x33   : > { %1825 = shalt.err (!%p1822_p3)
}
  0x34   : > { %s1826_s26 = scalar_lea.vmem %s2059_s29, 32  ;;  %p1834_p12 = scmp.lt.s32.totalorder %s2059_s29, %s2059_s29 }
  0x35   : > { %p1827_p5 = scmp.ne.s32.totalorder %s2059_s29, %s1826_s26  ;;  %p1835_p0 = scmp.lt.s32.totalorder %s1826_s26, %s1826_s26 }
  0x37   : > { %p1829_p7 = pnand %p1827_p5, %p1787_p13  ;;  %p1836_p1 = por %p1835_p0, %p1834_p12 }
  0x39   : > { %p1830_p9 = pneg %p1829_p7 }
  0x3b   : > { %p1837_p4 = pnand %p1836_p1, %p1830_p9 }
  0x3d   : > { %1840 = shalt.err (!%p1837_p4)
}
  0x3e   : > { %1647 = dma.hbm_to_vmem [thread:$0]  (!%p2055_p11), %s2696_s2, 32, %s2059_s29, [#allocation9]  }
  0x3f   : > { %s32_s11 = sadd.s32 1, %s1953_s16  ;;  %s41_s18 = sadd.s32 1, %s1945_s14 }
  0x40   : > { %p34_p13 = scmp.ge.s32.totalorder %s32_s11, 2  ;;  %p48_p6 = scmp.ne.s32.totalorder %s1945_s14, %s1941_s13 }
  0x41   : > { %p49_p10 = scmp.eq.s32.totalorder %s1957_s17, 0  ;;  %p1658_p3 = scmp.lt.s32.totalorder %s1957_s17, 2 }
  0x42   : > { %s2721_s11 = smov (%p34_p13, %s32_s11), 0  ;;  %p2123_p7 = por %p2028_p2, %p48_p6 }
  0x43   : > { %p50_p5 = por %p49_p10, %p48_p6  ;;  %s36_s19 = ssub.s32 %s1953_s16, %s2721_s11 }
  0x44   : > { %s2708_s27 = scalar_select %p2123_p7, 1, 0 }
  0x45   : > { %s170_s25 = sand.u32 1, %s1945_s14   ;;  %p39_p9 = scmp.eq.s32.totalorder %s36_s19, 0 }
  0x46   : > { %s1374_s29 = sshll.u32 %s170_s25, 8  ;;  %s1467_s28 = sshll.u32 %s1953_s16, 12 }
  0x47   : > { %s2132_s30 = scalar_select %p39_p9, %s1945_s14, %s41_s18  }
  0x48   : > { %s2137_s6 = scalar_lea.hbm %s2694_s0, %s1467_s28  ;;  %s174_s21 = scalar_lea.vmem [#allocation5], %s1374_s29 }
  0x49   : > { %s184_s7 = sshll.u32 %s174_s21, 4  ;;  %p2141_p2 = pnand %p1658_p3, %p50_p5  ;;  %s2145_s7 = int_to_ptr.vmem [resolvable:$true] %s184_s7 }
  0x4a   : > { %s2147_s26 = scalar_lea.sflag [#allocation6], %s170_s25  ;;  %s1841_s9 = scalar_lea.hbm %s2137_s6, 4096 }
  0x4b   : > { %p1842_p11 = scmp.ne.s32.totalorder %s2137_s6, %s1841_s9  ;;  %p1843_p12 = pneg %p2141_p2 }
  0x4c   : > { %s1846_s19 = scalar_lea.hbm %s2694_s0, 8192  ;;  %p1847_p4 = scmp.lt.u32.totalorder %s2137_s6, %s2694_s0 }
  0x4d   : > { %p1844_p0 = pnand %p1843_p12, %p1842_p11  ;;  %p1848_p13 = scmp.lt.u32.totalorder %s1846_s19, %s1841_s9 }
  0x4e   : > { %p1850_p10 = scmp.lt.u32.totalorder %s1841_s9, %s2137_s6 }
  0x4f   : > { %p1845_p1 = pneg %p1844_p0  ;;  %p1849_p6 = por %p1848_p13, %p1847_p4 }
  0x51   : > { %p1851_p3 = por %p1850_p10, %p1849_p6 }
  0x53   : > { %p1852_p5 = pnand %p1851_p3, %p1845_p1 }
  0x55   : > { %1855 = shalt.err (!%p1852_p5)
}
  0x56   : > { %s1856_s25 = scalar_lea.vmem %s2145_s7, 4096  ;;  %s1963_s4 = smov [#allocation5]  }
  0x57   : > { %p1857_p9 = scmp.ne.s32.totalorder %s2145_s7, %s1856_s25  ;;  %s1861_s5 = sshll.u32 %s1963_s4, 4  ;;  %s1862_s5 = int_to_ptr.vmem [resolvable:$false] %s1861_s5 }
  0x58   : > { %s1863_s21 = scalar_lea.vmem %s1862_s5, 8192  ;;  %p1864_p7 = scmp.lt.s32.totalorder %s2145_s7, %s1862_s5 }
  0x59   : > { %p1859_p11 = pnand %p1857_p9, %p1843_p12  ;;  %p1865_p4 = scmp.lt.s32.totalorder %s1863_s21, %s1856_s25 }
  0x5b   : > { %p1860_p0 = pneg %p1859_p11  ;;  %p1866_p13 = por %p1865_p4, %p1864_p7 }
  0x5d   : > { %p1867_p6 = pnand %p1866_p13, %p1860_p0 }
  0x5f   : > { %1870 = shalt.err (!%p1867_p6)
}
  0x60   : > { %s1964_s9 = smov 128   ;;  %s1965_s10 = smov 8  }
  0x61   : > { %1651 = dma.hbm_to_vmem [thread:$0]  (!%p2141_p2), %s2137_s6, 4096, %s2145_s7, %s2147_s26, %s1964_s9, %s1964_s9, %s1965_s10  }
  0x62   : > { %196 = sbr.rel (%p2044_p8) target bundleno = 554 (0x22a), region = 32  ;;  %s2178_s18 = sand.u32 (!%p2044_p8), 1, %s1941_s13  }
  0x63   : > { %s1378_s19 = sshll.u32 (!%p2044_p8), %s2178_s18, 8  ;;  %s199_s29 = scalar_lea.sflag (!%p2044_p8), [#allocation6], %s2178_s18 }
  0x64   : > { %s2182_s28 = scalar_lea.vmem (!%p2044_p8), [#allocation5], %s1378_s19  ;;  %p2710_p7 = scmp.ne.s32.totalorder (!%p2044_p8), %s2704_s22, 0 }
  0x69   : > { %1924 = dma.done.wait (%p2710_p7), %s199_s29, 4096  }
  0x6a   : > { %1926 = vsyncadd (%p2710_p7), %s199_s29, 4294963200  ;;  %p2711_p2 = scmp.ne.s32.totalorder %s2702_s20, 0 }
  0x6c   : > { %1928 = dma.done.wait (%p2711_p2), [#allocation9], 2080  }
  0x6d   : > { %1930 = vsyncadd (%p2711_p2), [#allocation9], 4294965216  ;;  %v1719_v0 = vld [vmem:[#allocation8 + $0x40] sm:$0xff]   ;;  %v1721_v2 = vld [vmem:[#allocation8 + $0x48] sm:$0xff]   ;;  %vm239_vm0 = vcmask 122880   ;;  %v1966_v48 = vmov 0.0  }
  0x6e   : > { %v1720_v1 = vld [vmem:[#allocation8] sm:$0xff]   ;;  %1501 = vmatprep.subr.bf16.mxu0 %v1719_v0  ;;  %1613 = vmatprep.subr.bf16.mxu1 %v1719_v0  ;;  %v1722_v3 = vld [vmem:[#allocation8 + $0x8] sm:$0xff]   ;;  %v1723_v4 = vld [vmem:[#allocation8 + $0x50] sm:$0xff]   ;;  %240 = vst.msk [vmem:[#allocation2] sm:$0x1] %vm239_vm0, %v1966_v48  ;;  %vm724_vm1 = vcmask 130048  }
  0x6f   : > { %1502 = vmatpush3.bf16.msra.mxu0 %v1720_v1  ;;  %1621 = vmatpush3.bf16.msra.mxu1 %v1720_v1  ;;  %v1724_v5 = vld [vmem:[#allocation8 + $0x10] sm:$0xff]   ;;  %v1725_v6 = vld [vmem:[#allocation8 + $0x58] sm:$0xff]   ;;  %v1727_v8 = vld [vmem:[#allocation8 + $0x60] sm:$0xff]   ;;  %241 = vst.msk [vmem:[#allocation3] sm:$0x1] %vm239_vm0, %v1966_v48  ;;  %vm1216_vm2 = vcmask 125952  }
  0x70   : > { %1503 = vmatprep.subr.bf16.mxu0 %v1721_v2  ;;  %1614 = vmatprep.subr.bf16.mxu1 %v1721_v2  ;;  %v1726_v7 = vld [vmem:[#allocation8 + $0x18] sm:$0xff]   ;;  %v1728_v9 = vld [vmem:[#allocation8 + $0x20] sm:$0xff]   ;;  %v1729_v10 = vld [vmem:[#allocation8 + $0x68] sm:$0xff]   ;;  %s1381_s20 = sshll.u32 %s2178_s18, 7  ;;  %s1500_s24 = sshll.u32 %s1949_s15, 11 }
  0x71   : > { %v1737_v11 = vld [vmem:[%s2182_s28 + $0x4] ss:$8 sps:$4 sm:$0xff]   ;;  %v1731_v13 = vld [vmem:[#allocation8 + $0x70] sm:$0xff]   ;;  %v1733_v16 = vld [vmem:[#allocation8 + $0x78] sm:$0xff]   ;;  %s2457_s22 = scalar_lea.vmem [#allocation11], %s1381_s20  ;;  %s2623_s8 = scalar_lea.hbm %s2697_s3, %s1500_s24 }
  0x72   : > { %v1730_v12 = vld [vmem:[#allocation8 + $0x28] sm:$0xff]   ;;  %594 = vmatprep.mubr.bf16.mxu0 %v1737_v11  ;;  %v1732_v15 = vld [vmem:[#allocation8 + $0x30] sm:$0xff]   ;;  %v1734_v17 = vld [vmem:[#allocation8 + $0x38] sm:$0xff]   ;;  %s1263_s6 = sshll.u32 %s2457_s22, 4  ;;  %s1250_s26 = scalar_lea.sflag [#allocation7], %s2178_s18  ;;  %s2625_s6 = int_to_ptr.vmem [resolvable:$true] %s1263_s6 }
  0x73   : > { %1504 = vmatpush3.bf16.msra.mxu0 %v1722_v3  ;;  %1622 = vmatpush3.bf16.msra.mxu1 %v1722_v3  ;;  %v1749_v14 = vld [vmem:[%s2182_s28 + $0x84] ss:$8 sps:$4 sm:$0xff]   ;;  %v1735_v18 = vld [vmem:[%s2182_s28] ss:$8 sps:$4 sm:$0xff]   ;;  %v1738_v19 = vld [vmem:[%s2182_s28 + $0x14] ss:$8 sps:$4 sm:$0xff]  }
  0x74   : > { %1505 = vmatprep.subr.bf16.mxu0 %v1723_v4  ;;  %1615 = vmatprep.subr.bf16.mxu1 %v1723_v4  ;;  %v1747_v20 = vld [vmem:[%s2182_s28 + $0x80] ss:$8 sps:$4 sm:$0xff]   ;;  %v1753_v21 = vld [vmem:[%s2182_s28 + $0x94] ss:$8 sps:$4 sm:$0xff]   ;;  %v1740_v22 = vld [vmem:[%s2182_s28 + $0x10] ss:$8 sps:$4 sm:$0xff]  }
  0x75   : > { %658 = vmatprep.mubr.bf16.mxu1 %v1749_v14  ;;  %v1741_v23 = vld [vmem:[%s2182_s28 + $0x24] ss:$8 sps:$4 sm:$0xff]   ;;  %v1755_v24 = vld [vmem:[%s2182_s28 + $0x90] ss:$8 sps:$4 sm:$0xff]   ;;  %v1743_v26 = vld [vmem:[%s2182_s28 + $0x20] ss:$8 sps:$4 sm:$0xff]  }
  0x76   : > { %v1759_v25 = vld [vmem:[%s2182_s28 + $0xa4] ss:$8 sps:$4 sm:$0xff]   ;;  %v1744_v27 = vld [vmem:[%s2182_s28 + $0x34] ss:$8 sps:$4 sm:$0xff]   ;;  %v1761_v28 = vld [vmem:[%s2182_s28 + $0xa0] ss:$8 sps:$4 sm:$0xff]  }
  0x77   : > { %1506 = vmatpush3.bf16.msra.mxu0 %v1724_v5  ;;  %1623 = vmatpush3.bf16.msra.mxu1 %v1724_v5  ;;  %v1765_v29 = vld [vmem:[%s2182_s28 + $0xb4] ss:$8 sps:$4 sm:$0xff]   ;;  %v1746_v30 = vld [vmem:[%s2182_s28 + $0x30] ss:$8 sps:$4 sm:$0xff]   ;;  %v1750_v31 = vld [vmem:[%s2182_s28 + $0x44] ss:$8 sps:$4 sm:$0xff]  }
  0x78   : > { %1507 = vmatprep.subr.bf16.mxu0 %v1725_v6  ;;  %1616 = vmatprep.subr.bf16.mxu1 %v1725_v6  ;;  %v1767_v32 = vld [vmem:[%s2182_s28 + $0xb0] ss:$8 sps:$4 sm:$0xff]   ;;  %v1771_v33 = vld [vmem:[%s2182_s28 + $0xc4] ss:$8 sps:$4 sm:$0xff]   ;;  %v1752_v34 = vld [vmem:[%s2182_s28 + $0x40] ss:$8 sps:$4 sm:$0xff]  }
  0x79   : > { %v1756_v35 = vld [vmem:[%s2182_s28 + $0x54] ss:$8 sps:$4 sm:$0xff]   ;;  %v1773_v36 = vld [vmem:[%s2182_s28 + $0xc0] ss:$8 sps:$4 sm:$0xff]   ;;  %v1758_v38 = vld [vmem:[%s2182_s28 + $0x50] ss:$8 sps:$4 sm:$0xff]  }
  0x7a   : > { %v1774_v37 = vld [vmem:[%s2182_s28 + $0xd4] ss:$8 sps:$4 sm:$0xff]   ;;  %v1762_v39 = vld [vmem:[%s2182_s28 + $0x64] ss:$8 sps:$4 sm:$0xff]   ;;  %v1776_v40 = vld [vmem:[%s2182_s28 + $0xd0] ss:$8 sps:$4 sm:$0xff]  }
  0x7b   : > { %1508 = vmatpush3.bf16.msra.mxu0 %v1726_v7  ;;  %1624 = vmatpush3.bf16.msra.mxu1 %v1726_v7  ;;  %v1777_v41 = vld [vmem:[%s2182_s28 + $0xe4] ss:$8 sps:$4 sm:$0xff]   ;;  %v1764_v42 = vld [vmem:[%s2182_s28 + $0x60] ss:$8 sps:$4 sm:$0xff]   ;;  %v1768_v43 = vld [vmem:[%s2182_s28 + $0x74] ss:$8 sps:$4 sm:$0xff]  }
  0x7c   : > { %1509 = vmatprep.subr.bf16.mxu0 %v1727_v8  ;;  %1617 = vmatprep.subr.bf16.mxu1 %v1727_v8  ;;  %v1779_v44 = vld [vmem:[%s2182_s28 + $0xe0] ss:$8 sps:$4 sm:$0xff]   ;;  %v1780_v45 = vld [vmem:[%s2182_s28 + $0xf4] ss:$8 sps:$4 sm:$0xff]   ;;  %v1770_v46 = vld [vmem:[%s2182_s28 + $0x70] ss:$8 sps:$4 sm:$0xff]  }
  0x7d   : > { %v1782_v47 = vld [vmem:[%s2182_s28 + $0xf0] ss:$8 sps:$4 sm:$0xff]   ;;  %s1871_s25 = scalar_lea.vmem %s2625_s6, 2048  ;;  %p2712_p12 = scmp.ne.s32.totalorder %s2708_s27, 0 }
  0x7e   : > { %p1872_p8 = scmp.ne.s32.totalorder %s2625_s6, %s1871_s25  ;;  %s1967_s4 = smov [#allocation11]  }
  0x7f   : > { %1510 = vmatpush3.bf16.msra.mxu0 %v1728_v9  ;;  %1625 = vmatpush3.bf16.msra.mxu1 %v1728_v9  ;;  %s1875_s5 = sshll.u32 %s1967_s4, 4  ;;  %s1876_s5 = int_to_ptr.vmem [resolvable:$false] %s1875_s5 }
  0x80   : > { %1511 = vmatprep.subr.bf16.mxu0 %v1729_v10  ;;  %1618 = vmatprep.subr.bf16.mxu1 %v1729_v10  ;;  %p1873_p1 = pnand %p1872_p8, %p2712_p12  ;;  %s1877_s21 = scalar_lea.vmem %s1876_s5, 4096 }
  0x81   : > { %p1878_p3 = scmp.lt.s32.totalorder %s2625_s6, %s1876_s5  ;;  %p1879_p5 = scmp.lt.s32.totalorder %s1877_s21, %s1871_s25 }
  0x82   : > { %p1874_p10 = pneg %p1873_p1 }
  0x83   : > { %1512 = vmatpush3.bf16.msra.mxu0 %v1730_v12  ;;  %1626 = vmatpush3.bf16.msra.mxu1 %v1730_v12  ;;  %p1880_p9 = por %p1879_p5, %p1878_p3 }
  0x84   : > { %1513 = vmatprep.subr.bf16.mxu0 %v1731_v13  ;;  %1619 = vmatprep.subr.bf16.mxu1 %v1731_v13 }
  0x85   : > { %p1881_p11 = pnand %p1880_p9, %p1874_p10 }
  0x87   : > { %1514 = vmatpush3.bf16.msra.mxu0 %v1732_v15  ;;  %1627 = vmatpush3.bf16.msra.mxu1 %v1732_v15 }
  0x88   : > { %1515 = vmatprep.subr.bf16.mxu0 %v1733_v16  ;;  %1620 = vmatprep.subr.bf16.mxu1 %v1733_v16 }
  0x8b   : > { %1516 = vmatpush3.bf16.msra.mxu0 %v1734_v17  ;;  %1628 = vmatpush3.bf16.msra.mxu1 %v1734_v17 }
  0x8e   : > { %595 = vmatmul.mubr.bf16.vlgmr.msra.gmra.mrb[0].mxu0 %v1735_v18  ;;  %659 = vmatmul.mubr.bf16.vlgmr.msra.gmra.mrb[0].mxu1 %v1747_v20 }
  0x8f   : > { %602 = vmatprep.mubr.bf16.mxu0 %v1738_v19  ;;  %666 = vmatprep.mubr.bf16.mxu1 %v1753_v21 }
  0x96   : > { %603 = vmatmul.mubr.bf16.gmra.mrb[4].mxu0 %v1740_v22  ;;  %667 = vmatmul.mubr.bf16.gmra.mrb[4].mxu1 %v1755_v24 }
  0x97   : > { %610 = vmatprep.mubr.bf16.mxu0 %v1741_v23  ;;  %674 = vmatprep.mubr.bf16.mxu1 %v1759_v25 }
  0x9e   : > { %611 = vmatmul.mubr.bf16.gmra.mrb[8].mxu0 %v1743_v26  ;;  %675 = vmatmul.mubr.bf16.gmra.mrb[8].mxu1 %v1761_v28 }
  0x9f   : > { %618 = vmatprep.mubr.bf16.mxu0 %v1744_v27  ;;  %682 = vmatprep.mubr.bf16.mxu1 %v1765_v29 }
  0xa6   : > { %619 = vmatmul.mubr.bf16.gmra.mrb[12].mxu0 %v1746_v30  ;;  %683 = vmatmul.mubr.bf16.gmra.mrb[12].mxu1 %v1767_v32 }
  0xa7   : > { %626 = vmatprep.mubr.bf16.mxu0 %v1750_v31  ;;  %690 = vmatprep.mubr.bf16.mxu1 %v1771_v33 }
  0xae   : > { %627 = vmatmul.mubr.bf16.gmra.mrb[16].mxu0 %v1752_v34  ;;  %691 = vmatmul.mubr.bf16.gmra.mrb[16].mxu1 %v1773_v36 }
  0xaf   : > { %634 = vmatprep.mubr.bf16.mxu0 %v1756_v35  ;;  %698 = vmatprep.mubr.bf16.mxu1 %v1774_v37 }
  0xb6   : > { %635 = vmatmul.mubr.bf16.gmra.mrb[20].mxu0 %v1758_v38  ;;  %699 = vmatmul.mubr.bf16.gmra.mrb[20].mxu1 %v1776_v40 }
  0xb7   : > { %642 = vmatprep.mubr.bf16.mxu0 %v1762_v39  ;;  %706 = vmatprep.mubr.bf16.mxu1 %v1777_v41 }
  0xbe   : > { %643 = vmatmul.mubr.bf16.gmra.mrb[24].mxu0 %v1764_v42  ;;  %707 = vmatmul.mubr.bf16.gmra.mrb[24].mxu1 %v1779_v44 }
  0xbf   : > { %650 = vmatprep.mubr.bf16.mxu0 %v1768_v43  ;;  %714 = vmatprep.mubr.bf16.mxu1 %v1780_v45 }
  0xc6   : > { %651 = vmatmul.mubr.bf16.gmra.mrb[28].mxu0 %v1770_v46  ;;  %715 = vmatmul.mubr.bf16.gmra.mrb[28].mxu1 %v1782_v47 }
 0x161   : > { %v1517_v49 = vpop.f32.mrb[0].mxu0  ;;  %v1565_v51 = vpop.f32.mrb[0].mxu1 }
 0x162   : > { %v1518_v50 = vpop.f32.mrb[1].mxu0  ;;  %v1566_v54 = vpop.f32.mrb[1].mxu1 }
 0x163   : > { %v1519_v52 = vadd.f32 %v1518_v50, %v1517_v49  ;;  %v1520_v53 = vpop.f32.mrb[2].mxu0  ;;  %v2226_v56 = vadd.f32 %v1566_v54, %v1565_v51  ;;  %v1568_v57 = vpop.f32.mrb[2].mxu1 }
 0x164   : > { %v1521_v55 = vpop.f32.mrb[3].mxu0  ;;  %v1569_v60 = vpop.f32.mrb[3].mxu1 }
 0x165   : > { %v798_v58 = vmul.f32 %v1519_v52, %v1519_v52  ;;  %903 = vst.msk [vmem:[#allocation4] sm:$0xff] %vm724_vm1, %v1519_v52  ;;  %v1522_v59 = vadd.f32 %v1521_v55, %v1520_v53  ;;  %919 = vst.msk [vmem:[#allocation4 + $0x80] sm:$0xff] %vm724_vm1, %v2226_v56  ;;  %v2231_v61 = vadd.f32 %v1569_v60, %v1568_v57  ;;  %v725_v62 = vsel %vm724_vm1, %v1519_v52, 0.0 }
 0x167   : > { %v726_v63 = vsel %vm724_vm1, %v1522_v59, 0.0  ;;  %v799_v0 = vmul.f32 %v1522_v59, %v1522_v59  ;;  %904 = vst.msk [vmem:[#allocation4 + $0x8] sm:$0xff] %vm724_vm1, %v1522_v59  ;;  %v815_v2 = vmul.f32 %v2231_v61, %v2231_v61  ;;  %920 = vst.msk [vmem:[#allocation4 + $0x88] sm:$0xff] %vm724_vm1, %v2231_v61  ;;  %v830_v3 = vsel %vm724_vm1, %v798_v58, 0.0 }
 0x168   : > { %v727_v1 = vadd.f32 %v726_v63, %v725_v62 }
 0x169   : > { %v831_v4 = vsel %vm724_vm1, %v799_v0, 0.0  ;;  %v1523_v5 = vpop.f32.mrb[4].mxu0  ;;  %v2243_v8 = vsel %vm724_vm1, %v815_v2, 0.0  ;;  %v1571_v9 = vpop.f32.mrb[4].mxu1 }
 0x16a   : > { %v832_v6 = vadd.f32 %v831_v4, %v830_v3  ;;  %v1524_v7 = vpop.f32.mrb[5].mxu0  ;;  %v1572_v12 = vpop.f32.mrb[5].mxu1 }
 0x16b   : > { %v1525_v10 = vadd.f32 %v1524_v7, %v1523_v5  ;;  %v1526_v11 = vpop.f32.mrb[6].mxu0  ;;  %v1573_v14 = vadd.f32 %v1572_v12, %v1571_v9  ;;  %v1574_v15 = vpop.f32.mrb[6].mxu1 }
 0x16c   : > { %v1527_v13 = vpop.f32.mrb[7].mxu0  ;;  %v1575_v19 = vpop.f32.mrb[7].mxu1 }
 0x16d   : > { %v728_v16 = vsel %vm724_vm1, %v1525_v10, 0.0  ;;  %v800_v17 = vmul.f32 %v1525_v10, %v1525_v10  ;;  %905 = vst.msk [vmem:[#allocation4 + $0x10] sm:$0xff] %vm724_vm1, %v1525_v10  ;;  %v1528_v18 = vadd.f32 %v1527_v13, %v1526_v11  ;;  %v2248_v21 = vsel %vm724_vm1, %v1573_v14, 0.0  ;;  %921 = vst.msk [vmem:[#allocation4 + $0x90] sm:$0xff] %vm724_vm1, %v1573_v14 }
 0x16e   : > { %v729_v20 = vadd.f32 %v728_v16, %v727_v1  ;;  %v816_v22 = vmul.f32 %v1573_v14, %v1573_v14  ;;  %v1576_v23 = vadd.f32 %v1575_v19, %v1574_v15 }
 0x16f   : > { %v833_v24 = vsel %vm724_vm1, %v800_v17, 0.0  ;;  %v730_v25 = vsel %vm724_vm1, %v1528_v18, 0.0  ;;  %v801_v26 = vmul.f32 %v1528_v18, %v1528_v18  ;;  %906 = vst.msk [vmem:[#allocation4 + $0x18] sm:$0xff] %vm724_vm1, %v1528_v18 }
 0x170   : > { %v834_v27 = vadd.f32 %v833_v24, %v832_v6  ;;  %v731_v28 = vadd.f32 %v730_v25, %v729_v20  ;;  %v2255_v29 = vsel %vm724_vm1, %v816_v22, 0.0  ;;  %v2258_v30 = vsel %vm724_vm1, %v1576_v23, 0.0  ;;  %922 = vst.msk [vmem:[#allocation4 + $0x98] sm:$0xff] %vm724_vm1, %v1576_v23 }
 0x171   : > { %v835_v31 = vsel %vm724_vm1, %v801_v26, 0.0  ;;  %v1529_v32 = vpop.f32.mrb[8].mxu0  ;;  %v817_v33 = vmul.f32 %v1576_v23, %v1576_v23  ;;  %v1577_v36 = vpop.f32.mrb[8].mxu1 }
 0x172   : > { %v836_v34 = vadd.f32 %v835_v31, %v834_v27  ;;  %v1530_v35 = vpop.f32.mrb[9].mxu0  ;;  %v1578_v40 = vpop.f32.mrb[9].mxu1 }
 0x173   : > { %v1531_v37 = vadd.f32 %v1530_v35, %v1529_v32  ;;  %v1532_v38 = vpop.f32.mrb[10].mxu0  ;;  %v2263_v39 = vsel %vm724_vm1, %v817_v33, 0.0  ;;  %v1579_v42 = vadd.f32 %v1578_v40, %v1577_v36  ;;  %v1580_v43 = vpop.f32.mrb[10].mxu1 }
 0x174   : > { %v1533_v41 = vpop.f32.mrb[11].mxu0  ;;  %v1581_v47 = vpop.f32.mrb[11].mxu1 }
 0x175   : > { %v732_v44 = vsel %vm724_vm1, %v1531_v37, 0.0  ;;  %v802_v45 = vmul.f32 %v1531_v37, %v1531_v37  ;;  %907 = vst.msk [vmem:[#allocation4 + $0x20] sm:$0xff] %vm724_vm1, %v1531_v37  ;;  %v1534_v46 = vadd.f32 %v1533_v41, %v1532_v38  ;;  %v2268_v49 = vsel %vm724_vm1, %v1579_v42, 0.0  ;;  %923 = vst.msk [vmem:[#allocation4 + $0xa0] sm:$0xff] %vm724_vm1, %v1579_v42 }
 0x176   : > { %v733_v48 = vadd.f32 %v732_v44, %v731_v28  ;;  %v818_v50 = vmul.f32 %v1579_v42, %v1579_v42  ;;  %v1582_v51 = vadd.f32 %v1581_v47, %v1580_v43 }
 0x177   : > { %v837_v52 = vsel %vm724_vm1, %v802_v45, 0.0  ;;  %v734_v53 = vsel %vm724_vm1, %v1534_v46, 0.0  ;;  %v803_v54 = vmul.f32 %v1534_v46, %v1534_v46  ;;  %908 = vst.msk [vmem:[#allocation4 + $0x28] sm:$0xff] %vm724_vm1, %v1534_v46 }
 0x178   : > { %v838_v55 = vadd.f32 %v837_v52, %v836_v34  ;;  %v735_v57 = vadd.f32 %v734_v53, %v733_v48  ;;  %v2275_v58 = vsel %vm724_vm1, %v818_v50, 0.0  ;;  %v2278_v59 = vsel %vm724_vm1, %v1582_v51, 0.0  ;;  %924 = vst.msk [vmem:[#allocation4 + $0xa8] sm:$0xff] %vm724_vm1, %v1582_v51 }
 0x179   : > { %v839_v60 = vsel %vm724_vm1, %v803_v54, 0.0  ;;  %v1535_v62 = vpop.f32.mrb[12].mxu0  ;;  %v819_v63 = vmul.f32 %v1582_v51, %v1582_v51  ;;  %v1583_v2 = vpop.f32.mrb[12].mxu1 }
 0x17a   : > { %v840_v0 = vadd.f32 %v839_v60, %v838_v55  ;;  %v1536_v1 = vpop.f32.mrb[13].mxu0  ;;  %v1584_v6 = vpop.f32.mrb[13].mxu1 }
 0x17b   : > { %v1537_v3 = vadd.f32 %v1536_v1, %v1535_v62  ;;  %v1538_v4 = vpop.f32.mrb[14].mxu0  ;;  %v2283_v5 = vsel %vm724_vm1, %v819_v63, 0.0  ;;  %v1585_v9 = vadd.f32 %v1584_v6, %v1583_v2  ;;  %v1586_v10 = vpop.f32.mrb[14].mxu1 }
 0x17c   : > { %v1539_v7 = vpop.f32.mrb[15].mxu0  ;;  %v1587_v14 = vpop.f32.mrb[15].mxu1 }
 0x17d   : > { %v736_v11 = vsel %vm724_vm1, %v1537_v3, 0.0  ;;  %v804_v12 = vmul.f32 %v1537_v3, %v1537_v3  ;;  %909 = vst.msk [vmem:[#allocation4 + $0x30] sm:$0xff] %vm724_vm1, %v1537_v3  ;;  %v1540_v13 = vadd.f32 %v1539_v7, %v1538_v4  ;;  %v2288_v16 = vsel %vm724_vm1, %v1585_v9, 0.0  ;;  %925 = vst.msk [vmem:[#allocation4 + $0xb0] sm:$0xff] %vm724_vm1, %v1585_v9 }
 0x17e   : > { %v737_v15 = vadd.f32 %v736_v11, %v735_v57  ;;  %v820_v17 = vmul.f32 %v1585_v9, %v1585_v9  ;;  %v1588_v18 = vadd.f32 %v1587_v14, %v1586_v10 }
 0x17f   : > { %v841_v19 = vsel %vm724_vm1, %v804_v12, 0.0  ;;  %v738_v20 = vsel %vm724_vm1, %v1540_v13, 0.0  ;;  %v805_v22 = vmul.f32 %v1540_v13, %v1540_v13  ;;  %910 = vst.msk [vmem:[#allocation4 + $0x38] sm:$0xff] %vm724_vm1, %v1540_v13 }
 0x180   : > { %v842_v23 = vadd.f32 %v841_v19, %v840_v0  ;;  %v739_v24 = vadd.f32 %v738_v20, %v737_v15  ;;  %v2295_v25 = vsel %vm724_vm1, %v820_v17, 0.0  ;;  %v2298_v26 = vsel %vm724_vm1, %v1588_v18, 0.0  ;;  %926 = vst.msk [vmem:[#allocation4 + $0xb8] sm:$0xff] %vm724_vm1, %v1588_v18 }
 0x181   : > { %v843_v27 = vsel %vm724_vm1, %v805_v22, 0.0  ;;  %v1541_v28 = vpop.f32.mrb[16].mxu0  ;;  %v821_v31 = vmul.f32 %v1588_v18, %v1588_v18  ;;  %v1589_v34 = vpop.f32.mrb[16].mxu1 }
 0x182   : > { %v844_v32 = vadd.f32 %v843_v27, %v842_v23  ;;  %v1542_v33 = vpop.f32.mrb[17].mxu0  ;;  %v1590_v38 = vpop.f32.mrb[17].mxu1 }
 0x183   : > { %v1543_v35 = vadd.f32 %v1542_v33, %v1541_v28  ;;  %v1544_v36 = vpop.f32.mrb[18].mxu0  ;;  %v2303_v37 = vsel %vm724_vm1, %v821_v31, 0.0  ;;  %v1591_v41 = vadd.f32 %v1590_v38, %v1589_v34  ;;  %v1592_v42 = vpop.f32.mrb[18].mxu1 }
 0x184   : > { %v1545_v40 = vpop.f32.mrb[19].mxu0  ;;  %v1593_v46 = vpop.f32.mrb[19].mxu1 }
 0x185   : > { %v740_v43 = vsel %vm724_vm1, %v1543_v35, 0.0  ;;  %v806_v44 = vmul.f32 %v1543_v35, %v1543_v35  ;;  %911 = vst.msk [vmem:[#allocation4 + $0x40] sm:$0xff] %vm724_vm1, %v1543_v35  ;;  %v1546_v45 = vadd.f32 %v1545_v40, %v1544_v36  ;;  %v2308_v48 = vsel %vm724_vm1, %v1591_v41, 0.0  ;;  %927 = vst.msk [vmem:[#allocation4 + $0xc0] sm:$0xff] %vm724_vm1, %v1591_v41 }
 0x186   : > { %v741_v47 = vadd.f32 %v740_v43, %v739_v24  ;;  %v822_v50 = vmul.f32 %v1591_v41, %v1591_v41  ;;  %v1594_v51 = vadd.f32 %v1593_v46, %v1592_v42 }
 0x187   : > { %v845_v52 = vsel %vm724_vm1, %v806_v44, 0.0  ;;  %v742_v53 = vsel %vm724_vm1, %v1546_v45, 0.0  ;;  %v807_v54 = vmul.f32 %v1546_v45, %v1546_v45  ;;  %912 = vst.msk [vmem:[#allocation4 + $0x48] sm:$0xff] %vm724_vm1, %v1546_v45 }
 0x188   : > { %v846_v55 = vadd.f32 %v845_v52, %v844_v32  ;;  %v743_v57 = vadd.f32 %v742_v53, %v741_v47  ;;  %v2315_v60 = vsel %vm724_vm1, %v822_v50, 0.0  ;;  %v2318_v62 = vsel %vm724_vm1, %v1594_v51, 0.0  ;;  %928 = vst.msk [vmem:[#allocation4 + $0xc8] sm:$0xff] %vm724_vm1, %v1594_v51 }
 0x189   : > { %v847_v63 = vsel %vm724_vm1, %v807_v54, 0.0  ;;  %v1547_v0 = vpop.f32.mrb[20].mxu0  ;;  %v823_v1 = vmul.f32 %v1594_v51, %v1594_v51  ;;  %v1595_v4 = vpop.f32.mrb[20].mxu1 }
 0x18a   : > { %v848_v2 = vadd.f32 %v847_v63, %v846_v55  ;;  %v1548_v3 = vpop.f32.mrb[21].mxu0  ;;  %v1596_v10 = vpop.f32.mrb[21].mxu1 }
 0x18b   : > { %v1549_v6 = vadd.f32 %v1548_v3, %v1547_v0  ;;  %v1550_v7 = vpop.f32.mrb[22].mxu0  ;;  %v2323_v9 = vsel %vm724_vm1, %v823_v1, 0.0  ;;  %v1597_v12 = vadd.f32 %v1596_v10, %v1595_v4  ;;  %v1598_v13 = vpop.f32.mrb[22].mxu1 }
 0x18c   : > { %v1551_v11 = vpop.f32.mrb[23].mxu0  ;;  %v1599_v18 = vpop.f32.mrb[23].mxu1 }
 0x18d   : > { %v744_v14 = vsel %vm724_vm1, %v1549_v6, 0.0  ;;  %v808_v15 = vmul.f32 %v1549_v6, %v1549_v6  ;;  %913 = vst.msk [vmem:[#allocation4 + $0x50] sm:$0xff] %vm724_vm1, %v1549_v6  ;;  %v1552_v17 = vadd.f32 %v1551_v11, %v1550_v7  ;;  %v2328_v20 = vsel %vm724_vm1, %v1597_v12, 0.0  ;;  %929 = vst.msk [vmem:[#allocation4 + $0xd0] sm:$0xff] %vm724_vm1, %v1597_v12 }
 0x18e   : > { %v745_v19 = vadd.f32 %v744_v14, %v743_v57  ;;  %v824_v22 = vmul.f32 %v1597_v12, %v1597_v12  ;;  %v1600_v23 = vadd.f32 %v1599_v18, %v1598_v13 }
 0x18f   : > { %v849_v24 = vsel %vm724_vm1, %v808_v15, 0.0  ;;  %v746_v27 = vsel %vm724_vm1, %v1552_v17, 0.0  ;;  %v809_v28 = vmul.f32 %v1552_v17, %v1552_v17  ;;  %914 = vst.msk [vmem:[#allocation4 + $0x58] sm:$0xff] %vm724_vm1, %v1552_v17 }
 0x190   : > { %v850_v31 = vadd.f32 %v849_v24, %v848_v2  ;;  %v747_v32 = vadd.f32 %v746_v27, %v745_v19  ;;  %v2335_v33 = vsel %vm724_vm1, %v824_v22, 0.0  ;;  %v2338_v34 = vsel %vm724_vm1, %v1600_v23, 0.0  ;;  %930 = vst.msk [vmem:[#allocation4 + $0xd8] sm:$0xff] %vm724_vm1, %v1600_v23 }
 0x191   : > { %v851_v35 = vsel %vm724_vm1, %v809_v28, 0.0  ;;  %v1553_v36 = vpop.f32.mrb[24].mxu0  ;;  %v825_v38 = vmul.f32 %v1600_v23, %v1600_v23  ;;  %v1601_v42 = vpop.f32.mrb[24].mxu1 }
 0x192   : > { %v852_v40 = vadd.f32 %v851_v35, %v850_v31  ;;  %v1554_v41 = vpop.f32.mrb[25].mxu0  ;;  %v1602_v46 = vpop.f32.mrb[25].mxu1 }
 0x193   : > { %v1555_v43 = vadd.f32 %v1554_v41, %v1553_v36  ;;  %v1556_v44 = vpop.f32.mrb[26].mxu0  ;;  %v2343_v45 = vsel %vm724_vm1, %v825_v38, 0.0  ;;  %v1603_v50 = vadd.f32 %v1602_v46, %v1601_v42  ;;  %v1604_v51 = vpop.f32.mrb[26].mxu1 }
 0x194   : > { %v1557_v47 = vpop.f32.mrb[27].mxu0  ;;  %v1605_v55 = vpop.f32.mrb[27].mxu1 }
 0x195   : > { %v748_v52 = vsel %vm724_vm1, %v1555_v43, 0.0  ;;  %v810_v53 = vmul.f32 %v1555_v43, %v1555_v43  ;;  %915 = vst.msk [vmem:[#allocation4 + $0x60] sm:$0xff] %vm724_vm1, %v1555_v43  ;;  %v1558_v54 = vadd.f32 %v1557_v47, %v1556_v44  ;;  %v2348_v63 = vsel %vm724_vm1, %v1603_v50, 0.0  ;;  %931 = vst.msk [vmem:[#allocation4 + $0xe0] sm:$0xff] %vm724_vm1, %v1603_v50 }
 0x196   : > { %v749_v57 = vadd.f32 %v748_v52, %v747_v32  ;;  %v826_v0 = vmul.f32 %v1603_v50, %v1603_v50  ;;  %v1606_v1 = vadd.f32 %v1605_v55, %v1604_v51  ;;  %v814_v44 = vmul.f32 %v2226_v56, %v2226_v56 }
 0x197   : > { %v853_v2 = vsel %vm724_vm1, %v810_v53, 0.0  ;;  %v750_v3 = vsel %vm724_vm1, %v1558_v54, 0.0  ;;  %v811_v4 = vmul.f32 %v1558_v54, %v1558_v54  ;;  %916 = vst.msk [vmem:[#allocation4 + $0x68] sm:$0xff] %vm724_vm1, %v1558_v54  ;;  %v756_v55 = vsel %vm724_vm1, %v2226_v56, 0.0 }
 0x198   : > { %v854_v6 = vadd.f32 %v853_v2, %v852_v40  ;;  %v751_v7 = vadd.f32 %v750_v3, %v749_v57  ;;  %v2355_v10 = vsel %vm724_vm1, %v826_v0, 0.0  ;;  %v2358_v11 = vsel %vm724_vm1, %v1606_v1, 0.0  ;;  %932 = vst.msk [vmem:[#allocation4 + $0xe8] sm:$0xff] %vm724_vm1, %v1606_v1 }
 0x199   : > { %v855_v12 = vsel %vm724_vm1, %v811_v4, 0.0  ;;  %v1559_v13 = vpop.f32.mrb[28].mxu0  ;;  %v827_v14 = vmul.f32 %v1606_v1, %v1606_v1  ;;  %v1607_v18 = vpop.f32.mrb[28].mxu1  ;;  %v861_v3 = vsel %vm724_vm1, %v814_v44, 0.0  ;;  %v758_v4 = vsel %vm724_vm1, %v2231_v61, 0.0 }
 0x19a   : > { %v856_v15 = vadd.f32 %v855_v12, %v854_v6  ;;  %v1560_v17 = vpop.f32.mrb[29].mxu0  ;;  %v1608_v24 = vpop.f32.mrb[29].mxu1 }
 0x19b   : > { %v1561_v19 = vadd.f32 %v1560_v17, %v1559_v13  ;;  %v1562_v22 = vpop.f32.mrb[30].mxu0  ;;  %v887_v23 = vsel %vm724_vm1, %v827_v14, 0.0  ;;  %v1609_v28 = vadd.f32 %v1608_v24, %v1607_v18  ;;  %v1610_v31 = vpop.f32.mrb[30].mxu1 }
 0x19c   : > { %v1563_v27 = vpop.f32.mrb[31].mxu0  ;;  %v1611_v38 = vpop.f32.mrb[31].mxu1 }
 0x19d   : > { %v752_v32 = vsel %vm724_vm1, %v1561_v19, 0.0  ;;  %v812_v35 = vmul.f32 %v1561_v19, %v1561_v19  ;;  %917 = vst.msk [vmem:[#allocation4 + $0x70] sm:$0xff] %vm724_vm1, %v1561_v19  ;;  %v1564_v36 = vadd.f32 %v1563_v27, %v1562_v22  ;;  %v784_v41 = vsel %vm724_vm1, %v1609_v28, 0.0  ;;  %933 = vst.msk [vmem:[#allocation4 + $0xf0] sm:$0xff] %vm724_vm1, %v1609_v28 }
 0x19e   : > { %v753_v40 = vadd.f32 %v752_v32, %v751_v7  ;;  %v828_v42 = vmul.f32 %v1609_v28, %v1609_v28  ;;  %v1612_v43 = vadd.f32 %v1611_v38, %v1610_v31 }
 0x19f   : > { %v857_v46 = vsel %vm724_vm1, %v812_v35, 0.0  ;;  %v754_v47 = vsel %vm724_vm1, %v1564_v36, 0.0  ;;  %v813_v50 = vmul.f32 %v1564_v36, %v1564_v36  ;;  %918 = vst.msk [vmem:[#allocation4 + $0x78] sm:$0xff] %vm724_vm1, %v1564_v36 }
 0x1a0   : > { %v858_v51 = vadd.f32 %v857_v46, %v856_v15  ;;  %v755_v52 = vadd.f32 %v754_v47, %v753_v40  ;;  %v889_v53 = vsel %vm724_vm1, %v828_v42, 0.0  ;;  %v786_v54 = vsel %vm724_vm1, %v1612_v43, 0.0  ;;  %934 = vst.msk [vmem:[#allocation4 + $0xf8] sm:$0xff] %vm724_vm1, %v1612_v43  ;;  %v723_v40 = vld [vmem:[#allocation2] sm:$0x1] }
 0x1a1   : > { %v859_v57 = vsel %vm724_vm1, %v813_v50, 0.0  ;;  %v829_v0 = vmul.f32 %v1612_v43, %v1612_v43 }
 0x1a2   : > { %v757_v1 = vadd.f32 %v756_v55, %v755_v52  ;;  %v860_v2 = vadd.f32 %v859_v57, %v858_v51  ;;  %v945_v57 = vld [vmem:[#allocation10] sm:$0x1] }
 0x1a3   : > { %v891_v6 = vsel %vm724_vm1, %v829_v0, 0.0 }
 0x1a4   : > { %v759_v7 = vadd.f32 %v758_v4, %v757_v1  ;;  %v862_v12 = vadd.f32 %v861_v3, %v860_v2  ;;  %v949_v3 = vld [vmem:[#allocation10 + $0x1] sm:$0x1] }
 0x1a5   : > { %v952_v4 = vld [vmem:[#allocation4] sm:$0xff] }
 0x1a6   : > { %v761_v13 = vadd.f32 %v2248_v21, %v759_v7  ;;  %v864_v14 = vadd.f32 %v2243_v8, %v862_v12 }
 0x1a8   : > { %v763_v56 = vadd.f32 %v2258_v30, %v761_v13  ;;  %v866_v15 = vadd.f32 %v2255_v29, %v864_v14  ;;  %v954_v13 = vld [vmem:[#allocation4 + $0x10] sm:$0xff]  ;;  %v955_v14 = vld [vmem:[#allocation4 + $0x18] sm:$0xff] }
 0x1aa   : > { %v868_v17 = vadd.f32 %v2263_v39, %v866_v15  ;;  %v765_v18 = vadd.f32 %v2268_v49, %v763_v56  ;;  %v983_v56 = vld [vmem:[#allocation4 + $0xf8] sm:$0xff]  ;;  %v956_v15 = vld [vmem:[#allocation4 + $0x20] sm:$0xff] }
 0x1ac   : > { %v767_v19 = vadd.f32 %v2278_v59, %v765_v18  ;;  %v870_v61 = vadd.f32 %v2275_v58, %v868_v17  ;;  %v957_v17 = vld [vmem:[#allocation4 + $0x28] sm:$0xff]  ;;  %v958_v18 = vld [vmem:[#allocation4 + $0x30] sm:$0xff] }
 0x1ae   : > { %v769_v22 = vadd.f32 %v2288_v16, %v767_v19  ;;  %v872_v24 = vadd.f32 %v2283_v5, %v870_v61 }
 0x1b0   : > { %v771_v21 = vadd.f32 %v2298_v26, %v769_v22  ;;  %v874_v8 = vadd.f32 %v2295_v25, %v872_v24 }
 0x1b2   : > { %v773_v30 = vadd.f32 %v2308_v48, %v771_v21  ;;  %v876_v29 = vadd.f32 %v2303_v37, %v874_v8  ;;  %v959_v21 = vld [vmem:[#allocation4 + $0x38] sm:$0xff]  ;;  %v960_v8 = vld [vmem:[#allocation4 + $0x40] sm:$0xff] }
 0x1b4   : > { %v878_v39 = vadd.f32 %v2315_v60, %v876_v29  ;;  %v775_v49 = vadd.f32 %v2318_v62, %v773_v30  ;;  %v961_v30 = vld [vmem:[#allocation4 + $0x48] sm:$0xff] }
 0x1b6   : > { %v880_v59 = vadd.f32 %v2323_v9, %v878_v39  ;;  %v777_v58 = vadd.f32 %v2328_v20, %v775_v49 }
 0x1b8   : > { %v882_v16 = vadd.f32 %v2335_v33, %v880_v59  ;;  %v779_v5 = vadd.f32 %v2338_v34, %v777_v58  ;;  %v968_v58 = vld [vmem:[#allocation4 + $0x80] sm:$0xff] }
 0x1ba   : > { %v884_v26 = vadd.f32 %v2343_v45, %v882_v16  ;;  %v781_v25 = vadd.f32 %v2348_v63, %v779_v5  ;;  %v969_v16 = vld [vmem:[#allocation4 + $0x88] sm:$0xff]  ;;  %v962_v5 = vld [vmem:[#allocation4 + $0x50] sm:$0xff] }
 0x1bc   : > { %v886_v48 = vadd.f32 %v2355_v10, %v884_v26  ;;  %v783_v37 = vadd.f32 %v2358_v11, %v781_v25  ;;  %v797_v10 = vld [vmem:[#allocation3] sm:$0x1]  ;;  %v964_v25 = vld [vmem:[#allocation4 + $0x60] sm:$0xff] }
 0x1bd   : > { %v963_v26 = vld [vmem:[#allocation4 + $0x58] sm:$0xff] }
 0x1be   : > { %v888_v27 = vadd.f32 %v887_v23, %v886_v48  ;;  %v785_v60 = vadd.f32 %v784_v41, %v783_v37 }
 0x1c0   : > { %v890_v28 = vadd.f32 %v889_v53, %v888_v27  ;;  %v787_v62 = vadd.f32 %v786_v54, %v785_v60  ;;  %v984_v54 = vlaneseq }
 0x1c2   : > { %v788_v31 = vrot.slane %v787_v62, 4  ;;  %v892_v9 = vadd.f32 %v891_v6, %v890_v28  ;;  %v985_v55 = vshrl.u32 %v984_v54, 7  ;;  %v953_v6 = vld [vmem:[#allocation4 + $0x8] sm:$0xff] }
 0x1c3   : > { %v965_v28 = vld [vmem:[#allocation4 + $0x68] sm:$0xff] }
 0x1c4   : > { %v789_v32 = vadd.f32 %v788_v31, %v787_v62  ;;  %v893_v20 = vrot.slane %v892_v9, 4  ;;  %v986_v0 = vsub.s32 0, %v985_v55  ;;  %v966_v62 = vld [vmem:[#allocation4 + $0x70] sm:$0xff]  ;;  %v967_v31 = vld [vmem:[#allocation4 + $0x78] sm:$0xff] }
 0x1c5   : > { %v979_v55 = vld [vmem:[#allocation4 + $0xd8] sm:$0xff] }
 0x1c6   : > { %v790_v35 = vrot.slane %v789_v32, 2  ;;  %v894_v33 = vadd.f32 %v893_v20, %v892_v9 }
 0x1c8   : > { %v791_v36 = vadd.f32 %v790_v35, %v789_v32  ;;  %v895_v34 = vrot.slane %v894_v33, 2 }
 0x1ca   : > { %v792_v38 = vrot.slane %v791_v36, 1  ;;  %v896_v45 = vadd.f32 %v895_v34, %v894_v33  ;;  %v970_v33 = vld [vmem:[#allocation4 + $0x90] sm:$0xff]  ;;  %v972_v34 = vld [vmem:[#allocation4 + $0xa0] sm:$0xff] }
 0x1cc   : > { %v793_v63 = vadd.f32 %v792_v38, %v791_v36  ;;  %v897_v42 = vrot.slane %v896_v45, 1  ;;  %v971_v36 = vld [vmem:[#allocation4 + $0x98] sm:$0xff] }
 0x1ce   : > { %v794_v43 = vadd.f32 %v793_v63, %v723_v40  ;;  %v898_v11 = vadd.f32 %v897_v42, %v896_v45  ;;  %v973_v42 = vld [vmem:[#allocation4 + $0xa8] sm:$0xff] }
 0x1d0   : > { %796 = vst.msk [vmem:[#allocation2] sm:$0x1] %vm239_vm0, %v794_v43  ;;  %v899_v23 = vadd.f32 %v898_v11, %v797_v10  ;;  %v974_v10 = vld [vmem:[#allocation4 + $0xb0] sm:$0xff]  ;;  %v975_v43 = vld [vmem:[#allocation4 + $0xb8] sm:$0xff] }
 0x1d2   : > { %900 = vst.msk [vmem:[#allocation3] sm:$0x1] %vm239_vm0, %v899_v23 }
 0x1d7   : > { %v938_v41 = vld [vmem:[#allocation2] sm:$0x1] }
 0x1d8   : > { %v939_v44 = vmul.f32 0.00390625, %v938_v41 }
 0x1d9   : > { %v940_v46 = vld [vmem:[#allocation3] sm:$0x1] }
 0x1da   : > { %v941_v47 = vmul.f32 0.00390625, %v940_v46  ;;  %v942_v50 = vmul.f32 %v939_v44, %v939_v44  ;;  %v976_v46 = vld [vmem:[#allocation4 + $0xc0] sm:$0xff] }
 0x1dc   : > { %v943_v51 = vsub.f32 %v941_v47, %v942_v50  ;;  %v977_v47 = vld [vmem:[#allocation4 + $0xc8] sm:$0xff]  ;;  %v978_v50 = vld [vmem:[#allocation4 + $0xd0] sm:$0xff] }
 0x1de   : > { %v944_v52 = vmax.f32 %v943_v51, 0.0 }
 0x1e0   : > { %v946_v53 = vadd.f32 1e-05, %v944_v52 }
 0x1e2   : > { %1783 = vrsqrt.f32 %v946_v53 }
 0x1ec   : > { %v1784_v1 = vpop.eup %1783 }
 0x1ed   : > { %v948_v2 = vmul.f32 %v1784_v1, %v945_v57  ;;  %v980_v57 = vld [vmem:[#allocation4 + $0xe0] sm:$0xff] }
 0x1ef   : > { %v950_v7 = vmul.f32 %v948_v2, %v939_v44  ;;  %v2408_v12 = vrot.slane %v948_v2, %v986_v0 }
 0x1f1   : > { %v951_v19 = vsub.f32 %v949_v3, %v950_v7  ;;  %v1019_v61 = vmul.f32 %v2408_v12, %v983_v56  ;;  %v988_v22 = vmul.f32 %v2408_v12, %v952_v4  ;;  %v989_v24 = vmul.f32 %v2408_v12, %v953_v6  ;;  %v982_v6 = vld [vmem:[#allocation4 + $0xf0] sm:$0xff] }
 0x1f2   : > { %v990_v29 = vmul.f32 %v2408_v12, %v954_v13  ;;  %v991_v39 = vmul.f32 %v2408_v12, %v955_v14  ;;  %v992_v49 = vmul.f32 %v2408_v12, %v956_v15  ;;  %v993_v59 = vmul.f32 %v2408_v12, %v957_v17 }
 0x1f3   : > { %v2417_v48 = vrot.slane %v951_v19, %v986_v0  ;;  %v994_v37 = vmul.f32 %v2408_v12, %v958_v18  ;;  %v995_v27 = vmul.f32 %v2408_v12, %v959_v21  ;;  %v996_v60 = vmul.f32 %v2408_v12, %v960_v8  ;;  %v981_v0 = vld [vmem:[#allocation4 + $0xe8] sm:$0xff] }
 0x1f4   : > { %v997_v9 = vmul.f32 %v2408_v12, %v961_v30  ;;  %v998_v32 = vmul.f32 %v2408_v12, %v962_v5  ;;  %v999_v20 = vmul.f32 %v2408_v12, %v963_v26  ;;  %v1000_v35 = vmul.f32 %v2408_v12, %v964_v25 }
 0x1f5   : > { %v1055_v38 = vadd.f32 %v2417_v48, %v1019_v61  ;;  %v1001_v45 = vmul.f32 %v2408_v12, %v965_v28  ;;  %v1002_v40 = vmul.f32 %v2408_v12, %v966_v62  ;;  %v1003_v63 = vmul.f32 %v2408_v12, %v967_v31 }
 0x1f6   : > { %v1004_v11 = vmul.f32 %v2408_v12, %v968_v58  ;;  %v1005_v23 = vmul.f32 %v2408_v12, %v969_v16  ;;  %v1006_v41 = vmul.f32 %v2408_v12, %v970_v33  ;;  %v1007_v44 = vmul.f32 %v2408_v12, %v971_v36 }
 0x1f7   : > { %v1087_v51 = vmax.f32 %v1055_v38, 0.0  ;;  %v1008_v52 = vmul.f32 %v2408_v12, %v972_v34  ;;  %v1009_v53 = vmul.f32 %v2408_v12, %v973_v42  ;;  %v1010_v54 = vmul.f32 %v2408_v12, %v974_v10 }
 0x1f8   : > { %v1011_v1 = vmul.f32 %v2408_v12, %v975_v43  ;;  %v1012_v2 = vmul.f32 %v2408_v12, %v976_v46  ;;  %v1013_v3 = vmul.f32 %v2408_v12, %v977_v47  ;;  %v1014_v4 = vmul.f32 %v2408_v12, %v978_v50 }
 0x1f9   : > { %v1499_v7 = vpack.c.bf16 %v1087_v51, %v1087_v51  ;;  %v1015_v13 = vmul.f32 %v2408_v12, %v979_v55  ;;  %v1016_v14 = vmul.f32 %v2408_v12, %v980_v57  ;;  %v1017_v56 = vmul.f32 %v2408_v12, %v981_v0 }
 0x1fa   : > { %v1018_v15 = vmul.f32 %v2408_v12, %v982_v6  ;;  %v2447_v17 = vadd.f32 %v2417_v48, %v988_v22  ;;  %v2450_v18 = vadd.f32 %v2417_v48, %v989_v24  ;;  %v2453_v19 = vadd.f32 %v2417_v48, %v990_v29 }
 0x1fb   : > { %1248 = vst.msk [vmem:[%s2457_s22 + $0x7c] sm:$0xf] %vm1216_vm2, %v1499_v7  ;;  %v2462_v61 = vadd.f32 %v2417_v48, %v991_v39  ;;  %v2465_v12 = vadd.f32 %v2417_v48, %v992_v49  ;;  %v2468_v22 = vadd.f32 %v2417_v48, %v993_v59  ;;  %v2471_v24 = vadd.f32 %v2417_v48, %v994_v37 }
 0x1fc   : > { %v2474_v21 = vadd.f32 %v2417_v48, %v995_v27  ;;  %v2477_v8 = vadd.f32 %v2417_v48, %v996_v60  ;;  %v2480_v30 = vadd.f32 %v2417_v48, %v997_v9  ;;  %v2483_v29 = vadd.f32 %v2417_v48, %v998_v32 }
 0x1fd   : > { %v2486_v39 = vadd.f32 %v2417_v48, %v999_v20  ;;  %v2489_v49 = vadd.f32 %v2417_v48, %v1000_v35  ;;  %v2492_v59 = vadd.f32 %v2417_v48, %v1001_v45  ;;  %v2495_v58 = vadd.f32 %v2417_v48, %v1002_v40 }
 0x1fe   : > { %v2498_v16 = vadd.f32 %v2417_v48, %v1003_v63  ;;  %v2501_v5 = vadd.f32 %v2417_v48, %v1004_v11  ;;  %v2504_v26 = vadd.f32 %v2417_v48, %v1005_v23  ;;  %v2507_v25 = vadd.f32 %v2417_v48, %v1006_v41 }
 0x1ff   : > { %v2510_v37 = vadd.f32 %v2417_v48, %v1007_v44  ;;  %v2513_v27 = vadd.f32 %v2417_v48, %v1008_v52  ;;  %v2516_v60 = vadd.f32 %v2417_v48, %v1009_v53  ;;  %v2519_v28 = vadd.f32 %v2417_v48, %v1010_v54 }
 0x200   : > { %v2522_v62 = vadd.f32 %v2417_v48, %v1011_v1  ;;  %v2525_v31 = vadd.f32 %v2417_v48, %v1012_v2  ;;  %v2528_v9 = vadd.f32 %v2417_v48, %v1013_v3  ;;  %v2531_v32 = vadd.f32 %v2417_v48, %v1014_v4 }
 0x201   : > { %v2534_v20 = vadd.f32 %v2417_v48, %v1015_v13  ;;  %v2537_v35 = vadd.f32 %v2417_v48, %v1016_v14  ;;  %v2540_v33 = vadd.f32 %v2417_v48, %v1017_v56  ;;  %v2543_v36 = vadd.f32 %v2417_v48, %v1018_v15 }
 0x202   : > { %v1056_v34 = vmax.f32 %v2447_v17, 0.0  ;;  %v1057_v38 = vmax.f32 %v2450_v18, 0.0  ;;  %v1058_v45 = vmax.f32 %v2453_v19, 0.0  ;;  %v1059_v40 = vmax.f32 %v2462_v61, 0.0 }
 0x203   : > { %v1060_v63 = vmax.f32 %v2465_v12, 0.0  ;;  %v1061_v42 = vmax.f32 %v2468_v22, 0.0  ;;  %v1062_v10 = vmax.f32 %v2471_v24, 0.0  ;;  %v1063_v43 = vmax.f32 %v2474_v21, 0.0 }
 0x204   : > { %v1064_v11 = vmax.f32 %v2477_v8, 0.0  ;;  %v1065_v48 = vmax.f32 %v2480_v30, 0.0  ;;  %v1066_v23 = vmax.f32 %v2483_v29, 0.0  ;;  %v1067_v41 = vmax.f32 %v2486_v39, 0.0 }
 0x205   : > { %v1068_v44 = vmax.f32 %v2489_v49, 0.0  ;;  %v1069_v46 = vmax.f32 %v2492_v59, 0.0  ;;  %v1070_v47 = vmax.f32 %v2495_v58, 0.0  ;;  %v1071_v50 = vmax.f32 %v2498_v16, 0.0 }
 0x206   : > { %v1072_v51 = vmax.f32 %v2501_v5, 0.0  ;;  %v1073_v52 = vmax.f32 %v2504_v26, 0.0  ;;  %v1074_v53 = vmax.f32 %v2507_v25, 0.0  ;;  %v1075_v54 = vmax.f32 %v2510_v37, 0.0 }
 0x207   : > { %v1076_v55 = vmax.f32 %v2513_v27, 0.0  ;;  %v1077_v57 = vmax.f32 %v2516_v60, 0.0  ;;  %v1078_v0 = vmax.f32 %v2519_v28, 0.0  ;;  %v1079_v1 = vmax.f32 %v2522_v62, 0.0 }
 0x208   : > { %v1080_v2 = vmax.f32 %v2525_v31, 0.0  ;;  %v1081_v3 = vmax.f32 %v2528_v9, 0.0  ;;  %v1082_v4 = vmax.f32 %v2531_v32, 0.0  ;;  %v1083_v6 = vmax.f32 %v2534_v20, 0.0 }
 0x209   : > { %v1084_v7 = vmax.f32 %v2537_v35, 0.0  ;;  %v1085_v13 = vmax.f32 %v2540_v33, 0.0  ;;  %v1086_v14 = vmax.f32 %v2543_v36, 0.0  ;;  %v1468_v56 = vpack.c.bf16 %v1056_v34, %v1056_v34 }
 0x20a   : > { %v1469_v15 = vpack.c.bf16 %v1057_v38, %v1057_v38  ;;  %v1470_v17 = vpack.c.bf16 %v1058_v45, %v1058_v45  ;;  %v1471_v18 = vpack.c.bf16 %v1059_v40, %v1059_v40  ;;  %v1472_v19 = vpack.c.bf16 %v1060_v63, %v1060_v63 }
 0x20b   : > { %v1473_v61 = vpack.c.bf16 %v1061_v42, %v1061_v42  ;;  %v1474_v12 = vpack.c.bf16 %v1062_v10, %v1062_v10  ;;  %v1475_v22 = vpack.c.bf16 %v1063_v43, %v1063_v43  ;;  %v1476_v24 = vpack.c.bf16 %v1064_v11, %v1064_v11  ;;  %1217 = vst.msk [vmem:[%s2457_s22] sm:$0xf] %vm1216_vm2, %v1468_v56 }
 0x20c   : > { %v1477_v21 = vpack.c.bf16 %v1065_v48, %v1065_v48  ;;  %v1478_v8 = vpack.c.bf16 %v1066_v23, %v1066_v23  ;;  %v1479_v30 = vpack.c.bf16 %v1067_v41, %v1067_v41  ;;  %v1480_v29 = vpack.c.bf16 %v1068_v44, %v1068_v44  ;;  %1218 = vst.msk [vmem:[%s2457_s22 + $0x4] sm:$0xf] %vm1216_vm2, %v1469_v15 }
 0x20d   : > { %1219 = vst.msk [vmem:[%s2457_s22 + $0x8] sm:$0xf] %vm1216_vm2, %v1470_v17  ;;  %1220 = vst.msk [vmem:[%s2457_s22 + $0xc] sm:$0xf] %vm1216_vm2, %v1471_v18  ;;  %v1481_v39 = vpack.c.bf16 %v1069_v46, %v1069_v46  ;;  %v1482_v49 = vpack.c.bf16 %v1070_v47, %v1070_v47  ;;  %v1483_v59 = vpack.c.bf16 %v1071_v50, %v1071_v50 }
 0x20e   : > { %1221 = vst.msk [vmem:[%s2457_s22 + $0x10] sm:$0xf] %vm1216_vm2, %v1472_v19  ;;  %v1484_v58 = vpack.c.bf16 %v1072_v51, %v1072_v51  ;;  %1222 = vst.msk [vmem:[%s2457_s22 + $0x14] sm:$0xf] %vm1216_vm2, %v1473_v61  ;;  %v1485_v16 = vpack.c.bf16 %v1073_v52, %v1073_v52  ;;  %v1486_v5 = vpack.c.bf16 %v1074_v53, %v1074_v53 }
 0x20f   : > { %1223 = vst.msk [vmem:[%s2457_s22 + $0x18] sm:$0xf] %vm1216_vm2, %v1474_v12  ;;  %1224 = vst.msk [vmem:[%s2457_s22 + $0x1c] sm:$0xf] %vm1216_vm2, %v1475_v22  ;;  %v1487_v26 = vpack.c.bf16 %v1075_v54, %v1075_v54  ;;  %v1488_v25 = vpack.c.bf16 %v1076_v55, %v1076_v55  ;;  %v1489_v37 = vpack.c.bf16 %v1077_v57, %v1077_v57 }
 0x210   : > { %1225 = vst.msk [vmem:[%s2457_s22 + $0x20] sm:$0xf] %vm1216_vm2, %v1476_v24  ;;  %1226 = vst.msk [vmem:[%s2457_s22 + $0x24] sm:$0xf] %vm1216_vm2, %v1477_v21  ;;  %v1490_v27 = vpack.c.bf16 %v1078_v0, %v1078_v0  ;;  %v1491_v60 = vpack.c.bf16 %v1079_v1, %v1079_v1  ;;  %v1492_v28 = vpack.c.bf16 %v1080_v2, %v1080_v2 }
 0x211   : > { %1227 = vst.msk [vmem:[%s2457_s22 + $0x28] sm:$0xf] %vm1216_vm2, %v1478_v8  ;;  %1228 = vst.msk [vmem:[%s2457_s22 + $0x2c] sm:$0xf] %vm1216_vm2, %v1479_v30  ;;  %v1493_v62 = vpack.c.bf16 %v1081_v3, %v1081_v3  ;;  %v1494_v31 = vpack.c.bf16 %v1082_v4, %v1082_v4  ;;  %v1495_v9 = vpack.c.bf16 %v1083_v6, %v1083_v6 }
 0x212   : > { %1229 = vst.msk [vmem:[%s2457_s22 + $0x30] sm:$0xf] %vm1216_vm2, %v1480_v29  ;;  %1230 = vst.msk [vmem:[%s2457_s22 + $0x34] sm:$0xf] %vm1216_vm2, %v1481_v39  ;;  %v1496_v32 = vpack.c.bf16 %v1084_v7, %v1084_v7  ;;  %v1497_v20 = vpack.c.bf16 %v1085_v13, %v1085_v13  ;;  %v1498_v35 = vpack.c.bf16 %v1086_v14, %v1086_v14 }
 0x213   : > { %1231 = vst.msk [vmem:[%s2457_s22 + $0x38] sm:$0xf] %vm1216_vm2, %v1482_v49  ;;  %1232 = vst.msk [vmem:[%s2457_s22 + $0x3c] sm:$0xf] %vm1216_vm2, %v1483_v59 }
 0x214   : > { %1233 = vst.msk [vmem:[%s2457_s22 + $0x40] sm:$0xf] %vm1216_vm2, %v1484_v58  ;;  %1234 = vst.msk [vmem:[%s2457_s22 + $0x44] sm:$0xf] %vm1216_vm2, %v1485_v16 }
 0x215   : > { %1235 = vst.msk [vmem:[%s2457_s22 + $0x48] sm:$0xf] %vm1216_vm2, %v1486_v5  ;;  %1236 = vst.msk [vmem:[%s2457_s22 + $0x4c] sm:$0xf] %vm1216_vm2, %v1487_v26 }
 0x216   : > { %1237 = vst.msk [vmem:[%s2457_s22 + $0x50] sm:$0xf] %vm1216_vm2, %v1488_v25  ;;  %1238 = vst.msk [vmem:[%s2457_s22 + $0x54] sm:$0xf] %vm1216_vm2, %v1489_v37 }
 0x217   : > { %1239 = vst.msk [vmem:[%s2457_s22 + $0x58] sm:$0xf] %vm1216_vm2, %v1490_v27  ;;  %1240 = vst.msk [vmem:[%s2457_s22 + $0x5c] sm:$0xf] %vm1216_vm2, %v1491_v60 }
 0x218   : > { %1241 = vst.msk [vmem:[%s2457_s22 + $0x60] sm:$0xf] %vm1216_vm2, %v1492_v28  ;;  %1242 = vst.msk [vmem:[%s2457_s22 + $0x64] sm:$0xf] %vm1216_vm2, %v1493_v62 }
 0x219   : > { %1243 = vst.msk [vmem:[%s2457_s22 + $0x68] sm:$0xf] %vm1216_vm2, %v1494_v31  ;;  %1244 = vst.msk [vmem:[%s2457_s22 + $0x6c] sm:$0xf] %vm1216_vm2, %v1495_v9 }
 0x21a   : > { %1245 = vst.msk [vmem:[%s2457_s22 + $0x70] sm:$0xf] %vm1216_vm2, %v1496_v32  ;;  %1246 = vst.msk [vmem:[%s2457_s22 + $0x74] sm:$0xf] %vm1216_vm2, %v1497_v20 }
 0x21b   : > { %1247 = vst.msk [vmem:[%s2457_s22 + $0x78] sm:$0xf] %vm1216_vm2, %v1498_v35 }
 0x21c   : > { %1884 = shalt.err (!%p1881_p11)
}
 0x21d   : > { %s1885_s9 = scalar_lea.hbm %s2623_s8, 2048  ;;  %s1889_s29 = scalar_lea.hbm %s2697_s3, 4096 }
 0x21e   : > { %p1886_p0 = scmp.ne.s32.totalorder %s2623_s8, %s1885_s9  ;;  %p1890_p6 = scmp.lt.u32.totalorder %s2623_s8, %s2697_s3 }
 0x21f   : > { %p1891_p7 = scmp.lt.u32.totalorder %s1889_s29, %s1885_s9  ;;  %p1893_p8 = scmp.lt.u32.totalorder %s1885_s9, %s2623_s8 }
 0x220   : > { %p1887_p4 = pnand %p1886_p0, %p2712_p12 }
 0x221   : > { %p1892_p2 = por %p1891_p7, %p1890_p6 }
 0x222   : > { %p1888_p13 = pneg %p1887_p4 }
 0x223   : > { %p1894_p1 = por %p1893_p8, %p1892_p2 }
 0x225   : > { %p1895_p10 = pnand %p1894_p1, %p1888_p13 }
 0x227   : > { %1898 = shalt.err (!%p1895_p10)
}
 0x228   : > { %s1968_s22 = smov 64   ;;  %s1969_s24 = smov 4  }
 0x229   : > { %1639 = dma.vmem_to_hbm [thread:$0]  (%p2712_p12), %s2625_s6, 2048, %s2623_s8, %s1250_s26, %s1968_s22, %s1968_s22, %s1969_s24  }
 0x22a PF: > { %s1278_s15 = sand.u32 1, %s1937_s12   ;;  %p2713_p3 = scmp.ne.s32.totalorder %s2705_s23, 0 }
 0x22b   : > { %p2714_p5 = scmp.ge.s32.totalorder %s1957_s17, 2  ;;  %s1279_s7 = scalar_lea.sflag [#allocation7], %s1278_s15 }
 0x22d   : > { %p1653_p9 = pnand %p2714_p5, %p2713_p3 }
 0x22f   : > { %1932 = dma.done.wait (!%p1653_p9), %s1279_s7, 2048  }
 0x230   : > { %1934 = vsyncadd (!%p1653_p9), %s1279_s7, 4294965248  ;;  %s20_s17 = sadd.s32 1, %s1957_s17   ;;  %s2715_s12 = smov %s1941_s13 }
 0x231   : > { %p17_p11 = scmp.ge.s32.totalorder %s20_s17, 4   ;;  %s2716_s13 = smov %s1945_s14 }
 0x232   : > { %s2717_s14 = smov %s2132_s30  ;;  %s2718_s15 = smov %s1953_s16 }
 0x233   : > { %s2719_s16 = smov %s2721_s11  ;;  %19 = sbr.rel (!%p17_p11) target bundleno = 7 (0x7), region = 94 }
 0x23a   :  { %1284 = vsyncpa [#allocation6], 1 }
 0x23b   :  { %1286 = vsyncpa [#allocation6 + $0x1], 1 }
 0x23c   :  { %1287 = vsyncpa [#allocation9], 1 }
 0x23d   :  { %1288 = vsyncpa [#allocation7], 1 }
 0x23e   :  { %1290 = vsyncpa [#allocation7 + $0x1], 1 }

// kernel: rgb_block_forward.10
= control target key start
LH: loop header
LB: loop body
LE: loop exit
PB: predicated region body
PF: predicated region fallthrough
CT: control target
= control target key end

     0   :  { %8 = vsyncpa [#allocation6], 0  ;;  %s1423_s0 = inlined_call_operand.hbm [shape: bf16[2,64,144], index: 0, kind: input, shape index: {}]   ;;  %s1424_s1 = inlined_call_operand.hbm [shape: bf16[144,32], index: 1, kind: input, shape index: {}]   ;;  %s1425_s2 = inlined_call_operand.hbm [shape: f32[2,32], index: 2, kind: input, shape index: {}]   ;;  %s1426_s3 = inlined_call_operand.hbm [shape: bf16[2,64,32], index: 3, kind: output, shape index: {}]  }
   0x1   :  { %10 = vsyncpa [#allocation6 + $0x1], 0 }
   0x2   :  { %11 = vsyncpa [#allocation9], 0 }
   0x3   :  { %12 = vsyncpa [#allocation7], 0 }
   0x4   :  { %14 = vsyncpa [#allocation7 + $0x1], 0  ;;  %s1117_s12 = smov 0   ;;  %s1119_s13 = smov 0  }
   0x5   :  { %s1121_s14 = smov 0   ;;  %s1123_s15 = smov 0  }
   0x6   :  { %s1125_s16 = smov 0   ;;  %s1127_s17 = smov 0  }
   0x7 LB: > { %s721_s18 = sadd.s32 4294967295, %s1083_s17   ;;  %s722_s19 = sadd.s32 4294967294, %s1083_s17   ;;  %s1083_s17 = sphi %s1127_s17, %s20_s17   ;;  %s1079_s16 = sphi %s1125_s16, %s1448_s16   ;;  %s1075_s15 = sphi %s1123_s15, %s1447_s15   ;;  %s1071_s14 = sphi %s1121_s14, %s1446_s14   ;;  %s1067_s13 = sphi %s1119_s13, %s1445_s13   ;;  %s1063_s12 = sphi %s1117_s12, %s1444_s12  }
   0x8   : > { %p54_p0 = scmp.ne.s32.totalorder %s1067_s13, %s1063_s12  ;;  %p1151_p1 = scmp.eq.s32.totalorder %s721_s18, 0 }
   0x9   : > { %p1155_p2 = scmp.eq.s32.totalorder %s721_s18, 1  ;;  %p126_p3 = scmp.eq.s32.totalorder %s722_s19, 1 }
   0xa   : > { %s1431_s20 = scalar_select %p1151_p1, 1, 0 }
   0xb   : > { %p1161_p4 = por %p1151_p1, %p54_p0  ;;  %p723_p5 = scmp.ge.s32.totalorder %s1083_s17, 1 }
   0xc   : > { %p1166_p6 = por %p126_p3, %p54_p0  ;;  %p133_p7 = scmp.lt.s32.totalorder %s1083_s17, 3 }
   0xd   : > { %s1433_s22 = scalar_select %p1161_p4, 1, 0 }
   0xe   : > { %s1434_s23 = scalar_select %p1166_p6, 1, 0 }
   0xf   : > { %p1171_p8 = pnand %p723_p5, %p133_p7  ;;  %s1085_s25 = smov [#allocation8]  }
  0x10   : > { %s145_s26 = sshll.u32 %s1085_s25, 4  ;;  %s1086_s28 = smov [#allocation10]   ;;  %s1175_s26 = int_to_ptr.vmem [resolvable:$true] %s145_s26 }
  0x11   : > { %p809_p9 = pneg %p1171_p8  ;;  %s159_s29 = sshll.u32 %s1086_s28, 4  ;;  %s1186_s29 = int_to_ptr.vmem [resolvable:$true] %s159_s29 }
  0x12   : > { %s911_s5 = scalar_lea.hbm %s1424_s1, 1152 }
  0x13   : > { %p1182_p11 = pnand %p809_p9, %p1151_p1  ;;  %p912_p12 = scmp.ne.s32.totalorder %s1424_s1, %s911_s5 }
  0x14   : > { %p918_p5 = scmp.lt.u32.totalorder %s911_s5, %s1424_s1 }
  0x15   : > { %p913_p13 = pneg %p1182_p11 }
  0x17   : > { %p914_p0 = pnand %p913_p13, %p912_p12 }
  0x19   : > { %p915_p3 = pneg %p914_p0 }
  0x1b   : > { %p920_p7 = pnand %p918_p5, %p915_p3 }
  0x1d   : > { %923 = shalt.err (!%p920_p7)
}
  0x1e   : > { %s924_s10 = scalar_lea.vmem %s1175_s26, 1152  ;;  %p932_p1 = scmp.lt.s32.totalorder %s1175_s26, %s1175_s26 }
  0x1f   : > { %p925_p9 = scmp.ne.s32.totalorder %s1175_s26, %s924_s10  ;;  %p933_p12 = scmp.lt.s32.totalorder %s924_s10, %s924_s10 }
  0x21   : > { %p927_p10 = pnand %p925_p9, %p913_p13  ;;  %p934_p0 = por %p933_p12, %p932_p1 }
  0x23   : > { %p928_p6 = pneg %p927_p10 }
  0x25   : > { %p935_p4 = pnand %p934_p0, %p928_p6 }
  0x27   : > { %938 = shalt.err (!%p935_p4)
}
  0x28   : > { %s1087_s11 = smov 64   ;;  %s1088_s18 = smov 4  }
  0x29   : > { %812 = dma.hbm_to_vmem [thread:$0]  (!%p1182_p11), %s1424_s1, 1152, %s1175_s26, [#allocation9], %s1087_s11, %s1087_s11, %s1088_s18  }
  0x2a   : > { %s939_s4 = scalar_lea.hbm %s1425_s2, 32 }
  0x2b   : > { %p940_p1 = scmp.ne.s32.totalorder %s1425_s2, %s939_s4  ;;  %p946_p10 = scmp.lt.u32.totalorder %s939_s4, %s1425_s2 }
  0x2d   : > { %p942_p4 = pnand %p940_p1, %p913_p13 }
  0x2f   : > { %p943_p6 = pneg %p942_p4 }
  0x31   : > { %p948_p3 = pnand %p946_p10, %p943_p6 }
  0x33   : > { %951 = shalt.err (!%p948_p3)
}
  0x34   : > { %s952_s26 = scalar_lea.vmem %s1186_s29, 32  ;;  %p960_p12 = scmp.lt.s32.totalorder %s1186_s29, %s1186_s29 }
  0x35   : > { %p953_p5 = scmp.ne.s32.totalorder %s1186_s29, %s952_s26  ;;  %p961_p0 = scmp.lt.s32.totalorder %s952_s26, %s952_s26 }
  0x37   : > { %p955_p7 = pnand %p953_p5, %p913_p13  ;;  %p962_p1 = por %p961_p0, %p960_p12 }
  0x39   : > { %p956_p9 = pneg %p955_p7 }
  0x3b   : > { %p963_p4 = pnand %p962_p1, %p956_p9 }
  0x3d   : > { %966 = shalt.err (!%p963_p4)
}
  0x3e   : > { %815 = dma.hbm_to_vmem [thread:$0]  (!%p1182_p11), %s1425_s2, 32, %s1186_s29, [#allocation9]  }
  0x3f   : > { %s32_s11 = sadd.s32 1, %s1079_s16  ;;  %s41_s18 = sadd.s32 1, %s1071_s14 }
  0x40   : > { %p34_p13 = scmp.ge.s32.totalorder %s32_s11, 2  ;;  %p48_p6 = scmp.ne.s32.totalorder %s1071_s14, %s1067_s13 }
  0x41   : > { %p49_p10 = scmp.eq.s32.totalorder %s1083_s17, 0  ;;  %p826_p3 = scmp.lt.s32.totalorder %s1083_s17, 2 }
  0x42   : > { %s1450_s11 = smov (%p34_p13, %s32_s11), 0  ;;  %p1250_p7 = por %p1155_p2, %p48_p6 }
  0x43   : > { %p50_p5 = por %p49_p10, %p48_p6  ;;  %s36_s19 = ssub.s32 %s1079_s16, %s1450_s11 }
  0x44   : > { %s1437_s27 = scalar_select %p1250_p7, 1, 0 }
  0x45   : > { %s170_s25 = sand.u32 1, %s1071_s14   ;;  %p39_p9 = scmp.eq.s32.totalorder %s36_s19, 0 }
  0x46   : > { %s727_s29 = sshll.u32 %s170_s25, 6  ;;  %s769_s28 = sshll.u32 %s1079_s16, 10 }
  0x47   : > { %s1259_s30 = scalar_select %p39_p9, %s1071_s14, %s41_s18  }
  0x48   : > { %s1264_s6 = scalar_lea.hbm %s1423_s0, %s769_s28  ;;  %s174_s21 = scalar_lea.vmem [#allocation5], %s727_s29 }
  0x49   : > { %s184_s7 = sshll.u32 %s174_s21, 4  ;;  %p1268_p2 = pnand %p826_p3, %p50_p5  ;;  %s1272_s7 = int_to_ptr.vmem [resolvable:$true] %s184_s7 }
  0x4a   : > { %s1274_s26 = scalar_lea.sflag [#allocation6], %s170_s25  ;;  %s967_s9 = scalar_lea.hbm %s1264_s6, 1024 }
  0x4b   : > { %p968_p11 = scmp.ne.s32.totalorder %s1264_s6, %s967_s9  ;;  %p969_p12 = pneg %p1268_p2 }
  0x4c   : > { %s972_s19 = scalar_lea.hbm %s1423_s0, 2048  ;;  %p973_p4 = scmp.lt.u32.totalorder %s1264_s6, %s1423_s0 }
  0x4d   : > { %p970_p0 = pnand %p969_p12, %p968_p11  ;;  %p974_p13 = scmp.lt.u32.totalorder %s972_s19, %s967_s9 }
  0x4e   : > { %p976_p10 = scmp.lt.u32.totalorder %s967_s9, %s1264_s6 }
  0x4f   : > { %p971_p1 = pneg %p970_p0  ;;  %p975_p6 = por %p974_p13, %p973_p4 }
  0x51   : > { %p977_p3 = por %p976_p10, %p975_p6 }
  0x53   : > { %p978_p5 = pnand %p977_p3, %p971_p1 }
  0x55   : > { %981 = shalt.err (!%p978_p5)
}
  0x56   : > { %s982_s25 = scalar_lea.vmem %s1272_s7, 1024  ;;  %s1089_s4 = smov [#allocation5]  }
  0x57   : > { %p983_p9 = scmp.ne.s32.totalorder %s1272_s7, %s982_s25  ;;  %s987_s5 = sshll.u32 %s1089_s4, 4  ;;  %s988_s5 = int_to_ptr.vmem [resolvable:$false] %s987_s5 }
  0x58   : > { %s989_s21 = scalar_lea.vmem %s988_s5, 2048  ;;  %p990_p7 = scmp.lt.s32.totalorder %s1272_s7, %s988_s5 }
  0x59   : > { %p985_p11 = pnand %p983_p9, %p969_p12  ;;  %p991_p4 = scmp.lt.s32.totalorder %s989_s21, %s982_s25 }
  0x5b   : > { %p986_p0 = pneg %p985_p11  ;;  %p992_p13 = por %p991_p4, %p990_p7 }
  0x5d   : > { %p993_p6 = pnand %p992_p13, %p986_p0 }
  0x5f   : > { %996 = shalt.err (!%p993_p6)
}
  0x60   : > { %s1090_s9 = smov 128   ;;  %s1091_s10 = smov 8  }
  0x61   : > { %819 = dma.hbm_to_vmem [thread:$0]  (!%p1268_p2), %s1264_s6, 1024, %s1272_s7, %s1274_s26, %s1090_s9, %s1090_s9, %s1091_s10  }
  0x62   : > { %196 = sbr.rel (%p1171_p8) target bundleno = 454 (0x1c6), region = 32  ;;  %s1305_s18 = sand.u32 (!%p1171_p8), 1, %s1067_s13  }
  0x63   : > { %s731_s19 = sshll.u32 (!%p1171_p8), %s1305_s18, 6  ;;  %s199_s29 = scalar_lea.sflag (!%p1171_p8), [#allocation6], %s1305_s18 }
  0x64   : > { %s1309_s28 = scalar_lea.vmem (!%p1171_p8), [#allocation5], %s731_s19  ;;  %p1439_p7 = scmp.ne.s32.totalorder (!%p1171_p8), %s1433_s22, 0 }
  0x69   : > { %1050 = dma.done.wait (%p1439_p7), %s199_s29, 1024  }
  0x6a   : > { %1052 = vsyncadd (%p1439_p7), %s199_s29, 4294966272  ;;  %p1440_p2 = scmp.ne.s32.totalorder %s1431_s20, 0 }
  0x6c   : > { %1054 = dma.done.wait (%p1440_p2), [#allocation9], 1184  }
  0x6d   : > { %1056 = vsyncadd (%p1440_p2), [#allocation9], 4294966112  ;;  %v1092_v0 = vmov 0   ;;  %v888_v1 = vld [vmem:[#allocation8] sm:$0xff]   ;;  %v889_v2 = vld [vmem:[#allocation8 + $0x8] sm:$0xff]   ;;  %vm358_vm0 = vcmask 130048  }
  0x6e   : > { %371 = vmatprep.subr.bf16.mxu0 %v1092_v0  ;;  %779 = vmatprep.subr.bf16.mxu1 %v1092_v0  ;;  %v890_v3 = vld [vmem:[#allocation8 + $0x10] sm:$0xff]   ;;  %v891_v4 = vld [vmem:[#allocation8 + $0x18] sm:$0xff]   ;;  %v899_v5 = vld [vmem:[%s1309_s28 + $0x4] ss:$8 sps:$4 sm:$0xff]   ;;  %vm239_vm1 = vcmask 253952   ;;  %v1093_v18 = vmov 0.0  }
  0x6f   : > { %372 = vmatpush1.bf16.msra.mxu0 %v888_v1  ;;  %788 = vmatpush1.bf16.msra.mxu1 %v888_v1  ;;  %v902_v6 = vld [vmem:[%s1309_s28 + $0x24] ss:$8 sps:$4 sm:$0xff]   ;;  %v894_v9 = vld [vmem:[#allocation8 + $0x30] sm:$0xff]   ;;  %v895_v10 = vld [vmem:[#allocation8 + $0x38] sm:$0xff]   ;;  %240 = vst.msk [vmem:[#allocation2] sm:$0x1] %vm239_vm1, %v1093_v18 }
  0x70   : > { %373 = vmatprep.subr.bf16.mxu0 %v1092_v0  ;;  %780 = vmatprep.subr.bf16.mxu1 %v1092_v0  ;;  %v892_v7 = vld [vmem:[#allocation8 + $0x20] sm:$0xff]   ;;  %v893_v8 = vld [vmem:[#allocation8 + $0x28] sm:$0xff]   ;;  %v903_v14 = vld [vmem:[%s1309_s28 + $0x14] ss:$8 sps:$4 sm:$0xff]   ;;  %241 = vst.msk [vmem:[#allocation3] sm:$0x1] %vm239_vm1, %v1093_v18 }
  0x71   : > { %752 = vmatprep.mubr.msk.bf16.mxu0 %vm358_vm0, %v899_v5  ;;  %754 = vmatprep.mubr.msk.bf16.mxu1 %vm358_vm0, %v902_v6  ;;  %v896_v11 = vld [vmem:[#allocation8 + $0x40] sm:$0xff]   ;;  %v906_v15 = vld [vmem:[%s1309_s28 + $0x34] ss:$8 sps:$4 sm:$0xff]   ;;  %v905_v16 = vld [vmem:[%s1309_s28 + $0x10] ss:$8 sps:$4 sm:$0xff]   ;;  %vm437_vm2 = vcmask 261120  }
  0x72   : > { %v897_v12 = vld [vmem:[%s1309_s28] ss:$8 sps:$4 sm:$0xff]   ;;  %v908_v17 = vld [vmem:[%s1309_s28 + $0x30] ss:$8 sps:$4 sm:$0xff]   ;;  %s734_s20 = sshll.u32 %s1305_s18, 5  ;;  %vm593_vm3 = vcmask 257024  }
  0x73   : > { %374 = vmatpush1.bf16.msra.mxu0 %v889_v2  ;;  %789 = vmatpush1.bf16.msra.mxu1 %v889_v2  ;;  %v900_v13 = vld [vmem:[%s1309_s28 + $0x20] ss:$8 sps:$4 sm:$0xff]   ;;  %s778_s22 = sshll.u32 %s1075_s15, 9  ;;  %s232_s24 = scalar_lea.vmem [#allocation11], %s734_s20 }
  0x74   : > { %375 = vmatprep.subr.bf16.mxu0 %v1092_v0  ;;  %781 = vmatprep.subr.bf16.mxu1 %v1092_v0  ;;  %s616_s6 = sshll.u32 %s232_s24, 4  ;;  %s1364_s26 = scalar_lea.hbm %s1426_s3, %s778_s22  ;;  %s1366_s6 = int_to_ptr.vmem [resolvable:$true] %s616_s6 }
  0x75   : > { %s603_s15 = scalar_lea.sflag [#allocation7], %s1305_s18  ;;  %s997_s25 = scalar_lea.vmem %s1366_s6, 512 }
  0x76   : > { %v436_v18 = vld [vmem:[#allocation2] sm:$0x1]  ;;  %p998_p8 = scmp.ne.s32.totalorder %s1366_s6, %s997_s25  ;;  %p1441_p12 = scmp.ne.s32.totalorder %s1437_s27, 0 }
  0x77   : > { %376 = vmatpush1.bf16.msra.mxu0 %v890_v3  ;;  %790 = vmatpush1.bf16.msra.mxu1 %v890_v3  ;;  %s1094_s4 = smov [#allocation11]  }
  0x78   : > { %377 = vmatprep.subr.bf16.mxu0 %v1092_v0  ;;  %782 = vmatprep.subr.bf16.mxu1 %v1092_v0  ;;  %p999_p1 = pnand %p998_p8, %p1441_p12  ;;  %s1001_s5 = sshll.u32 %s1094_s4, 4  ;;  %s1002_s5 = int_to_ptr.vmem [resolvable:$false] %s1001_s5 }
  0x79   : > { %s1003_s21 = scalar_lea.vmem %s1002_s5, 1024  ;;  %p1004_p3 = scmp.lt.s32.totalorder %s1366_s6, %s1002_s5 }
  0x7a   : > { %p1000_p10 = pneg %p999_p1  ;;  %p1005_p5 = scmp.lt.s32.totalorder %s1003_s21, %s997_s25 }
  0x7b   : > { %378 = vmatpush1.bf16.msra.mxu0 %v891_v4  ;;  %791 = vmatpush1.bf16.msra.mxu1 %v891_v4 }
  0x7c   : > { %379 = vmatprep.subr.bf16.mxu0 %v1092_v0  ;;  %783 = vmatprep.subr.bf16.mxu1 %v1092_v0  ;;  %p1006_p9 = por %p1005_p5, %p1004_p3 }
  0x7e   : > { %p1007_p11 = pnand %p1006_p9, %p1000_p10 }
  0x7f   : > { %380 = vmatpush1.bf16.msra.mxu0 %v892_v7  ;;  %792 = vmatpush1.bf16.msra.mxu1 %v892_v7 }
  0x80   : > { %381 = vmatprep.subr.bf16.mxu0 %v1092_v0  ;;  %784 = vmatprep.subr.bf16.mxu1 %v1092_v0 }
  0x83   : > { %382 = vmatpush1.bf16.msra.mxu0 %v893_v8  ;;  %793 = vmatpush1.bf16.msra.mxu1 %v893_v8 }
  0x84   : > { %383 = vmatprep.subr.bf16.mxu0 %v1092_v0  ;;  %785 = vmatprep.subr.bf16.mxu1 %v1092_v0 }
  0x87   : > { %384 = vmatpush1.bf16.msra.mxu0 %v894_v9  ;;  %794 = vmatpush1.bf16.msra.mxu1 %v894_v9 }
  0x88   : > { %385 = vmatprep.subr.bf16.mxu0 %v1092_v0  ;;  %786 = vmatprep.subr.bf16.mxu1 %v1092_v0 }
  0x8b   : > { %386 = vmatpush1.bf16.msra.mxu0 %v895_v10  ;;  %795 = vmatpush1.bf16.msra.mxu1 %v895_v10 }
  0x8c   : > { %387 = vmatprep.subr.bf16.mxu0 %v1092_v0  ;;  %787 = vmatprep.subr.bf16.mxu1 %v1092_v0 }
  0x8f   : > { %388 = vmatpush1.bf16.msra.mxu0 %v896_v11  ;;  %796 = vmatpush1.bf16.msra.mxu1 %v896_v11 }
  0x92   : > { %404 = vmatmul.mubr.bf16.vlgmr.msra.gmra.mrb[0].mxu0 %v897_v12  ;;  %420 = vmatmul.mubr.bf16.vlgmr.msra.gmra.mrb[0].mxu1 %v900_v13 }
  0x93   : > { %753 = vmatprep.mubr.msk.bf16.mxu0 %vm358_vm0, %v903_v14  ;;  %755 = vmatprep.mubr.msk.bf16.mxu1 %vm358_vm0, %v906_v15 }
  0x9a   : > { %412 = vmatmul.mubr.bf16.gmra.mrb[4].mxu0 %v905_v16  ;;  %428 = vmatmul.mubr.bf16.gmra.mrb[4].mxu1 %v908_v17 }
 0x165   : > { %v405_v19 = vpop.f32.mrb[0].mxu0  ;;  %v421_v20 = vpop.f32.mrb[0].mxu1 }
 0x166   : > { %v463_v21 = vmul.f32 %v405_v19, %v405_v19  ;;  %496 = vst.msk [vmem:[#allocation4] sm:$0xff] %vm437_vm2, %v405_v19  ;;  %v407_v22 = vpop.f32.mrb[1].mxu0  ;;  %500 = vst.msk [vmem:[#allocation4 + $0x20] sm:$0xff] %vm437_vm2, %v421_v20  ;;  %v423_v23 = vpop.f32.mrb[1].mxu1  ;;  %v438_v26 = vsel %vm437_vm2, %v405_v19, 0.0  ;;  %v467_v44 = vmul.f32 %v421_v20, %v421_v20  ;;  %v445_v52 = vsel %vm437_vm2, %v421_v20, 0.0 }
 0x167   : > { %v408_v24 = vpop.f32.mrb[2].mxu0  ;;  %v424_v25 = vpop.f32.mrb[2].mxu1 }
 0x168   : > { %v439_v27 = vsel %vm437_vm2, %v408_v24, 0.0  ;;  %v464_v28 = vmul.f32 %v408_v24, %v408_v24  ;;  %497 = vst.msk [vmem:[#allocation4 + $0x8] sm:$0xff] %vm437_vm2, %v408_v24  ;;  %v410_v29 = vpop.f32.mrb[3].mxu0  ;;  %501 = vst.msk [vmem:[#allocation4 + $0x28] sm:$0xff] %vm437_vm2, %v424_v25  ;;  %v426_v30 = vpop.f32.mrb[3].mxu1  ;;  %v471_v32 = vsel %vm437_vm2, %v463_v21, 0.0  ;;  %v468_v53 = vmul.f32 %v424_v25, %v424_v25 }
 0x169   : > { %v440_v31 = vadd.f32 %v439_v27, %v438_v26  ;;  %v478_v58 = vsel %vm437_vm2, %v467_v44, 0.0  ;;  %v447_v59 = vsel %vm437_vm2, %v424_v25, 0.0  ;;  %v462_v21 = vld [vmem:[#allocation3] sm:$0x1] }
 0x16a   : > { %v472_v33 = vsel %vm437_vm2, %v464_v28, 0.0  ;;  %v480_v63 = vsel %vm437_vm2, %v468_v53, 0.0 }
 0x16b   : > { %v473_v34 = vadd.f32 %v472_v33, %v471_v32  ;;  %v529_v33 = vlaneseq }
 0x16d   : > { %v413_v35 = vpop.f32.mrb[4].mxu0  ;;  %v429_v36 = vpop.f32.mrb[4].mxu1 }
 0x16e   : > { %v441_v37 = vsel %vm437_vm2, %v413_v35, 0.0  ;;  %v465_v38 = vmul.f32 %v413_v35, %v413_v35  ;;  %498 = vst.msk [vmem:[#allocation4 + $0x10] sm:$0xff] %vm437_vm2, %v413_v35  ;;  %v415_v39 = vpop.f32.mrb[5].mxu0  ;;  %502 = vst.msk [vmem:[#allocation4 + $0x30] sm:$0xff] %vm437_vm2, %v429_v36  ;;  %v431_v40 = vpop.f32.mrb[5].mxu1  ;;  %v469_v55 = vmul.f32 %v429_v36, %v429_v36  ;;  %v449_v60 = vsel %vm437_vm2, %v429_v36, 0.0 }
 0x16f   : > { %v442_v41 = vadd.f32 %v441_v37, %v440_v31  ;;  %v416_v42 = vpop.f32.mrb[6].mxu0  ;;  %v432_v43 = vpop.f32.mrb[6].mxu1  ;;  %v514_v35 = vld [vmem:[#allocation10] sm:$0x1]  ;;  %v518_v39 = vld [vmem:[#allocation10 + $0x1] sm:$0x1] }
 0x170   : > { %v474_v45 = vsel %vm437_vm2, %v465_v38, 0.0  ;;  %v443_v46 = vsel %vm437_vm2, %v416_v42, 0.0  ;;  %v466_v47 = vmul.f32 %v416_v42, %v416_v42  ;;  %499 = vst.msk [vmem:[#allocation4 + $0x18] sm:$0xff] %vm437_vm2, %v416_v42  ;;  %v418_v48 = vpop.f32.mrb[7].mxu0  ;;  %503 = vst.msk [vmem:[#allocation4 + $0x38] sm:$0xff] %vm437_vm2, %v432_v43  ;;  %v434_v49 = vpop.f32.mrb[7].mxu1  ;;  %v470_v1 = vmul.f32 %v432_v43, %v432_v43 }
 0x171   : > { %v475_v50 = vadd.f32 %v474_v45, %v473_v34  ;;  %v444_v51 = vadd.f32 %v443_v46, %v442_v41  ;;  %v482_v0 = vsel %vm437_vm2, %v469_v55, 0.0  ;;  %v451_v4 = vsel %vm437_vm2, %v432_v43, 0.0  ;;  %v521_v42 = vld [vmem:[#allocation4] sm:$0xff]  ;;  %v522_v45 = vld [vmem:[#allocation4 + $0x8] sm:$0xff] }
 0x172   : > { %v476_v54 = vsel %vm437_vm2, %v466_v47, 0.0  ;;  %v484_v7 = vsel %vm437_vm2, %v470_v1, 0.0  ;;  %v530_v34 = vshrl.u32 %v529_v33, 7  ;;  %v525_v46 = vld [vmem:[#allocation4 + $0x20] sm:$0xff]  ;;  %v526_v49 = vld [vmem:[#allocation4 + $0x28] sm:$0xff] }
 0x173   : > { %v446_v56 = vadd.f32 %v445_v52, %v444_v51  ;;  %v477_v57 = vadd.f32 %v476_v54, %v475_v50 }
 0x174   : > { %v531_v36 = vsub.s32 0, %v530_v34 }
 0x175   : > { %v479_v61 = vadd.f32 %v478_v58, %v477_v57  ;;  %v448_v62 = vadd.f32 %v447_v59, %v446_v56  ;;  %v523_v47 = vld [vmem:[#allocation4 + $0x10] sm:$0xff] }
 0x176   : > { %v527_v51 = vld [vmem:[#allocation4 + $0x30] sm:$0xff] }
 0x177   : > { %v450_v2 = vadd.f32 %v449_v60, %v448_v62  ;;  %v481_v3 = vadd.f32 %v480_v63, %v479_v61  ;;  %v528_v44 = vld [vmem:[#allocation4 + $0x38] sm:$0xff] }
 0x178   : > { %v524_v50 = vld [vmem:[#allocation4 + $0x18] sm:$0xff] }
 0x179   : > { %v483_v5 = vadd.f32 %v482_v0, %v481_v3  ;;  %v452_v6 = vadd.f32 %v451_v4, %v450_v2 }
 0x17b   : > { %v453_v8 = vrot.slane %v452_v6, 4  ;;  %v485_v9 = vadd.f32 %v484_v7, %v483_v5 }
 0x17d   : > { %v454_v10 = vadd.f32 %v453_v8, %v452_v6  ;;  %v486_v11 = vrot.slane %v485_v9, 4 }
 0x17f   : > { %v455_v12 = vrot.slane %v454_v10, 2  ;;  %v487_v13 = vadd.f32 %v486_v11, %v485_v9 }
 0x181   : > { %v456_v14 = vadd.f32 %v455_v12, %v454_v10  ;;  %v488_v15 = vrot.slane %v487_v13, 2 }
 0x183   : > { %v457_v16 = vrot.slane %v456_v14, 1  ;;  %v489_v17 = vadd.f32 %v488_v15, %v487_v13 }
 0x185   : > { %v458_v19 = vadd.f32 %v457_v16, %v456_v14  ;;  %v490_v20 = vrot.slane %v489_v17, 1 }
 0x187   : > { %v459_v22 = vadd.f32 %v458_v19, %v436_v18  ;;  %v491_v23 = vadd.f32 %v490_v20, %v489_v17 }
 0x189   : > { %461 = vst.msk [vmem:[#allocation2] sm:$0x1] %vm239_vm1, %v459_v22  ;;  %v492_v24 = vadd.f32 %v491_v23, %v462_v21 }
 0x18b   : > { %493 = vst.msk [vmem:[#allocation3] sm:$0x1] %vm239_vm1, %v492_v24 }
 0x190   : > { %v507_v25 = vld [vmem:[#allocation2] sm:$0x1] }
 0x191   : > { %v508_v26 = vmul.f32 0.015625, %v507_v25 }
 0x192   : > { %v509_v27 = vld [vmem:[#allocation3] sm:$0x1] }
 0x193   : > { %v510_v28 = vmul.f32 0.015625, %v509_v27  ;;  %v511_v29 = vmul.f32 %v508_v26, %v508_v26 }
 0x195   : > { %v512_v30 = vsub.f32 %v510_v28, %v511_v29 }
 0x197   : > { %v513_v31 = vmax.f32 %v512_v30, 0.0 }
 0x199   : > { %v515_v32 = vadd.f32 1e-05, %v513_v31 }
 0x19b   : > { %909 = vrsqrt.f32 %v515_v32 }
 0x1a5   : > { %v910_v37 = vpop.eup %909 }
 0x1a6   : > { %v517_v38 = vmul.f32 %v910_v37, %v514_v35 }
 0x1a8   : > { %v519_v40 = vmul.f32 %v517_v38, %v508_v26  ;;  %v532_v41 = vrot.slane %v517_v38, %v531_v36 }
 0x1aa   : > { %v520_v43 = vsub.f32 %v518_v39, %v519_v40  ;;  %v540_v48 = vmul.f32 %v532_v41, %v528_v44  ;;  %v533_v53 = vmul.f32 %v532_v41, %v521_v42  ;;  %v534_v54 = vmul.f32 %v532_v41, %v522_v45 }
 0x1ab   : > { %v535_v55 = vmul.f32 %v532_v41, %v523_v47  ;;  %v536_v56 = vmul.f32 %v532_v41, %v524_v50  ;;  %v537_v57 = vmul.f32 %v532_v41, %v525_v46  ;;  %v538_v58 = vmul.f32 %v532_v41, %v526_v49 }
 0x1ac   : > { %v544_v52 = vrot.slane %v520_v43, %v531_v36  ;;  %v539_v59 = vmul.f32 %v532_v41, %v527_v51 }
 0x1ae   : > { %v552_v60 = vadd.f32 %v544_v52, %v540_v48  ;;  %v545_v61 = vadd.f32 %v544_v52, %v533_v53  ;;  %v546_v62 = vadd.f32 %v544_v52, %v534_v54  ;;  %v547_v63 = vadd.f32 %v544_v52, %v535_v55 }
 0x1af   : > { %v548_v0 = vadd.f32 %v544_v52, %v536_v56  ;;  %v549_v1 = vadd.f32 %v544_v52, %v537_v57  ;;  %v550_v2 = vadd.f32 %v544_v52, %v538_v58  ;;  %v551_v3 = vadd.f32 %v544_v52, %v539_v59 }
 0x1b0   : > { %v560_v4 = vmax.f32 %v552_v60, 0.0  ;;  %v553_v5 = vmax.f32 %v545_v61, 0.0  ;;  %v554_v6 = vmax.f32 %v546_v62, 0.0  ;;  %v555_v7 = vmax.f32 %v547_v63, 0.0 }
 0x1b1   : > { %v556_v8 = vmax.f32 %v548_v0, 0.0  ;;  %v557_v9 = vmax.f32 %v549_v1, 0.0  ;;  %v558_v10 = vmax.f32 %v550_v2, 0.0  ;;  %v559_v11 = vmax.f32 %v551_v3, 0.0 }
 0x1b2   : > { %v777_v12 = vpack.c.bf16 %v560_v4, %v560_v4  ;;  %v770_v13 = vpack.c.bf16 %v553_v5, %v553_v5  ;;  %v771_v14 = vpack.c.bf16 %v554_v6, %v554_v6  ;;  %v772_v15 = vpack.c.bf16 %v555_v7, %v555_v7 }
 0x1b3   : > { %v773_v16 = vpack.c.bf16 %v556_v8, %v556_v8  ;;  %v774_v17 = vpack.c.bf16 %v557_v9, %v557_v9  ;;  %v775_v18 = vpack.c.bf16 %v558_v10, %v558_v10  ;;  %v776_v19 = vpack.c.bf16 %v559_v11, %v559_v11 }
 0x1b4   : > { %601 = vst.msk [vmem:[%s232_s24 + $0x1c] sm:$0xf] %vm593_vm3, %v777_v12  ;;  %594 = vst.msk [vmem:[%s232_s24] sm:$0xf] %vm593_vm3, %v770_v13 }
 0x1b5   : > { %595 = vst.msk [vmem:[%s232_s24 + $0x4] sm:$0xf] %vm593_vm3, %v771_v14  ;;  %596 = vst.msk [vmem:[%s232_s24 + $0x8] sm:$0xf] %vm593_vm3, %v772_v15 }
 0x1b6   : > { %597 = vst.msk [vmem:[%s232_s24 + $0xc] sm:$0xf] %vm593_vm3, %v773_v16  ;;  %598 = vst.msk [vmem:[%s232_s24 + $0x10] sm:$0xf] %vm593_vm3, %v774_v17 }
 0x1b7   : > { %599 = vst.msk [vmem:[%s232_s24 + $0x14] sm:$0xf] %vm593_vm3, %v775_v18  ;;  %600 = vst.msk [vmem:[%s232_s24 + $0x18] sm:$0xf] %vm593_vm3, %v776_v19 }
 0x1b8   : > { %1010 = shalt.err (!%p1007_p11)
}
 0x1b9   : > { %s1011_s9 = scalar_lea.hbm %s1364_s26, 512  ;;  %s1015_s29 = scalar_lea.hbm %s1426_s3, 1024 }
 0x1ba   : > { %p1012_p0 = scmp.ne.s32.totalorder %s1364_s26, %s1011_s9  ;;  %p1016_p6 = scmp.lt.u32.totalorder %s1364_s26, %s1426_s3 }
 0x1bb   : > { %p1017_p7 = scmp.lt.u32.totalorder %s1015_s29, %s1011_s9  ;;  %p1019_p8 = scmp.lt.u32.totalorder %s1011_s9, %s1364_s26 }
 0x1bc   : > { %p1013_p4 = pnand %p1012_p0, %p1441_p12 }
 0x1bd   : > { %p1018_p2 = por %p1017_p7, %p1016_p6 }
 0x1be   : > { %p1014_p13 = pneg %p1013_p4 }
 0x1bf   : > { %p1020_p1 = por %p1019_p8, %p1018_p2 }
 0x1c1   : > { %p1021_p10 = pnand %p1020_p1, %p1014_p13 }
 0x1c3   : > { %1024 = shalt.err (!%p1021_p10)
}
 0x1c4   : > { %s1095_s22 = smov 64   ;;  %s1096_s24 = smov 4  }
 0x1c5   : > { %807 = dma.vmem_to_hbm [thread:$0]  (%p1441_p12), %s1366_s6, 512, %s1364_s26, %s603_s15, %s1095_s22, %s1095_s22, %s1096_s24  }
 0x1c6 PF: > { %s631_s7 = sand.u32 1, %s1063_s12   ;;  %p1442_p3 = scmp.ne.s32.totalorder %s1434_s23, 0 }
 0x1c7   : > { %p1443_p5 = scmp.ge.s32.totalorder %s1083_s17, 2  ;;  %s632_s8 = scalar_lea.sflag [#allocation7], %s631_s7 }
 0x1c9   : > { %p821_p9 = pnand %p1443_p5, %p1442_p3 }
 0x1cb   : > { %1058 = dma.done.wait (!%p821_p9), %s632_s8, 512  }
 0x1cc   : > { %1060 = vsyncadd (!%p821_p9), %s632_s8, 4294966784  ;;  %s20_s17 = sadd.s32 1, %s1083_s17   ;;  %s1444_s12 = smov %s1067_s13 }
 0x1cd   : > { %p17_p11 = scmp.ge.s32.totalorder %s20_s17, 4   ;;  %s1445_s13 = smov %s1071_s14 }
 0x1ce   : > { %s1446_s14 = smov %s1259_s30  ;;  %s1447_s15 = smov %s1079_s16 }
 0x1cf   : > { %s1448_s16 = smov %s1450_s11  ;;  %19 = sbr.rel (!%p17_p11) target bundleno = 7 (0x7), region = 94 }
 0x1d6   :  { %637 = vsyncpa [#allocation6], 1 }
 0x1d7   :  { %639 = vsyncpa [#allocation6 + $0x1], 1 }
 0x1d8   :  { %640 = vsyncpa [#allocation9], 1 }
 0x1d9   :  { %641 = vsyncpa [#allocation7], 1 }
 0x1da   :  { %643 = vsyncpa [#allocation7 + $0x1], 1 }

// kernel: rgb_block_forward.11
= control target key start
LH: loop header
LB: loop body
LE: loop exit
PB: predicated region body
PF: predicated region fallthrough
CT: control target
= control target key end

     0   :  { %8 = vsyncpa [#allocation6], 0  ;;  %s1349_s0 = inlined_call_operand.hbm [shape: bf16[2,16,288], index: 0, kind: input, shape index: {}]   ;;  %s1350_s1 = inlined_call_operand.hbm [shape: bf16[288,64], index: 1, kind: input, shape index: {}]   ;;  %s1351_s2 = inlined_call_operand.hbm [shape: f32[2,64], index: 2, kind: input, shape index: {}]   ;;  %s1352_s3 = inlined_call_operand.hbm [shape: bf16[2,16,64], index: 3, kind: output, shape index: {}]  }
   0x1   :  { %10 = vsyncpa [#allocation6 + $0x1], 0 }
   0x2   :  { %11 = vsyncpa [#allocation9], 0 }
   0x3   :  { %12 = vsyncpa [#allocation7], 0 }
   0x4   :  { %14 = vsyncpa [#allocation7 + $0x1], 0  ;;  %s1086_s12 = smov 0   ;;  %s1088_s13 = smov 0  }
   0x5   :  { %s1090_s14 = smov 0   ;;  %s1092_s15 = smov 0  }
   0x6   :  { %s1094_s16 = smov 0   ;;  %s1096_s17 = smov 0  }
   0x7 LB: > { %s686_s18 = sadd.s32 4294967295, %s1052_s17   ;;  %s687_s19 = sadd.s32 4294967294, %s1052_s17   ;;  %s1052_s17 = sphi %s1096_s17, %s20_s17   ;;  %s1048_s16 = sphi %s1094_s16, %s1374_s16   ;;  %s1044_s15 = sphi %s1092_s15, %s1373_s15   ;;  %s1040_s14 = sphi %s1090_s14, %s1372_s14   ;;  %s1036_s13 = sphi %s1088_s13, %s1371_s13   ;;  %s1032_s12 = sphi %s1086_s12, %s1370_s12  }
   0x8   : > { %p54_p0 = scmp.ne.s32.totalorder %s1036_s13, %s1032_s12  ;;  %p1120_p1 = scmp.eq.s32.totalorder %s686_s18, 0 }
   0x9   : > { %p1124_p2 = scmp.eq.s32.totalorder %s686_s18, 1  ;;  %p126_p3 = scmp.eq.s32.totalorder %s687_s19, 1 }
   0xa   : > { %s1357_s20 = scalar_select %p1120_p1, 1, 0 }
   0xb   : > { %p1130_p4 = por %p1120_p1, %p54_p0  ;;  %p688_p5 = scmp.ge.s32.totalorder %s1052_s17, 1 }
   0xc   : > { %p1135_p6 = por %p126_p3, %p54_p0  ;;  %p133_p7 = scmp.lt.s32.totalorder %s1052_s17, 3 }
   0xd   : > { %s1359_s22 = scalar_select %p1130_p4, 1, 0 }
   0xe   : > { %s1360_s23 = scalar_select %p1135_p6, 1, 0 }
   0xf   : > { %p1140_p8 = pnand %p688_p5, %p133_p7  ;;  %s1054_s25 = smov [#allocation8]  }
  0x10   : > { %s145_s26 = sshll.u32 %s1054_s25, 4  ;;  %s1055_s28 = smov [#allocation10]   ;;  %s1144_s26 = int_to_ptr.vmem [resolvable:$true] %s145_s26 }
  0x11   : > { %p777_p9 = pneg %p1140_p8  ;;  %s159_s29 = sshll.u32 %s1055_s28, 4  ;;  %s1155_s29 = int_to_ptr.vmem [resolvable:$true] %s159_s29 }
  0x12   : > { %s880_s5 = scalar_lea.hbm %s1350_s1, 2304 }
  0x13   : > { %p1151_p11 = pnand %p777_p9, %p1120_p1  ;;  %p881_p12 = scmp.ne.s32.totalorder %s1350_s1, %s880_s5 }
  0x14   : > { %p887_p5 = scmp.lt.u32.totalorder %s880_s5, %s1350_s1 }
  0x15   : > { %p882_p13 = pneg %p1151_p11 }
  0x17   : > { %p883_p0 = pnand %p882_p13, %p881_p12 }
  0x19   : > { %p884_p3 = pneg %p883_p0 }
  0x1b   : > { %p889_p7 = pnand %p887_p5, %p884_p3 }
  0x1d   : > { %892 = shalt.err (!%p889_p7)
}
  0x1e   : > { %s893_s10 = scalar_lea.vmem %s1144_s26, 2304  ;;  %p901_p1 = scmp.lt.s32.totalorder %s1144_s26, %s1144_s26 }
  0x1f   : > { %p894_p9 = scmp.ne.s32.totalorder %s1144_s26, %s893_s10  ;;  %p902_p12 = scmp.lt.s32.totalorder %s893_s10, %s893_s10 }
  0x21   : > { %p896_p10 = pnand %p894_p9, %p882_p13  ;;  %p903_p0 = por %p902_p12, %p901_p1 }
  0x23   : > { %p897_p6 = pneg %p896_p10 }
  0x25   : > { %p904_p4 = pnand %p903_p0, %p897_p6 }
  0x27   : > { %907 = shalt.err (!%p904_p4)
}
  0x28   : > { %s1056_s11 = smov 64   ;;  %s1057_s18 = smov 4  }
  0x29   : > { %780 = dma.hbm_to_vmem [thread:$0]  (!%p1151_p11), %s1350_s1, 2304, %s1144_s26, [#allocation9], %s1056_s11, %s1056_s11, %s1057_s18  }
  0x2a   : > { %s908_s4 = scalar_lea.hbm %s1351_s2, 32 }
  0x2b   : > { %p909_p1 = scmp.ne.s32.totalorder %s1351_s2, %s908_s4  ;;  %p915_p10 = scmp.lt.u32.totalorder %s908_s4, %s1351_s2 }
  0x2d   : > { %p911_p4 = pnand %p909_p1, %p882_p13 }
  0x2f   : > { %p912_p6 = pneg %p911_p4 }
  0x31   : > { %p917_p3 = pnand %p915_p10, %p912_p6 }
  0x33   : > { %920 = shalt.err (!%p917_p3)
}
  0x34   : > { %s921_s26 = scalar_lea.vmem %s1155_s29, 32  ;;  %p929_p12 = scmp.lt.s32.totalorder %s1155_s29, %s1155_s29 }
  0x35   : > { %p922_p5 = scmp.ne.s32.totalorder %s1155_s29, %s921_s26  ;;  %p930_p0 = scmp.lt.s32.totalorder %s921_s26, %s921_s26 }
  0x37   : > { %p924_p7 = pnand %p922_p5, %p882_p13  ;;  %p931_p1 = por %p930_p0, %p929_p12 }
  0x39   : > { %p925_p9 = pneg %p924_p7 }
  0x3b   : > { %p932_p4 = pnand %p931_p1, %p925_p9 }
  0x3d   : > { %935 = shalt.err (!%p932_p4)
}
  0x3e   : > { %783 = dma.hbm_to_vmem [thread:$0]  (!%p1151_p11), %s1351_s2, 32, %s1155_s29, [#allocation9]  }
  0x3f   : > { %s32_s11 = sadd.s32 1, %s1048_s16  ;;  %s41_s18 = sadd.s32 1, %s1040_s14 }
  0x40   : > { %p34_p13 = scmp.ge.s32.totalorder %s32_s11, 2  ;;  %p48_p6 = scmp.ne.s32.totalorder %s1040_s14, %s1036_s13 }
  0x41   : > { %p49_p10 = scmp.eq.s32.totalorder %s1052_s17, 0  ;;  %p794_p3 = scmp.lt.s32.totalorder %s1052_s17, 2 }
  0x42   : > { %s1376_s11 = smov (%p34_p13, %s32_s11), 0  ;;  %p1219_p7 = por %p1124_p2, %p48_p6 }
  0x43   : > { %p50_p5 = por %p49_p10, %p48_p6  ;;  %s36_s19 = ssub.s32 %s1048_s16, %s1376_s11 }
  0x44   : > { %s1363_s27 = scalar_select %p1219_p7, 1, 0 }
  0x45   : > { %s170_s25 = sand.u32 1, %s1040_s14   ;;  %p39_p9 = scmp.eq.s32.totalorder %s36_s19, 0 }
  0x46   : > { %s762_s29 = smul.u32 24, %s170_s25  ;;  %p1226_p11 = pnand %p794_p3, %p50_p5 }
  0x47   : > { %s1231_s30 = scalar_select %p39_p9, %s1040_s14, %s41_s18  }
  0x48   : > { %s763_s4 = smul.u32 384, %s1048_s16  ;;  %s174_s5 = scalar_lea.vmem [#allocation5], %s762_s29 }
  0x49   : > { %s184_s6 = sshll.u32 %s174_s5, 4  ;;  %s1241_s26 = scalar_lea.sflag [#allocation6], %s170_s25  ;;  %s1239_s6 = int_to_ptr.vmem [resolvable:$true] %s184_s6 }
  0x4a   : > { %s1237_s8 = scalar_lea.hbm %s1349_s0, %s763_s4  ;;  %p938_p12 = pneg %p1226_p11 }
  0x4b   : > { %s936_s9 = scalar_lea.hbm %s1237_s8, 384  ;;  %s941_s19 = scalar_lea.hbm %s1349_s0, 768 }
  0x4c   : > { %p937_p2 = scmp.ne.s32.totalorder %s1237_s8, %s936_s9  ;;  %p942_p4 = scmp.lt.u32.totalorder %s1237_s8, %s1349_s0 }
  0x4d   : > { %p943_p13 = scmp.lt.u32.totalorder %s941_s19, %s936_s9  ;;  %p945_p10 = scmp.lt.u32.totalorder %s936_s9, %s1237_s8 }
  0x4e   : > { %p939_p0 = pnand %p938_p12, %p937_p2 }
  0x4f   : > { %p944_p6 = por %p943_p13, %p942_p4 }
  0x50   : > { %p940_p1 = pneg %p939_p0 }
  0x51   : > { %p946_p3 = por %p945_p10, %p944_p6 }
  0x53   : > { %p947_p5 = pnand %p946_p3, %p940_p1 }
  0x55   : > { %950 = shalt.err (!%p947_p5)
}
  0x56   : > { %s951_s25 = scalar_lea.vmem %s1239_s6, 384  ;;  %s1058_s5 = smov [#allocation5]  }
  0x57   : > { %p952_p9 = scmp.ne.s32.totalorder %s1239_s6, %s951_s25  ;;  %s956_s21 = sshll.u32 %s1058_s5, 4  ;;  %s957_s21 = int_to_ptr.vmem [resolvable:$false] %s956_s21 }
  0x58   : > { %s958_s7 = scalar_lea.vmem %s957_s21, 768  ;;  %p959_p7 = scmp.lt.s32.totalorder %s1239_s6, %s957_s21 }
  0x59   : > { %p954_p2 = pnand %p952_p9, %p938_p12  ;;  %p960_p4 = scmp.lt.s32.totalorder %s958_s7, %s951_s25 }
  0x5b   : > { %p955_p0 = pneg %p954_p2  ;;  %p961_p13 = por %p960_p4, %p959_p7 }
  0x5d   : > { %p962_p6 = pnand %p961_p13, %p955_p0 }
  0x5f   : > { %965 = shalt.err (!%p962_p6)
}
  0x60   : > { %s1059_s9 = smov 192   ;;  %s1060_s10 = smov 12  }
  0x61   : > { %787 = dma.hbm_to_vmem [thread:$0]  (!%p1226_p11), %s1237_s8, 384, %s1239_s6, %s1241_s26, %s1059_s9, %s1059_s9, %s1060_s10  }
  0x62   : > { %196 = sbr.rel (%p1140_p8) target bundleno = 437 (0x1b5), region = 32  ;;  %s1272_s18 = sand.u32 (!%p1140_p8), 1, %s1036_s13  }
  0x63   : > { %s764_s19 = smul.u32 (!%p1140_p8), 24, %s1272_s18  ;;  %s199_s29 = scalar_lea.sflag (!%p1140_p8), [#allocation6], %s1272_s18 }
  0x64   : > { %p1365_p7 = scmp.ne.s32.totalorder (!%p1140_p8), %s1359_s22, 0 }
  0x65   : > { %s1276_s4 = scalar_lea.vmem (!%p1140_p8), [#allocation5], %s764_s19 }
  0x69   : > { %1019 = dma.done.wait (%p1365_p7), %s199_s29, 384  }
  0x6a   : > { %1021 = vsyncadd (%p1365_p7), %s199_s29, 4294966912  ;;  %p1366_p11 = scmp.ne.s32.totalorder %s1357_s20, 0 }
  0x6c   : > { %1023 = dma.done.wait (%p1366_p11), [#allocation9], 2336  }
  0x6d   : > { %1025 = vsyncadd (%p1366_p11), [#allocation9], 4294964960  ;;  %vm239_vm0 = vcmask 516096   ;;  %v1061_v0 = vmov 0.0   ;;  %vm1062_vm1 = vmmov 0   ;;  %v856_v1 = vld [vmem:[#allocation8 + $0x40] sm:$0xff]  }
  0x6e   : > { %240 = vst.msk [vmem:[#allocation2] sm:$0x1] %vm239_vm0, %v1061_v0  ;;  %241 = vst.msk [vmem:[#allocation3] sm:$0x1] %vm239_vm0, %v1061_v0  ;;  %754 = vmatprep.subr.bf16.mxu1 %v1061_v0  ;;  %758 = vmatprep.mubr.msk.bf16.mxu1 %vm1062_vm1, %v1061_v0  ;;  %v857_v2 = vld [vmem:[#allocation8] sm:$0xff]   ;;  %v858_v3 = vld [vmem:[#allocation8 + $0x48] sm:$0xff]  }
  0x6f   : > { %729 = vmatprep.subr.bf16.mxu0 %v856_v1  ;;  %v859_v4 = vld [vmem:[#allocation8 + $0x8] sm:$0xff]   ;;  %v860_v5 = vld [vmem:[#allocation8 + $0x50] sm:$0xff]   ;;  %v862_v7 = vld [vmem:[#allocation8 + $0x58] sm:$0xff]   ;;  %vm405_vm2 = vcmask 261120   ;;  %vm492_vm3 = vcmask 523264   ;;  %s696_s20 = sshll.u32 %s1272_s18, 3 }
  0x70   : > { %730 = vmatpush3.bf16.msra.mxu0 %v857_v2  ;;  %v861_v6 = vld [vmem:[#allocation8 + $0x10] sm:$0xff]   ;;  %v863_v8 = vld [vmem:[#allocation8 + $0x18] sm:$0xff]   ;;  %v864_v9 = vld [vmem:[#allocation8 + $0x60] sm:$0xff]   ;;  %v542_v2 = vlaneseq  ;;  %s728_s22 = sshll.u32 %s1044_s15, 7  ;;  %s232_s24 = scalar_lea.vmem [#allocation11], %s696_s20  ;;  %vm564_vm4 = vcmask 519168  }
  0x71   : > { %731 = vmatprep.subr.bf16.mxu0 %v858_v3  ;;  %v870_v10 = vld [vmem:[#allocation8 + $0x80] sm:$0xff]   ;;  %v866_v12 = vld [vmem:[#allocation8 + $0x68] sm:$0xff]   ;;  %v868_v16 = vld [vmem:[#allocation8 + $0x70] sm:$0xff]   ;;  %s581_s28 = sshll.u32 %s232_s24, 4  ;;  %s1298_s26 = scalar_lea.hbm %s1352_s3, %s728_s22  ;;  %s1300_s28 = int_to_ptr.vmem [resolvable:$true] %s581_s28 }
  0x72   : > { %v865_v11 = vld [vmem:[#allocation8 + $0x20] sm:$0xff]   ;;  %755 = vmatpush3.bf16.msra.mxu1 %v870_v10  ;;  %v873_v13 = vld [vmem:[#allocation8 + $0x88] sm:$0xff]   ;;  %v869_v18 = vld [vmem:[#allocation8 + $0x30] sm:$0xff]   ;;  %v543_v3 = vshrl.u32 %v542_v2, 7  ;;  %s568_s15 = scalar_lea.sflag [#allocation7], %s1272_s18  ;;  %s966_s25 = scalar_lea.vmem %s1300_s28, 128 }
  0x73   : > { %756 = vmatprep.subr.bf16.mxu1 %v1061_v0  ;;  %v867_v14 = vld [vmem:[#allocation8 + $0x28] sm:$0xff]   ;;  %v877_v17 = vld [vmem:[%s1276_s4 + $0x8] ss:$12 sps:$4 sm:$0xff]   ;;  %p967_p8 = scmp.ne.s32.totalorder %s1300_s28, %s966_s25  ;;  %p1367_p12 = scmp.ne.s32.totalorder %s1363_s27, 0 }
  0x74   : > { %732 = vmatpush3.bf16.msra.mxu0 %v859_v4  ;;  %v876_v15 = vld [vmem:[%s1276_s4 + $0x4] ss:$12 sps:$4 sm:$0xff]   ;;  %v874_v21 = vld [vmem:[%s1276_s4] ss:$12 sps:$4 sm:$0xff]   ;;  %s1063_s5 = smov [#allocation11]  }
  0x75   : > { %733 = vmatprep.subr.bf16.mxu0 %v860_v5  ;;  %441 = vmatprep.mubr.bf16.mxu0 %v876_v15  ;;  %v871_v19 = vld [vmem:[#allocation8 + $0x78] sm:$0xff]   ;;  %v533_v4 = vld [vmem:[#allocation10] sm:$0x1]  ;;  %v544_v5 = vsub.s32 0, %v543_v3  ;;  %p968_p1 = pnand %p967_p8, %p1367_p12  ;;  %s970_s21 = sshll.u32 %s1063_s5, 4  ;;  %s971_s21 = int_to_ptr.vmem [resolvable:$false] %s970_s21 }
  0x76   : > { %757 = vmatpush3.bf16.msra.mxu1 %v873_v13  ;;  %v872_v20 = vld [vmem:[#allocation8 + $0x38] sm:$0xff]   ;;  %s972_s7 = scalar_lea.vmem %s971_s21, 256  ;;  %p973_p3 = scmp.lt.s32.totalorder %s1300_s28, %s971_s21 }
  0x77   : > { %v491_v51 = vld [vmem:[#allocation2] sm:$0x1]  ;;  %v505_v54 = vld [vmem:[#allocation3] sm:$0x1]  ;;  %p969_p10 = pneg %p968_p1  ;;  %p974_p5 = scmp.lt.s32.totalorder %s972_s7, %s966_s25 }
  0x78   : > { %734 = vmatpush3.bf16.msra.mxu0 %v861_v6 }
  0x79   : > { %735 = vmatprep.subr.bf16.mxu0 %v862_v7  ;;  %759 = vmatmul.mubr.msk.bf16.vlgmr.msra.gmra.mrb[0].mxu1 %vm405_vm2, %v877_v17  ;;  %p975_p9 = por %p974_p5, %p973_p3 }
  0x7b   : > { %p976_p2 = pnand %p975_p9, %p969_p10 }
  0x7c   : > { %736 = vmatpush3.bf16.msra.mxu0 %v863_v8  ;;  %v537_v8 = vld [vmem:[#allocation10 + $0x1] sm:$0x1] }
  0x7d   : > { %737 = vmatprep.subr.bf16.mxu0 %v864_v9 }
  0x80   : > { %738 = vmatpush3.bf16.msra.mxu0 %v865_v11 }
  0x81   : > { %739 = vmatprep.subr.bf16.mxu0 %v866_v12 }
  0x84   : > { %740 = vmatpush3.bf16.msra.mxu0 %v867_v14 }
  0x85   : > { %741 = vmatprep.subr.bf16.mxu0 %v868_v16 }
  0x88   : > { %742 = vmatpush3.bf16.msra.mxu0 %v869_v18 }
  0x89   : > { %743 = vmatprep.subr.bf16.mxu0 %v871_v19 }
  0x8c   : > { %744 = vmatpush3.bf16.msra.mxu0 %v872_v20 }
  0x8f   : > { %442 = vmatmul.mubr.bf16.vlgmr.msra.gmra.mrb[0].mxu0 %v874_v21 }
 0x14c   : > { %v484_v22 = vpop.f32.mrb[0].mxu1 }
 0x14d   : > { %v760_v23 = vpop.f32.mrb[1].mxu1 }
 0x14e   : > { %v487_v24 = vpop.f32.mrb[2].mxu1 }
 0x14f   : > { %v761_v25 = vpop.f32.mrb[3].mxu1 }
 0x162   : > { %v745_v26 = vpop.f32.mrb[0].mxu0 }
 0x163   : > { %v746_v27 = vpop.f32.mrb[1].mxu0 }
 0x164   : > { %v747_v28 = vadd.f32 %v746_v27, %v745_v26  ;;  %v748_v29 = vpop.f32.mrb[2].mxu0 }
 0x165   : > { %v749_v30 = vpop.f32.mrb[3].mxu0 }
 0x166   : > { %v485_v31 = vadd.f32 %v747_v28, %v484_v22  ;;  %v750_v32 = vadd.f32 %v749_v30, %v748_v29 }
 0x168   : > { %v506_v33 = vmul.f32 %v485_v31, %v485_v31  ;;  %521 = vst.msk [vmem:[#allocation4] sm:$0xff] %vm492_vm3, %v485_v31  ;;  %v488_v34 = vadd.f32 %v750_v32, %v487_v24  ;;  %v493_v35 = vsel %vm492_vm3, %v485_v31, 0.0 }
 0x16a   : > { %v494_v36 = vsel %vm492_vm3, %v488_v34, 0.0  ;;  %v507_v37 = vmul.f32 %v488_v34, %v488_v34  ;;  %522 = vst.msk [vmem:[#allocation4 + $0x8] sm:$0xff] %vm492_vm3, %v488_v34  ;;  %v508_v39 = vsel %vm492_vm3, %v506_v33, 0.0 }
 0x16b   : > { %v495_v38 = vadd.f32 %v494_v36, %v493_v35 }
 0x16c   : > { %v509_v40 = vsel %vm492_vm3, %v507_v37, 0.0 }
 0x16d   : > { %v496_v41 = vrot.slane %v495_v38, 4  ;;  %v510_v42 = vadd.f32 %v509_v40, %v508_v39 }
 0x16f   : > { %v497_v43 = vadd.f32 %v496_v41, %v495_v38  ;;  %v511_v44 = vrot.slane %v510_v42, 4  ;;  %v540_v12 = vld [vmem:[#allocation4] sm:$0xff] }
 0x171   : > { %v498_v45 = vrot.slane %v497_v43, 2  ;;  %v512_v46 = vadd.f32 %v511_v44, %v510_v42  ;;  %v541_v13 = vld [vmem:[#allocation4 + $0x8] sm:$0xff] }
 0x173   : > { %v499_v47 = vadd.f32 %v498_v45, %v497_v43  ;;  %v513_v48 = vrot.slane %v512_v46, 2 }
 0x175   : > { %v500_v49 = vrot.slane %v499_v47, 1  ;;  %v514_v50 = vadd.f32 %v513_v48, %v512_v46 }
 0x177   : > { %v501_v52 = vadd.f32 %v500_v49, %v499_v47  ;;  %v515_v53 = vrot.slane %v514_v50, 1 }
 0x179   : > { %v502_v55 = vadd.f32 %v501_v52, %v491_v51  ;;  %v516_v56 = vadd.f32 %v515_v53, %v514_v50 }
 0x17b   : > { %504 = vst.msk [vmem:[#allocation2] sm:$0x1] %vm239_vm0, %v502_v55  ;;  %v517_v57 = vadd.f32 %v516_v56, %v505_v54 }
 0x17d   : > { %518 = vst.msk [vmem:[#allocation3] sm:$0x1] %vm239_vm0, %v517_v57 }
 0x182   : > { %v526_v58 = vld [vmem:[#allocation2] sm:$0x1] }
 0x183   : > { %v527_v59 = vmul.f32 0.0625, %v526_v58 }
 0x184   : > { %v528_v60 = vld [vmem:[#allocation3] sm:$0x1] }
 0x185   : > { %v529_v61 = vmul.f32 0.0625, %v528_v60  ;;  %v530_v62 = vmul.f32 %v527_v59, %v527_v59 }
 0x187   : > { %v531_v63 = vsub.f32 %v529_v61, %v530_v62 }
 0x189   : > { %v532_v0 = vmax.f32 %v531_v63, 0.0 }
 0x18b   : > { %v534_v1 = vadd.f32 1e-05, %v532_v0 }
 0x18d   : > { %878 = vrsqrt.f32 %v534_v1 }
 0x197   : > { %v879_v6 = vpop.eup %878 }
 0x198   : > { %v536_v7 = vmul.f32 %v879_v6, %v533_v4 }
 0x19a   : > { %v538_v9 = vmul.f32 %v536_v7, %v527_v59  ;;  %v545_v10 = vrot.slane %v536_v7, %v544_v5 }
 0x19c   : > { %v539_v11 = vsub.f32 %v537_v8, %v538_v9  ;;  %v546_v14 = vmul.f32 %v545_v10, %v540_v12  ;;  %v547_v15 = vmul.f32 %v545_v10, %v541_v13 }
 0x19e   : > { %v551_v16 = vrot.slane %v539_v11, %v544_v5 }
 0x1a0   : > { %v552_v17 = vadd.f32 %v551_v16, %v546_v14  ;;  %v553_v18 = vadd.f32 %v551_v16, %v547_v15 }
 0x1a2   : > { %v554_v19 = vmax.f32 %v552_v17, 0.0  ;;  %v555_v20 = vmax.f32 %v553_v18, 0.0 }
 0x1a4   : > { %v726_v21 = vpack.c.bf16 %v554_v19, %v554_v19  ;;  %v727_v22 = vpack.c.bf16 %v555_v20, %v555_v20 }
 0x1a6   : > { %565 = vst.msk [vmem:[%s232_s24] sm:$0xf] %vm564_vm4, %v726_v21  ;;  %566 = vst.msk [vmem:[%s232_s24 + $0x4] sm:$0xf] %vm564_vm4, %v727_v22 }
 0x1a7   : > { %979 = shalt.err (!%p976_p2)
}
 0x1a8   : > { %s980_s9 = scalar_lea.hbm %s1298_s26, 128  ;;  %s984_s29 = scalar_lea.hbm %s1352_s3, 256 }
 0x1a9   : > { %p981_p0 = scmp.ne.s32.totalorder %s1298_s26, %s980_s9  ;;  %p985_p6 = scmp.lt.u32.totalorder %s1298_s26, %s1352_s3 }
 0x1aa   : > { %p986_p7 = scmp.lt.u32.totalorder %s984_s29, %s980_s9  ;;  %p988_p8 = scmp.lt.u32.totalorder %s980_s9, %s1298_s26 }
 0x1ab   : > { %p982_p4 = pnand %p981_p0, %p1367_p12 }
 0x1ac   : > { %p987_p11 = por %p986_p7, %p985_p6 }
 0x1ad   : > { %p983_p13 = pneg %p982_p4 }
 0x1ae   : > { %p989_p1 = por %p988_p8, %p987_p11 }
 0x1b0   : > { %p990_p10 = pnand %p989_p1, %p983_p13 }
 0x1b2   : > { %993 = shalt.err (!%p990_p10)
}
 0x1b3   : > { %s1064_s22 = smov 64   ;;  %s1065_s24 = smov 4  }
 0x1b4   : > { %775 = dma.vmem_to_hbm [thread:$0]  (%p1367_p12), %s1300_s28, 128, %s1298_s26, %s568_s15, %s1064_s22, %s1064_s22, %s1065_s24  }
 0x1b5 PF: > { %s596_s6 = sand.u32 1, %s1032_s12   ;;  %p1368_p3 = scmp.ne.s32.totalorder %s1360_s23, 0 }
 0x1b6   : > { %p1369_p5 = scmp.ge.s32.totalorder %s1052_s17, 2  ;;  %s597_s8 = scalar_lea.sflag [#allocation7], %s596_s6 }
 0x1b8   : > { %p789_p9 = pnand %p1369_p5, %p1368_p3 }
 0x1ba   : > { %1027 = dma.done.wait (!%p789_p9), %s597_s8, 128  }
 0x1bb   : > { %1029 = vsyncadd (!%p789_p9), %s597_s8, 4294967168  ;;  %s20_s17 = sadd.s32 1, %s1052_s17   ;;  %s1370_s12 = smov %s1036_s13 }
 0x1bc   : > { %p17_p2 = scmp.ge.s32.totalorder %s20_s17, 4   ;;  %s1371_s13 = smov %s1040_s14 }
 0x1bd   : > { %s1372_s14 = smov %s1231_s30  ;;  %s1373_s15 = smov %s1048_s16 }
 0x1be   : > { %s1374_s16 = smov %s1376_s11  ;;  %19 = sbr.rel (!%p17_p2) target bundleno = 7 (0x7), region = 94 }
 0x1c5   :  { %602 = vsyncpa [#allocation6], 1 }
 0x1c6   :  { %604 = vsyncpa [#allocation6 + $0x1], 1 }
 0x1c7   :  { %605 = vsyncpa [#allocation9], 1 }
 0x1c8   :  { %606 = vsyncpa [#allocation7], 1 }
 0x1c9   :  { %608 = vsyncpa [#allocation7 + $0x1], 1 }

// kernel: rgb_block_forward.12
= control target key start
LH: loop header
LB: loop body
LE: loop exit
PB: predicated region body
PF: predicated region fallthrough
CT: control target
= control target key end

     0   :  { %9 = vsyncpa [#allocation3], 0  ;;  %s2402_s0 = inlined_call_operand.hbm [shape: bf16[2,42,64], index: 0, kind: input, shape index: {}]   ;;  %s2403_s1 = inlined_call_operand.hbm [shape: bf16[9,64,64], index: 1, kind: input, shape index: {}]   ;;  %s2404_s2 = inlined_call_operand.hbm [shape: f32[2,64], index: 2, kind: input, shape index: {}]   ;;  %s2405_s3 = inlined_call_operand.hbm [shape: f32[24,1], index: 3, kind: input, shape index: {}]   ;;  %s2406_s4 = inlined_call_operand.hbm [shape: bf16[2,24,64], index: 4, kind: output, shape index: {}]  }
   0x1   :  { %11 = vsyncpa [#allocation3 + $0x1], 0 }
   0x2   :  { %12 = vsyncpa [#allocation6], 0 }
   0x3   :  { %13 = vsyncpa [#allocation9], 0 }
   0x4   :  { %14 = vsyncpa [#allocation4], 0 }
   0x5   :  { %16 = vsyncpa [#allocation4 + $0x1], 0  ;;  %s2044_s15 = smov 0   ;;  %s2046_s16 = smov 0  }
   0x6   :  { %s2048_s17 = smov 0   ;;  %s2050_s18 = smov 0  }
   0x7 LB: > { %s2065_s19 = sadd.s32 4294967295, %s2005_s18   ;;  %s1395_s20 = sadd.s32 4294967294, %s2005_s18   ;;  %s2005_s18 = sphi %s2050_s18, %s2429_s18   ;;  %s2001_s17 = sphi %s2048_s17, %s2428_s17   ;;  %s1997_s16 = sphi %s2046_s16, %s2427_s16   ;;  %s1993_s15 = sphi %s2044_s15, %s2426_s15  }
   0x8   : > { %p42_p0 = scmp.ne.s32.totalorder %s1997_s16, %s1993_s15  ;;  %p2407_p1 = scmp.eq.s32.totalorder %s2065_s19, 0 }
   0x9   : > { %p135_p3 = scmp.eq.s32.totalorder %s1395_s20, 1  ;;  %p1396_p5 = scmp.ge.s32.totalorder %s2005_s18, 1 }
   0xa   : > { %p2074_p4 = por %p2407_p1, %p42_p0  ;;  %p142_p7 = scmp.lt.s32.totalorder %s2005_s18, 3 }
   0xb   : > { %p2079_p6 = por %p135_p3, %p42_p0  ;;  %s2007_s24 = smov [#allocation5]  }
   0xc   : > { %s2410_s21 = scalar_select %p2074_p4, 1, 0 }
   0xd   : > { %s2411_s22 = scalar_select %p2079_p6, 1, 0 }
   0xe   : > { %p2084_p8 = pnand %p1396_p5, %p142_p7  ;;  %s154_s25 = sshll.u32 %s2007_s24, 4  ;;  %s2088_s25 = int_to_ptr.vmem [resolvable:$true] %s154_s25 }
   0xf   : > { %s2008_s27 = smov [#allocation7]   ;;  %s2009_s29 = smov [#allocation8]  }
  0x10   : > { %s2412_s23 = scalar_select %p2084_p8, 1, 0 }
  0x11   : > { %p1696_p9 = pneg %p2084_p8  ;;  %s168_s28 = sshll.u32 %s2008_s27, 4  ;;  %s2099_s28 = int_to_ptr.vmem [resolvable:$true] %s168_s28 }
  0x12   : > { %s2101_s30 = sshll.u32 %s2009_s29, 4  ;;  %s1817_s7 = scalar_lea.hbm %s2403_s1, 4608  ;;  %s179_s30 = int_to_ptr.vmem [resolvable:$true] %s2101_s30 }
  0x13   : > { %p2095_p11 = pnand %p1696_p9, %p2407_p1  ;;  %p1818_p12 = scmp.ne.s32.totalorder %s2403_s1, %s1817_s7 }
  0x14   : > { %p1824_p5 = scmp.lt.u32.totalorder %s1817_s7, %s2403_s1 }
  0x15   : > { %p2111_p13 = pneg %p2095_p11 }
  0x17   : > { %p1820_p0 = pnand %p2111_p13, %p1818_p12 }
  0x19   : > { %p1821_p3 = pneg %p1820_p0 }
  0x1b   : > { %p1826_p7 = pnand %p1824_p5, %p1821_p3 }
  0x1d   : > { %1829 = shalt.err (!%p1826_p7)
}
  0x1e   : > { %s1830_s13 = scalar_lea.vmem %s2088_s25, 4608  ;;  %p1838_p2 = scmp.lt.s32.totalorder %s2088_s25, %s2088_s25 }
  0x1f   : > { %p1831_p9 = scmp.ne.s32.totalorder %s2088_s25, %s1830_s13  ;;  %p1839_p6 = scmp.lt.s32.totalorder %s1830_s13, %s1830_s13 }
  0x21   : > { %p1833_p10 = pnand %p1831_p9, %p2111_p13  ;;  %p1840_p12 = por %p1839_p6, %p1838_p2 }
  0x23   : > { %p1834_p1 = pneg %p1833_p10 }
  0x25   : > { %p1841_p0 = pnand %p1840_p12, %p1834_p1 }
  0x27   : > { %1844 = shalt.err (!%p1841_p0)
}
  0x28   : > { %s2010_s14 = smov 64   ;;  %s2011_s20 = smov 4  }
  0x29   : > { %1699 = dma.hbm_to_vmem [thread:$0]  (!%p2095_p11), %s2403_s1, 4608, %s2088_s25, [#allocation6], %s2010_s14, %s2010_s14, %s2011_s20  }
  0x2a   : > { %s1845_s6 = scalar_lea.hbm %s2404_s2, 32 }
  0x2b   : > { %p1846_p1 = scmp.ne.s32.totalorder %s2404_s2, %s1845_s6  ;;  %p1852_p10 = scmp.lt.u32.totalorder %s1845_s6, %s2404_s2 }
  0x2d   : > { %p1848_p2 = pnand %p1846_p1, %p2111_p13 }
  0x2f   : > { %p1849_p6 = pneg %p1848_p2 }
  0x31   : > { %p1854_p3 = pnand %p1852_p10, %p1849_p6 }
  0x33   : > { %1857 = shalt.err (!%p1854_p3)
}
  0x34   : > { %s1858_s25 = scalar_lea.vmem %s2099_s28, 32  ;;  %p1866_p12 = scmp.lt.s32.totalorder %s2099_s28, %s2099_s28 }
  0x35   : > { %p1859_p5 = scmp.ne.s32.totalorder %s2099_s28, %s1858_s25  ;;  %p1867_p0 = scmp.lt.s32.totalorder %s1858_s25, %s1858_s25 }
  0x37   : > { %p1861_p7 = pnand %p1859_p5, %p2111_p13  ;;  %p1868_p1 = por %p1867_p0, %p1866_p12 }
  0x39   : > { %p1862_p9 = pneg %p1861_p7 }
  0x3b   : > { %p1869_p2 = pnand %p1868_p1, %p1862_p9 }
  0x3d   : > { %1872 = shalt.err (!%p1869_p2)
}
  0x3e   : > { %1702 = dma.hbm_to_vmem [thread:$0]  (!%p2095_p11), %s2404_s2, 32, %s2099_s28, [#allocation6]  }
  0x3f   : > { %s1873_s29 = scalar_lea.hbm %s2405_s3, 384 }
  0x40   : > { %p1874_p6 = scmp.ne.s32.totalorder %s2405_s3, %s1873_s29  ;;  %p1880_p5 = scmp.lt.u32.totalorder %s1873_s29, %s2405_s3 }
  0x42   : > { %p1876_p10 = pnand %p1874_p6, %p2111_p13 }
  0x44   : > { %p1877_p3 = pneg %p1876_p10 }
  0x46   : > { %p1882_p7 = pnand %p1880_p5, %p1877_p3 }
  0x48   : > { %1885 = shalt.err (!%p1882_p7)
}
  0x49   : > { %s1886_s9 = scalar_lea.vmem %s179_s30, 384  ;;  %p1894_p1 = scmp.lt.s32.totalorder %s179_s30, %s179_s30 }
  0x4a   : > { %p1887_p9 = scmp.ne.s32.totalorder %s179_s30, %s1886_s9  ;;  %p1895_p2 = scmp.lt.s32.totalorder %s1886_s9, %s1886_s9 }
  0x4c   : > { %p1889_p12 = pnand %p1887_p9, %p2111_p13  ;;  %p1896_p4 = por %p1895_p2, %p1894_p1 }
  0x4e   : > { %p1890_p0 = pneg %p1889_p12 }
  0x50   : > { %p1897_p8 = pnand %p1896_p4, %p1890_p0 }
  0x52   : > { %1900 = shalt.err (!%p1897_p8)
}
  0x53   : > { %s2012_s28 = smov 128   ;;  %s2013_s10 = smov 8  }
  0x54   : > { %1705 = dma.hbm_to_vmem [thread:$0]  (!%p2095_p11), %s2405_s3, 384, %s179_s30, [#allocation9], %s2012_s28, %s2012_s28, %s2013_s10  }
  0x55   : > { %s2178_s12 = sadd.s32 1, %s2005_s18   ;;  %s29_s24 = sadd.s32 1, %s2001_s17 }
  0x56   : > { %s26_s13 = ssub.s32 %s2005_s18, %s2178_s12  ;;  %p36_p8 = scmp.ne.s32.totalorder %s2001_s17, %s1997_s16 }
  0x57   : > { %p27_p4 = scmp.eq.s32.totalorder %s26_s13, 0  ;;  %p37_p13 = scmp.eq.s32.totalorder %s2005_s18, 0 }
  0x58   : > { %p1717_p6 = scmp.lt.s32.totalorder %s2005_s18, 2  ;;  %p2415_p3 = scmp.eq.s32.totalorder %s2065_s19, 1 }
  0x59   : > { %s2188_s27 = scalar_select %p27_p4, %s2001_s17, %s29_s24  }
  0x5a   : > { %p38_p10 = por %p37_p13, %p36_p8  ;;  %p2192_p5 = por %p2415_p3, %p36_p8 }
  0x5b   : > { %s192_s26 = sand.u32 1, %s2001_s17   ;;  %s1676_s5 = smul.u32 384, %s2005_s18 }
  0x5c   : > { %s1675_s30 = smul.u32 24, %s192_s26  ;;  %p2198_p11 = pnand %p1717_p6, %p38_p10 }
  0x5d   : > { %s2205_s9 = scalar_lea.hbm %s2402_s0, %s1676_s5  ;;  %s2209_s11 = scalar_lea.sflag [#allocation3], %s192_s26 }
  0x5e   : > { %s196_s28 = scalar_lea.vmem [#allocation2], %s1675_s30  ;;  %s1901_s25 = scalar_lea.hbm %s2205_s9, 384 }
  0x5f   : > { %s203_s10 = sshll.u32 %s196_s28, 4  ;;  %p1902_p7 = scmp.ne.s32.totalorder %s2205_s9, %s1901_s25  ;;  %s2207_s10 = int_to_ptr.vmem [resolvable:$true] %s203_s10 }
  0x60   : > { %p1903_p9 = pneg %p2198_p11  ;;  %s1906_s5 = scalar_lea.hbm %s2402_s0, 768 }
  0x61   : > { %p1907_p1 = scmp.lt.u32.totalorder %s2205_s9, %s2402_s0  ;;  %p1908_p2 = scmp.lt.u32.totalorder %s1906_s5, %s1901_s25 }
  0x62   : > { %p1904_p12 = pnand %p1903_p9, %p1902_p7  ;;  %p1910_p8 = scmp.lt.u32.totalorder %s1901_s25, %s2205_s9 }
  0x63   : > { %p1909_p4 = por %p1908_p2, %p1907_p1 }
  0x64   : > { %p1905_p0 = pneg %p1904_p12 }
  0x65   : > { %p1911_p13 = por %p1910_p8, %p1909_p4 }
  0x67   : > { %p1912_p6 = pnand %p1911_p13, %p1905_p0 }
  0x69   : > { %1915 = shalt.err (!%p1912_p6)
}
  0x6a   : > { %s1916_s26 = scalar_lea.vmem %s2207_s10, 384  ;;  %s2014_s30 = smov [#allocation2]  }
  0x6b   : > { %p1917_p10 = scmp.ne.s32.totalorder %s2207_s10, %s1916_s26  ;;  %s1921_s28 = sshll.u32 %s2014_s30, 4  ;;  %s1922_s28 = int_to_ptr.vmem [resolvable:$false] %s1921_s28 }
  0x6c   : > { %s1923_s13 = scalar_lea.vmem %s1922_s28, 768  ;;  %p1924_p12 = scmp.lt.s32.totalorder %s2207_s10, %s1922_s28 }
  0x6d   : > { %p1919_p3 = pnand %p1917_p10, %p1903_p9  ;;  %p1925_p1 = scmp.lt.s32.totalorder %s1923_s13, %s1916_s26 }
  0x6f   : > { %p1920_p7 = pneg %p1919_p3  ;;  %p1926_p2 = por %p1925_p1, %p1924_p12 }
  0x71   : > { %p1927_p4 = pnand %p1926_p2, %p1920_p7 }
  0x73   : > { %1930 = shalt.err (!%p1927_p4)
}
  0x74   : > { %1709 = dma.hbm_to_vmem [thread:$0]  (!%p2198_p11), %s2205_s9, 384, %s2207_s10, %s2209_s11, %s2010_s14, %s2010_s14, %s2011_s20  }
  0x75   : > { %p2418_p9 = scmp.ne.s32.totalorder %s2412_s23, 0 }
  0x76   : > { %s2243_s25 = sand.u32 (!%p2418_p9), 1, %s1997_s16   ;;  %p2419_p0 = scmp.ne.s32.totalorder (!%p2418_p9), %s2410_s21, 0 }
  0x77   : > { %215 = sbr.rel (%p2418_p9) target bundleno = 505 (0x1f9), region = 36  ;;  %s218_s5 = scalar_lea.sflag (!%p2418_p9), [#allocation3], %s2243_s25 }
  0x78   : > { %s1677_s24 = smul.u32 (!%p2418_p9), 24, %s2243_s25 }
  0x7a   : > { %s2247_s7 = scalar_lea.vmem (!%p2418_p9), [#allocation2], %s1677_s24 }
  0x7e   : > { %1976 = dma.done.wait (%p2419_p0), %s218_s5, 384  }
  0x7f   : > { %1978 = vsyncadd (%p2419_p0), %s218_s5, 4294966912  ;;  %p2420_p11 = scmp.eq.s32.totalorder %s2065_s19, 0 }
  0x81   : > { %1980 = dma.done.wait (%p2420_p11), [#allocation6], 4640   ;;  %p2421_p8 = pmov %p2420_p11 }
  0x83   : > { %1982 = vsyncadd (%p2421_p8), [#allocation6], 4294962656  ;;  %p2422_p13 = pmov %p2421_p8 }
  0x84   : > { %p2423_p6 = pmov %p2421_p8 }
  0x85   : > { %1984 = dma.done.wait (%p2422_p13), [#allocation9], 384  }
  0x86   : > { %1986 = vsyncadd (%p2423_p6), [#allocation9], 4294966912  ;;  %v2015_v0 = vmov 0   ;;  %v1766_v1 = vld [vmem:[#allocation5 + $0x20] sm:$0xff]   ;;  %v1768_v3 = vld [vmem:[#allocation5 + $0x28] sm:$0xff]   ;;  %vm330_vm1 = vcmask 523264  }
  0x87   : > { %1764 = vset.pattern.permute.xlu0 %v2015_v0  ;;  %1765 = vset.pattern.permute.xlu1 %v2015_v0  ;;  %v1767_v2 = vld [vmem:[#allocation5 + $0x80] sm:$0xff]   ;;  %v1769_v4 = vld [vmem:[#allocation5 + $0x88] sm:$0xff]   ;;  %v1770_v5 = vld [vmem:[#allocation5 + $0x30] sm:$0xff]   ;;  %vm290_vm0 = vsmask.f32 7424  ;;  %vm476_vm3 = vcmask 1046528  }
  0x88   : > { %1536 = vmatprep.subr.bf16.mxu1 %v1766_v1  ;;  %1584 = vmatprep.subr.bf16.mxu0 %v1767_v2  ;;  %v1771_v6 = vld [vmem:[#allocation5 + $0x90] sm:$0xff]   ;;  %v1772_v7 = vld [vmem:[#allocation5 + $0x38] sm:$0xff]   ;;  %vm676_vm2 = vsmask.f32 4352  ;;  %v1776_v23 = vld [vmem:[#allocation5] sm:$0xff]   ;;  %vm890_vm4 = vcmask 1045504  }
  0x89   : > { %1537 = vmatpush3.bf16.msra.mxu1 %v1766_v1  ;;  %1585 = vmatpush3.bf16.msra.mxu0 %v1767_v2  ;;  %v1773_v8 = vld [vmem:[#allocation5 + $0x98] sm:$0xff]   ;;  %v259_v9 = vld [vmem:[%s2247_s7] sm:$0xf]  ;;  %v2263_v10 = vld [vmem:[%s2247_s7 + $0x4] sm:$0xf]  ;;  %vm578_vm5 = vcmask 1044480  }
  0x8a   : > { %1538 = vmatprep.subr.bf16.mxu1 %v1768_v3  ;;  %1586 = vmatprep.subr.bf16.mxu0 %v1769_v4  ;;  %v2266_v11 = vld [vmem:[%s2247_s7 + $0x8] sm:$0xf]  ;;  %v270_v12 = vld [vmem:[%s2247_s7 + $0xc] sm:$0x1]  ;;  %v1406_v13 = vcombine.low %v259_v9, %v2263_v10  ;;  %v561_v15 = vld [vmem:[%s2247_s7] sm:$0x8] }
  0x8b   : > { %v2271_v14 = vcombine.low %v2266_v11, %v270_v12  ;;  %v2275_v16 = vld [vmem:[%s2247_s7 + $0xc] sm:$0xf]  ;;  %v2278_v19 = vcombine.low %v561_v15, %v2263_v10  ;;  %v1780_v24 = vld [vmem:[#allocation5 + $0xa0] sm:$0xff]   ;;  %v1781_v39 = vld [vmem:[#allocation5 + $0x8] sm:$0xff]   ;;  %v1443_v41 = vcombine.low %v2263_v10, %v2266_v11  ;;  %v1414_v58 = vcombine.low %v2266_v11, %v2266_v11  ;;  %s1678_s21 = smul.u32 12, %s2243_s25  ;;  %s2016_s8 = smov [#allocation10]  }
  0x8c   : > { %v292_v17 = vshrl.u32 %v1406_v13, 16  ;;  %v294_v18 = vshll.u32 %v1406_v13, 16  ;;  %v1436_v20 = vcombine.low %v2266_v11, %v2275_v16  ;;  %v1782_v43 = vld [vmem:[#allocation5 + $0xa8] sm:$0xff]   ;;  %v1783_v44 = vld [vmem:[#allocation5 + $0x10] sm:$0xff]   ;;  %v1785_v46 = vld [vmem:[#allocation5 + $0x18] sm:$0xff]   ;;  %v1444_v1 = vcombine.low %v2275_v16, %v2275_v16  ;;  %s1679_s23 = smul.u32 192, %s2065_s19 }
  0x8d   : > { %1539 = vmatpush3.bf16.msra.mxu1 %v1768_v3  ;;  %1587 = vmatpush3.bf16.msra.mxu0 %v1769_v4  ;;  %v299_v21 = vshll.u32 %v2271_v14, 16  ;;  %v303_v22 = vshrl.u32 %v2271_v14, 16  ;;  %v678_v26 = vshrl.u32 %v2278_v19, 16  ;;  %v681_v27 = vshll.u32 %v2278_v19, 16  ;;  %v1784_v45 = vld [vmem:[#allocation5 + $0xb0] sm:$0xff]   ;;  %v1786_v47 = vld [vmem:[#allocation5 + $0xb8] sm:$0xff]  }
  0x8e   : > { %1540 = vmatprep.subr.bf16.mxu1 %v1770_v5  ;;  %1588 = vmatprep.subr.bf16.mxu0 %v1771_v6  ;;  %v296_v25 = vrot.slane %v294_v18, 1  ;;  %v686_v28 = vshrl.u32 %v1436_v20, 16  ;;  %v689_v30 = vshll.u32 %v1436_v20, 16  ;;  %v463_v48 = vld [vmem:[%s2247_s7] sm:$0xe]  ;;  %v1787_v49 = vld [vmem:[#allocation5 + $0x40] sm:$0xff]   ;;  %s2356_s10 = scalar_lea.hbm %s2406_s4, %s1679_s23 }
  0x8f   : > { %v301_v29 = vrot.slane %v299_v21, 1  ;;  %v680_v32 = vrot.slane %v678_v26, 3  ;;  %v683_v33 = vrot.slane %v681_v27, 4  ;;  %v1421_v50 = vcombine.low %v463_v48, %v2263_v10  ;;  %v867_v51 = vld [vmem:[%s2247_s7 + $0x4] sm:$0xc]  ;;  %v1789_v61 = vld [vmem:[#allocation5 + $0xc0] sm:$0xff]  }
  0x90   : > { %v297_v31 = vor.u32 %v296_v25, %v292_v17  ;;  %v688_v34 = vrot.slane %v686_v28, 3  ;;  %v691_v36 = vrot.slane %v689_v30, 4  ;;  %v2300_v52 = vld [vmem:[%s2247_s7 + $0x8] sm:$0xf]  ;;  %v869_v53 = vld [vmem:[%s2247_s7 + $0xc] sm:$0xf] }
  0x91   : > { %1541 = vmatpush3.bf16.msra.mxu1 %v1770_v5  ;;  %1589 = vmatpush3.bf16.msra.mxu0 %v1771_v6  ;;  %v305_v35 = vor.u32 %v303_v22, %v301_v29  ;;  %v684_v38 = vor.u32 %v683_v33, %v680_v32  ;;  %v477_v54 = vrot.slane %v1421_v50, 1  ;;  %v478_v55 = vrot.slane %v2271_v14, 1  ;;  %v870_v56 = vld [vmem:[%s2247_s7 + $0x10] sm:$0x3]  ;;  %v1791_v63 = vld [vmem:[#allocation5 + $0x48] sm:$0xff]   ;;  %v1793_v6 = vld [vmem:[#allocation5 + $0x50] sm:$0xff]  }
  0x92   : > { %1542 = vmatprep.subr.bf16.mxu1 %v1772_v7  ;;  %1590 = vmatprep.subr.bf16.mxu0 %v1773_v8  ;;  %v302_v37 = vsel %vm290_vm0, %v297_v31, %v301_v29  ;;  %v692_v40 = vor.u32 %v691_v36, %v688_v34  ;;  %v1451_v57 = vcombine.low %v867_v51, %v2300_v52  ;;  %v975_v60 = vld [vmem:[%s2247_s7 + $0x10] sm:$0x7]  ;;  %v1792_v3 = vld [vmem:[#allocation5 + $0xc8] sm:$0xff]   ;;  %v579_v26 = vrot.slane %v2278_v19, 3  ;;  %v1805_v34 = vld [vmem:[#allocation5 + $0x70] sm:$0xff]   ;;  %s257_s14 = scalar_lea.vmem [#allocation10], %s1678_s21 }
  0x93   : > { %1544 = vmatprep.mubr.msk.bf16.mxu1 %vm330_vm1, %v302_v37  ;;  %v1452_v59 = vcombine.low %v869_v53, %v870_v56  ;;  %v479_v2 = vsel %vm476_vm3, %v477_v54, %v478_v55  ;;  %v2319_v5 = vcombine.low %v869_v53, %v975_v60  ;;  %v1795_v15 = vld [vmem:[#allocation5 + $0x58] sm:$0xff]   ;;  %v1184_v17 = vld [vmem:[#allocation8] sm:$0xff]  ;;  %v1185_v28 = vld [vmem:[#allocation8 + $0x8] sm:$0xff]  ;;  %vm988_vm6 = vsmask.f32 5376  ;;  %s1293_s20 = sshll.u32 %s257_s14, 4  ;;  %s2358_s20 = int_to_ptr.vmem [resolvable:$true] %s1293_s20 }
  0x94   : > { %v693_v42 = vsel %vm676_vm2, %v684_v38, %v692_v40  ;;  %v891_v62 = vrot.slane %v1451_v57, 2  ;;  %v990_v9 = vshrl.u32 %v1451_v57, 16  ;;  %v993_v10 = vshll.u32 %v1451_v57, 16  ;;  %v1186_v18 = vld [vmem:[#allocation8 + $0x10] sm:$0xff]  ;;  %v1798_v25 = vld [vmem:[#allocation5 + $0x60] sm:$0xff]   ;;  %1189 = vperm.xlu0 %1764, %v1184_v17   ;;  %v1803_v31 = vld [vmem:[#allocation5 + $0x68] sm:$0xff]  }
  0x95   : > { %1543 = vmatpush3.bf16.msra.mxu1 %v1772_v7  ;;  %1591 = vmatpush3.bf16.msra.mxu0 %v1773_v8  ;;  %v2309_v0 = vrot.slane %v1452_v59, 2  ;;  %v1794_v7 = vld [vmem:[#allocation5 + $0xd0] sm:$0xff]   ;;  %v998_v12 = vshrl.u32 %v2319_v5, 16  ;;  %v1796_v20 = vld [vmem:[#allocation5 + $0xd8] sm:$0xff]   ;;  %v1804_v19 = vld [vmem:[#allocation5 + $0xe8] sm:$0xff]   ;;  %vm1275_vm7 = vcmask 519168  }
  0x96   : > { %1548 = vmatprep.subr.bf16.mxu1 %v1776_v23  ;;  %1596 = vmatprep.subr.bf16.mxu0 %v1780_v24  ;;  %v562_v8 = vld [vmem:[%s2247_s7 + $0xc] sm:$0x7]  ;;  %v992_v21 = vrot.slane %v990_v9, 2  ;;  %v995_v22 = vrot.slane %v993_v10, 3  ;;  %v1087_v36 = vld [vmem:[%s2247_s7 + $0x4] sm:$0x8] }
  0x97   : > { %1592 = vmatprep.mubr.msk.bf16.mxu0 %vm330_vm1, %v693_v42  ;;  %v893_v4 = vsel %vm890_vm4, %v891_v62, %v2309_v0  ;;  %v1429_v16 = vcombine.low %v2266_v11, %v562_v8  ;;  %1199 = vperm.xlu1 %1765, %v1186_v18   ;;  %v1802_v11 = vld [vmem:[#allocation5 + $0xe0] sm:$0xff]   ;;  %v1806_v14 = vld [vmem:[#allocation5 + $0xf0] sm:$0xff]   ;;  %v1808_v37 = vld [vmem:[#allocation5 + $0xf8] sm:$0xff]   ;;  %v1466_v38 = vcombine.low %v1087_v36, %v2300_v52  ;;  %s1280_s19 = scalar_lea.sflag [#allocation4], %s2243_s25  ;;  %s1931_s11 = scalar_lea.vmem %s2358_s20, 192 }
  0x98   : > { %1545 = vmatmul.mubr.msk.bf16.vlgmr.msra.gmra.mrb[0].mxu1 %vm330_vm1, %v305_v35  ;;  %1593 = vmatmul.mubr.msk.bf16.vlgmr.msra.gmra.mrb[0].mxu0 %vm330_vm1, %v692_v40  ;;  %v996_v29 = vor.u32 %v995_v22, %v992_v21  ;;  %v1807_v35 = vld [vmem:[#allocation5 + $0x78] sm:$0xff]   ;;  %v1811_v42 = vld [vmem:[#allocation5 + $0x108] sm:$0xff]   ;;  %p1932_p10 = scmp.ne.s32.totalorder %s2358_s20, %s1931_s11  ;;  %s1935_s26 = sshll.u32 %s2016_s8, 4  ;;  %s1936_s26 = int_to_ptr.vmem [resolvable:$false] %s1935_s26 }
  0x99   : > { %1549 = vmatpush3.bf16.msra.mxu1 %v1776_v23  ;;  %1556 = vmatprep.mubr.msk.bf16.mxu1 %vm330_vm1, %v1406_v13  ;;  %v1001_v13 = vshll.u32 %v2319_v5, 16  ;;  %v1000_v23 = vrot.slane %v998_v12, 2  ;;  %v580_v27 = vrot.slane %v1429_v16, 3  ;;  %v1100_v40 = vrot.slane %v1466_v38, 3  ;;  %s1937_s30 = scalar_lea.vmem %s1936_s26, 384  ;;  %p1938_p12 = scmp.lt.s32.totalorder %s2358_s20, %s1936_s26 }
  0x9a   : > { %1550 = vmatprep.subr.bf16.mxu1 %v1781_v39  ;;  %1597 = vmatpush3.bf16.msra.mxu0 %v1780_v24  ;;  %p1933_p3 = pnand %p1932_p10, %p2192_p5  ;;  %p1939_p1 = scmp.lt.s32.totalorder %s1937_s30, %s1931_s11 }
  0x9b   : > { %1604 = vmatprep.mubr.msk.bf16.mxu0 %vm330_vm1, %v1443_v41  ;;  %1598 = vmatprep.subr.bf16.mxu0 %v1782_v43  ;;  %v1003_v24 = vrot.slane %v1001_v13, 3  ;;  %v581_v32 = vsel %vm578_vm5, %v579_v26, %v580_v27  ;;  %v1101_v41 = vrot.slane %v2319_v5, 3 }
  0x9c   : > { %1194 = vperm.xlu0 %1764, %v1185_v28   ;;  %p1934_p7 = pneg %p1933_p3  ;;  %p1940_p2 = por %p1939_p1, %p1938_p12 }
  0x9d   : > { %1551 = vmatpush3.bf16.msra.mxu1 %v1781_v39  ;;  %v1004_v30 = vor.u32 %v1003_v24, %v1000_v23  ;;  %v1810_v39 = vld [vmem:[#allocation5 + $0x100] sm:$0xff]  }
  0x9e   : > { %1552 = vmatprep.subr.bf16.mxu1 %v1783_v44  ;;  %1599 = vmatpush3.bf16.msra.mxu0 %v1782_v43  ;;  %v1102_v43 = vsel %vm578_vm5, %v1100_v40, %v1101_v41  ;;  %p1941_p4 = pnand %p1940_p2, %p1934_p7 }
  0x9f   : > { %1600 = vmatprep.subr.bf16.mxu0 %v1784_v45  ;;  %v1005_v33 = vsel %vm988_vm6, %v996_v29, %v1004_v30 }
  0xa1   : > { %1553 = vmatpush3.bf16.msra.mxu1 %v1783_v44  ;;  %v1812_v44 = vld [vmem:[#allocation5 + $0x110] sm:$0xff]  }
  0xa2   : > { %1554 = vmatprep.subr.bf16.mxu1 %v1785_v46  ;;  %1601 = vmatpush3.bf16.msra.mxu0 %v1784_v45  ;;  %v1813_v45 = vld [vmem:[#allocation5 + $0x118] sm:$0xff]  }
  0xa3   : > { %1602 = vmatprep.subr.bf16.mxu0 %v1786_v47 }
  0xa5   : > { %1555 = vmatpush3.bf16.msra.mxu1 %v1785_v46 }
  0xa6   : > { %1560 = vmatprep.subr.bf16.mxu1 %v1787_v49  ;;  %1603 = vmatpush3.bf16.msra.mxu0 %v1786_v47 }
  0xa7   : > { %1608 = vmatprep.subr.bf16.mxu0 %v1789_v61 }
  0xa8   : > { %1557 = vmatmul.mubr.msk.bf16.vlgmr.msra.gmra.mrb[0].mxu1 %vm330_vm1, %v1414_v58 }
  0xa9   : > { %1561 = vmatpush3.bf16.msra.mxu1 %v1787_v49  ;;  %1568 = vmatprep.mubr.msk.bf16.mxu1 %vm330_vm1, %v479_v2 }
  0xaa   : > { %1562 = vmatprep.subr.bf16.mxu1 %v1791_v63  ;;  %1605 = vmatmul.mubr.msk.bf16.vlgmr.msra.gmra.mrb[0].mxu0 %vm330_vm1, %v1444_v1 }
  0xab   : > { %1609 = vmatpush3.bf16.msra.mxu0 %v1789_v61  ;;  %1616 = vmatprep.mubr.msk.bf16.mxu0 %vm330_vm1, %v893_v4 }
  0xac   : > { %1610 = vmatprep.subr.bf16.mxu0 %v1792_v3 }
  0xad   : > { %1563 = vmatpush3.bf16.msra.mxu1 %v1791_v63 }
  0xae   : > { %1564 = vmatprep.subr.bf16.mxu1 %v1793_v6 }
  0xaf   : > { %1611 = vmatpush3.bf16.msra.mxu0 %v1792_v3 }
  0xb0   : > { %1612 = vmatprep.subr.bf16.mxu0 %v1794_v7 }
  0xb1   : > { %1565 = vmatpush3.bf16.msra.mxu1 %v1793_v6 }
  0xb2   : > { %1566 = vmatprep.subr.bf16.mxu1 %v1795_v15 }
  0xb3   : > { %1613 = vmatpush3.bf16.msra.mxu0 %v1794_v7 }
  0xb4   : > { %1614 = vmatprep.subr.bf16.mxu0 %v1796_v20 }
  0xb5   : > { %1567 = vmatpush3.bf16.msra.mxu1 %v1795_v15 }
  0xb6   : > { %1572 = vmatprep.subr.bf16.mxu1 %v1798_v25 }
  0xb7   : > { %1615 = vmatpush3.bf16.msra.mxu0 %v1796_v20 }
  0xb8   : > { %1569 = vmatmul.mubr.msk.bf16.vlgmr.msra.gmra.mrb[0].mxu1 %vm330_vm1, %v478_v55  ;;  %1620 = vmatprep.subr.bf16.mxu0 %v1802_v11 }
  0xb9   : > { %1573 = vmatpush3.bf16.msra.mxu1 %v1798_v25  ;;  %1580 = vmatprep.mubr.msk.bf16.mxu1 %vm330_vm1, %v581_v32 }
  0xba   : > { %1574 = vmatprep.subr.bf16.mxu1 %v1803_v31  ;;  %1617 = vmatmul.mubr.msk.bf16.vlgmr.msra.gmra.mrb[0].mxu0 %vm330_vm1, %v2309_v0 }
  0xbb   : > { %1621 = vmatpush3.bf16.msra.mxu0 %v1802_v11  ;;  %1628 = vmatprep.mubr.msk.bf16.mxu0 %vm330_vm1, %v1005_v33 }
  0xbc   : > { %1622 = vmatprep.subr.bf16.mxu0 %v1804_v19 }
  0xbd   : > { %1575 = vmatpush3.bf16.msra.mxu1 %v1803_v31 }
  0xbe   : > { %1576 = vmatprep.subr.bf16.mxu1 %v1805_v34 }
  0xbf   : > { %1623 = vmatpush3.bf16.msra.mxu0 %v1804_v19 }
  0xc0   : > { %1624 = vmatprep.subr.bf16.mxu0 %v1806_v14 }
  0xc1   : > { %1577 = vmatpush3.bf16.msra.mxu1 %v1805_v34  ;;  %v1245_v34 = vlaneseq }
  0xc2   : > { %1578 = vmatprep.subr.bf16.mxu1 %v1807_v35 }
  0xc3   : > { %1625 = vmatpush3.bf16.msra.mxu0 %v1806_v14  ;;  %v1246_v14 = vshrl.u32 %v1245_v34, 7 }
  0xc4   : > { %1626 = vmatprep.subr.bf16.mxu0 %v1808_v37 }
  0xc5   : > { %1579 = vmatpush3.bf16.msra.mxu1 %v1807_v35  ;;  %v1238_v35 = vld [vmem:[#allocation7] sm:$0x1]  ;;  %v1247_v36 = vsub.s32 0, %v1246_v14 }
  0xc7   : > { %1627 = vmatpush3.bf16.msra.mxu0 %v1808_v37 }
  0xc8   : > { %1581 = vmatmul.mubr.msk.bf16.vlgmr.msra.gmra.mrb[0].mxu1 %vm330_vm1, %v580_v27  ;;  %1632 = vmatprep.subr.bf16.mxu0 %v1810_v39 }
  0xca   : > { %1629 = vmatmul.mubr.msk.bf16.vlgmr.msra.gmra.mrb[0].mxu0 %vm330_vm1, %v1004_v30 }
  0xcb   : > { %1633 = vmatpush3.bf16.msra.mxu0 %v1810_v39  ;;  %1640 = vmatprep.mubr.msk.bf16.mxu0 %vm330_vm1, %v1102_v43  ;;  %v1242_v39 = vld [vmem:[#allocation7 + $0x1] sm:$0x1] }
  0xcc   : > { %1634 = vmatprep.subr.bf16.mxu0 %v1811_v42 }
  0xcf   : > { %1635 = vmatpush3.bf16.msra.mxu0 %v1811_v42 }
  0xd0   : > { %1636 = vmatprep.subr.bf16.mxu0 %v1812_v44 }
  0xd3   : > { %1637 = vmatpush3.bf16.msra.mxu0 %v1812_v44 }
  0xd4   : > { %1638 = vmatprep.subr.bf16.mxu0 %v1813_v45 }
  0xd7   : > { %1639 = vmatpush3.bf16.msra.mxu0 %v1813_v45 }
  0xda   : > { %1641 = vmatmul.mubr.msk.bf16.vlgmr.msra.gmra.mrb[0].mxu0 %vm330_vm1, %v1101_v41 }
 0x113   : > { %v1190_v50 = vpop.permute.xlu0 %1189 }
 0x116   : > { %v1200_v56 = vpop.permute.xlu1 %1199 }
 0x11b   : > { %v1195_v62 = vpop.permute.xlu0 %1194 }
 0x19b   : > { %v1582_v46 = vpop.f32.mrb[0].mxu1 }
 0x19c   : > { %v646_v47 = vpop.f32.mrb[1].mxu1 }
 0x19d   : > { %v1583_v48 = vpop.f32.mrb[2].mxu1 }
 0x19e   : > { %v649_v49 = vpop.f32.mrb[3].mxu1 }
 0x1ad   : > { %v1642_v51 = vpop.f32.mrb[0].mxu0 }
 0x1ae   : > { %v1644_v52 = vadd.f32 %v1642_v51, %v1582_v46  ;;  %v1167_v53 = vpop.f32.mrb[1].mxu0 }
 0x1af   : > { %v1645_v54 = vadd.f32 %v1167_v53, %v646_v47  ;;  %v1643_v55 = vpop.f32.mrb[2].mxu0 }
 0x1b0   : > { %v1170_v57 = vpop.f32.mrb[3].mxu0  ;;  %v1218_v60 = vmul.f32 %v1644_v52, %v1644_v52  ;;  %v1204_v0 = vmul.f32 %v1644_v52, %v1200_v56 }
 0x1b1   : > { %v1202_v58 = vmul.f32 %v1645_v54, %v1190_v50  ;;  %v1216_v59 = vmul.f32 %v1645_v54, %v1645_v54  ;;  %v1646_v61 = vadd.f32 %v1170_v57, %v649_v49 }
 0x1b2   : > { %v1221_v4 = vmul.f32 %v1218_v60, %v1200_v56  ;;  %v1208_v9 = vsel %vm330_vm1, %v1204_v0, 0.0 }
 0x1b3   : > { %v1219_v63 = vmul.f32 %v1216_v59, %v1190_v50  ;;  %v1203_v1 = vmul.f32 %v1646_v61, %v1195_v62  ;;  %v1217_v2 = vmul.f32 %v1646_v61, %v1646_v61  ;;  %v1205_v3 = vsel %vm330_vm1, %v1202_v58, 0.0 }
 0x1b4   : > { %v1225_v15 = vsel %vm330_vm1, %v1221_v4, 0.0 }
 0x1b5   : > { %v1206_v5 = vsel %vm330_vm1, %v1203_v1, 0.0  ;;  %v1220_v6 = vmul.f32 %v1217_v2, %v1195_v62  ;;  %v1222_v8 = vsel %vm330_vm1, %v1219_v63, 0.0 }
 0x1b6   : > { %v1207_v7 = vadd.f32 %v1206_v5, %v1205_v3 }
 0x1b7   : > { %v1223_v10 = vsel %vm330_vm1, %v1220_v6, 0.0 }
 0x1b8   : > { %v1209_v12 = vadd.f32 %v1208_v9, %v1207_v7  ;;  %v1224_v13 = vadd.f32 %v1223_v10, %v1222_v8 }
 0x1ba   : > { %v1210_v16 = vrot.slane %v1209_v12, 4  ;;  %v1226_v17 = vadd.f32 %v1225_v15, %v1224_v13 }
 0x1bc   : > { %v1211_v18 = vadd.f32 %v1210_v16, %v1209_v12  ;;  %v1227_v20 = vrot.slane %v1226_v17, 4 }
 0x1be   : > { %v1212_v21 = vrot.slane %v1211_v18, 2  ;;  %v1228_v22 = vadd.f32 %v1227_v20, %v1226_v17 }
 0x1c0   : > { %v1213_v23 = vadd.f32 %v1212_v21, %v1211_v18  ;;  %v1229_v24 = vrot.slane %v1228_v22, 2 }
 0x1c2   : > { %v1214_v25 = vrot.slane %v1213_v23, 1  ;;  %v1230_v26 = vadd.f32 %v1229_v24, %v1228_v22 }
 0x1c4   : > { %v1215_v27 = vadd.f32 %v1214_v25, %v1213_v23  ;;  %v1231_v28 = vrot.slane %v1230_v26, 1 }
 0x1c6   : > { %v1232_v11 = vadd.f32 %v1231_v28, %v1230_v26  ;;  %v1233_v29 = vmul.f32 0.0625, %v1215_v27 }
 0x1c8   : > { %v1234_v30 = vmul.f32 0.0625, %v1232_v11  ;;  %v1235_v31 = vmul.f32 %v1233_v29, %v1233_v29 }
 0x1ca   : > { %v1236_v32 = vsub.f32 %v1234_v30, %v1235_v31 }
 0x1cc   : > { %v1237_v19 = vmax.f32 %v1236_v32, 0.0 }
 0x1ce   : > { %v1239_v33 = vadd.f32 1e-05, %v1237_v19 }
 0x1d0   : > { %1815 = vrsqrt.f32 %v1239_v33 }
 0x1da   : > { %v1816_v37 = vpop.eup %1815 }
 0x1db   : > { %v1241_v38 = vmul.f32 %v1816_v37, %v1238_v35 }
 0x1dd   : > { %v1243_v40 = vmul.f32 %v1241_v38, %v1233_v29  ;;  %v1248_v41 = vrot.slane %v1241_v38, %v1247_v36 }
 0x1df   : > { %v1244_v42 = vsub.f32 %v1242_v39, %v1243_v40  ;;  %v1249_v43 = vmul.f32 %v1645_v54, %v1248_v41  ;;  %v1250_v44 = vmul.f32 %v1646_v61, %v1248_v41  ;;  %v1251_v45 = vmul.f32 %v1644_v52, %v1248_v41 }
 0x1e1   : > { %v1255_v46 = vrot.slane %v1244_v42, %v1247_v36 }
 0x1e3   : > { %v1256_v47 = vadd.f32 %v1255_v46, %v1249_v43  ;;  %v1257_v48 = vadd.f32 %v1255_v46, %v1250_v44  ;;  %v1258_v49 = vadd.f32 %v1255_v46, %v1251_v45 }
 0x1e5   : > { %v1259_v50 = vmax.f32 %v1256_v47, 0.0  ;;  %v1260_v51 = vmax.f32 %v1257_v48, 0.0  ;;  %v1261_v53 = vmax.f32 %v1258_v49, 0.0 }
 0x1e7   : > { %v1479_v52 = vpack.c.bf16 %v1259_v50, %v1259_v50  ;;  %v1480_v54 = vpack.c.bf16 %v1260_v51, %v1260_v51  ;;  %v1481_v55 = vpack.c.bf16 %v1261_v53, %v1261_v53 }
 0x1e9   : > { %1277 = vst.msk [vmem:[%s257_s14 + $0x4] sm:$0xf] %vm1275_vm7, %v1480_v54  ;;  %1276 = vst.msk [vmem:[%s257_s14] sm:$0xf] %vm1275_vm7, %v1479_v52 }
 0x1ea   : > { %1278 = vst.msk [vmem:[%s257_s14 + $0x8] sm:$0xf] %vm1275_vm7, %v1481_v55 }
 0x1eb   : > { %1944 = shalt.err (!%p1941_p4)
}
 0x1ec   : > { %s1945_s28 = scalar_lea.hbm %s2356_s10, 192  ;;  %s1949_s5 = scalar_lea.hbm %s2406_s4, 384 }
 0x1ed   : > { %p1946_p9 = scmp.ne.s32.totalorder %s2356_s10, %s1945_s28  ;;  %p1950_p8 = scmp.lt.u32.totalorder %s2356_s10, %s2406_s4 }
 0x1ee   : > { %p1951_p13 = scmp.lt.u32.totalorder %s1949_s5, %s1945_s28  ;;  %p1953_p10 = scmp.lt.u32.totalorder %s1945_s28, %s2356_s10 }
 0x1ef   : > { %p1947_p0 = pnand %p1946_p9, %p2192_p5 }
 0x1f0   : > { %p1952_p6 = por %p1951_p13, %p1950_p8 }
 0x1f1   : > { %p1948_p11 = pneg %p1947_p0 }
 0x1f2   : > { %p1954_p3 = por %p1953_p10, %p1952_p6 }
 0x1f4   : > { %p1955_p7 = pnand %p1954_p3, %p1948_p11 }
 0x1f6   : > { %1958 = shalt.err (!%p1955_p7)
}
 0x1f7   : > { %s2017_s23 = smov 64   ;;  %s2018_s14 = smov 4  }
 0x1f8   : > { %1694 = dma.vmem_to_hbm [thread:$0]  (%p2192_p5), %s2358_s20, 192, %s2356_s10, %s1280_s19, %s2017_s23, %s2017_s23, %s2018_s14  }
 0x1f9 PF: > { %s1308_s6 = sand.u32 1, %s1993_s15   ;;  %p2424_p12 = scmp.ne.s32.totalorder %s2411_s22, 0 }
 0x1fa   : > { %p2425_p1 = scmp.ge.s32.totalorder %s2005_s18, 2  ;;  %s1309_s9 = scalar_lea.sflag [#allocation4], %s1308_s6 }
 0x1fc   : > { %p1711_p2 = pnand %p2425_p1, %p2424_p12 }
 0x1fe   : > { %1988 = dma.done.wait (!%p1711_p2), %s1309_s9, 192  }
 0x1ff   : > { %1990 = vsyncadd (!%p1711_p2), %s1309_s9, 4294967104  ;;  %p19_p4 = scmp.ge.s32.totalorder %s2178_s12, 4   ;;  %s2426_s15 = smov %s1997_s16 }
 0x200   : > { %s2427_s16 = smov %s2001_s17  ;;  %s2428_s17 = smov %s2188_s27 }
 0x201   : > { %s2429_s18 = smov %s2178_s12  ;;  %21 = sbr.rel (!%p19_p4) target bundleno = 7 (0x7), region = 101 }
 0x208   :  { %1314 = vsyncpa [#allocation3], 1 }
 0x209   :  { %1316 = vsyncpa [#allocation3 + $0x1], 1 }
 0x20a   :  { %1317 = vsyncpa [#allocation6], 1 }
 0x20b   :  { %1318 = vsyncpa [#allocation9], 1 }
 0x20c   :  { %1319 = vsyncpa [#allocation4], 1 }
 0x20d   :  { %1321 = vsyncpa [#allocation4 + $0x1], 1 }

// kernel: rgb_block_forward.13
= control target key start
LH: loop header
LB: loop body
LE: loop exit
PB: predicated region body
PF: predicated region fallthrough
CT: control target
= control target key end

     0   :  { %s2585_s0 = inlined_call_operand.hbm [shape: bf16[2,42,64], index: 0, kind: input, shape index: {}]   ;;  %s2586_s1 = inlined_call_operand.hbm [shape: bf16[9,64,64], index: 1, kind: input, shape index: {}]   ;;  %s2587_s2 = inlined_call_operand.hbm [shape: f32[2,64], index: 2, kind: input, shape index: {}]   ;;  %s2588_s3 = inlined_call_operand.hbm [shape: f32[24,1], index: 3, kind: input, shape index: {}]   ;;  %s2589_s4 = inlined_call_operand.hbm [shape: bf16[2,24,64], index: 4, kind: input, shape index: {}]   ;;  %s2590_s5 = inlined_call_operand.hbm [shape: bf16[2,24,64], index: 5, kind: output, shape index: {}]  }
   0x1   :  { %2608 = sst [smem:[#allocation21_spill]] %s2585_s0 }
   0x2   :  { %2609 = sst [smem:[#allocation22_spill]] %s2586_s1 }
   0x3   :  { %10 = vsyncpa [#allocation3], 0 }
   0x4   :  { %12 = vsyncpa [#allocation3 + $0x1], 0 }
   0x5   :  { %13 = vsyncpa [#allocation6], 0 }
   0x6   :  { %14 = vsyncpa [#allocation9], 0 }
   0x7   :  { %15 = vsyncpa [#allocation4], 0 }
   0x8   :  { %17 = vsyncpa [#allocation4 + $0x1], 0  ;;  %s2186_s18 = smov 0   ;;  %s2188_s19 = smov 0  }
   0x9   :  { %s2190_s20 = smov 0   ;;  %s2192_s21 = smov 0  }
   0xa LB: > { %2610 = sst [smem:[#allocation17_spill]] %s2137_s20  ;;  %s2207_s22 = sadd.s32 4294967295, %s2141_s21   ;;  %s2141_s21 = sphi %s2192_s21, %s2640_s21   ;;  %s2137_s20 = sphi %s2190_s20, %s2642_s20   ;;  %s2133_s19 = sphi %s2188_s19, %s2644_s19   ;;  %s2129_s18 = sphi %s2186_s18, %s2643_s18  }
   0xb   : > { %s1485_s23 = sadd.s32 4294967294, %s2141_s21   ;;  %p43_p0 = scmp.ne.s32.totalorder %s2133_s19, %s2129_s18 }
   0xc   : > { %p2591_p1 = scmp.eq.s32.totalorder %s2207_s22, 0  ;;  %p162_p3 = scmp.eq.s32.totalorder %s1485_s23, 1 }
   0xd   : > { %p1486_p5 = scmp.ge.s32.totalorder %s2141_s21, 1  ;;  %p169_p7 = scmp.lt.s32.totalorder %s2141_s21, 3 }
   0xe   : > { %p2216_p4 = por %p2591_p1, %p43_p0  ;;  %p2221_p6 = por %p162_p3, %p43_p0 }
   0xf   : > { %p2226_p8 = pnand %p1486_p5, %p169_p7  ;;  %s2143_s27 = smov [#allocation5]  }
  0x10   : > { %s2611_s24 = scalar_select %p2216_p4, 1, 0 }
  0x11   : > { %s2612_s25 = scalar_select %p2221_p6, 1, 0 }
  0x12   : > { %s2614_s26 = scalar_select %p2226_p8, 1, 0 }
  0x13   : > { %2613 = sst [smem:[#allocation18_spill]] %s2612_s25  ;;  %s181_s28 = sshll.u32 %s2143_s27, 4  ;;  %s2230_s28 = int_to_ptr.vmem [resolvable:$true] %s181_s28 }
  0x14   : > { %p1795_p9 = pneg %p2226_p8  ;;  %s2242_s30 = sadd.s32 1, %s2141_s21  }
  0x15   : > { %2616 = sst [smem:[#allocation19_spill]] %s2242_s30  ;;  %s30_s6 = sadd.s32 1, %s2137_s20 }
  0x16   : > { %p2237_p11 = pnand %p1795_p9, %p2591_p1  ;;  %s27_s7 = ssub.s32 %s2141_s21, %s2242_s30 }
  0x17   : > { %s2617_s1 = sld [smem:[#allocation22_spill]] }
  0x18   : > { %s2615_s29 = scalar_select %p2237_p11, 1, 0 }
  0x19   : > { %p2255_p13 = pneg %p2237_p11 }
  0x1d   : > { %s1919_s10 = scalar_lea.hbm %s2617_s1, 4608 }
  0x1e   : > { %p1920_p12 = scmp.ne.s32.totalorder %s2617_s1, %s1919_s10  ;;  %p1926_p5 = scmp.lt.u32.totalorder %s1919_s10, %s2617_s1 }
  0x20   : > { %p1922_p0 = pnand %p2255_p13, %p1920_p12 }
  0x22   : > { %p1923_p3 = pneg %p1922_p0 }
  0x24   : > { %p1928_p7 = pnand %p1926_p5, %p1923_p3 }
  0x26   : > { %1931 = shalt.err (!%p1928_p7)
}
  0x27   : > { %s1932_s16 = scalar_lea.vmem %s2230_s28, 4608  ;;  %p1940_p2 = scmp.lt.s32.totalorder %s2230_s28, %s2230_s28 }
  0x28   : > { %p1933_p9 = scmp.ne.s32.totalorder %s2230_s28, %s1932_s16  ;;  %p1941_p6 = scmp.lt.s32.totalorder %s1932_s16, %s1932_s16 }
  0x2a   : > { %p1935_p10 = pnand %p1933_p9, %p2255_p13  ;;  %p1942_p12 = por %p1941_p6, %p1940_p2 }
  0x2c   : > { %p1936_p1 = pneg %p1935_p10 }
  0x2e   : > { %p1943_p0 = pnand %p1942_p12, %p1936_p1 }
  0x30   : > { %1946 = shalt.err (!%p1943_p0)
}
  0x31   : > { %s2592_s17 = smov 64   ;;  %s2594_s23 = smov 4  }
  0x32   : > { %1798 = dma.hbm_to_vmem [thread:$0]  (!%p2237_p11), %s2617_s1, 4608, %s2230_s28, [#allocation6], %s2592_s17, %s2592_s17, %s2594_s23  }
  0x33   : > { %p28_p1 = scmp.eq.s32.totalorder %s27_s7, 0  ;;  %p37_p2 = scmp.ne.s32.totalorder %s2137_s20, %s2133_s19 }
  0x34   : > { %p38_p6 = scmp.eq.s32.totalorder %s2141_s21, 0  ;;  %p1819_p10 = scmp.lt.s32.totalorder %s2141_s21, 2 }
  0x35   : > { %s2284_s9 = scalar_select %p28_p1, %s2137_s20, %s30_s6  }
  0x36   : > { %p39_p3 = por %p38_p6, %p37_p2  ;;  %p2620_p5 = scmp.eq.s32.totalorder %s2207_s22, 1 }
  0x37   : > { %2619 = sst [smem:[#allocation20_spill]] %s2284_s9  ;;  %s219_s11 = sand.u32 1, %s2141_s21  }
  0x38   : > { %p2288_p7 = por %p2620_p5, %p37_p2  ;;  %s221_s12 = sand.u32 1, %s2137_s20  }
  0x39   : > { %s1770_s14 = smul.u32 24, %s221_s12  ;;  %p2295_p9 = pnand %p1819_p10, %p39_p3 }
  0x3a   : > { %s2621_s10 = scalar_select %p2288_p7, 1, 0 }
  0x3b   : > { %s1771_s15 = smul.u32 384, %s2141_s21  ;;  %s2623_s0 = sld [smem:[#allocation21_spill]] }
  0x3c   : > { %s2622_s16 = scalar_select %p2295_p9, 1, 0 }
  0x3d   : > { %s2299_s28 = smul.u32 12, %s221_s12  ;;  %s223_s8 = scalar_lea.vmem [#allocation2], %s1770_s14 }
  0x3e   : > { %s230_s17 = sshll.u32 %s223_s8, 4  ;;  %s2308_s23 = scalar_lea.sflag [#allocation3], %s219_s11  ;;  %s2306_s17 = int_to_ptr.vmem [resolvable:$true] %s230_s17 }
  0x3f   : > { %p2605_p0 = pneg %p2295_p9 }
  0x41   : > { %s2304_s27 = scalar_lea.hbm %s2623_s0, %s1771_s15  ;;  %s1952_s6 = scalar_lea.hbm %s2623_s0, 768 }
  0x42   : > { %s1947_s1 = scalar_lea.hbm %s2304_s27, 384  ;;  %p1953_p6 = scmp.lt.u32.totalorder %s2304_s27, %s2623_s0 }
  0x43   : > { %p1948_p12 = scmp.ne.s32.totalorder %s2304_s27, %s1947_s1  ;;  %p1954_p10 = scmp.lt.u32.totalorder %s1952_s6, %s1947_s1 }
  0x44   : > { %p1956_p5 = scmp.lt.u32.totalorder %s1947_s1, %s2304_s27 }
  0x45   : > { %p1950_p1 = pnand %p2605_p0, %p1948_p12  ;;  %p1955_p3 = por %p1954_p10, %p1953_p6 }
  0x47   : > { %p1951_p2 = pneg %p1950_p1  ;;  %p1957_p7 = por %p1956_p5, %p1955_p3 }
  0x49   : > { %p1958_p4 = pnand %p1957_p7, %p1951_p2 }
  0x4b   : > { %1961 = shalt.err (!%p1958_p4)
}
  0x4c   : > { %s1962_s11 = scalar_lea.vmem %s2306_s17, 384  ;;  %s2146_s14 = smov [#allocation2]  }
  0x4d   : > { %p1963_p12 = scmp.ne.s32.totalorder %s2306_s17, %s1962_s11  ;;  %s1967_s8 = sshll.u32 %s2146_s14, 4  ;;  %s1968_s8 = int_to_ptr.vmem [resolvable:$false] %s1967_s8 }
  0x4e   : > { %s1969_s9 = scalar_lea.vmem %s1968_s8, 768  ;;  %p1970_p11 = scmp.lt.s32.totalorder %s2306_s17, %s1968_s8 }
  0x4f   : > { %p1965_p1 = pnand %p1963_p12, %p2605_p0  ;;  %p1971_p6 = scmp.lt.s32.totalorder %s1969_s9, %s1962_s11 }
  0x51   : > { %p1966_p8 = pneg %p1965_p1  ;;  %p1972_p10 = por %p1971_p6, %p1970_p11 }
  0x53   : > { %p1973_p3 = pnand %p1972_p10, %p1966_p8 }
  0x55   : > { %1976 = shalt.err (!%p1973_p3)
}
  0x56   : > { %s2624_s1 = smov 4   ;;  %s2625_s12 = smov 64  }
  0x57   : > { %1808 = dma.hbm_to_vmem [thread:$0]  (!%p2295_p9), %s2304_s27, 384, %s2306_s17, %s2308_s23, %s2625_s12, %s2625_s12, %s2624_s1  }
  0x58   : > { %s2147_s15 = smov [#allocation7]   ;;  %s2148_s7 = smov [#allocation8]  }
  0x59   : > { %s195_s6 = sshll.u32 %s2147_s15, 4  ;;  %s205_s14 = sshll.u32 %s2148_s7, 4  ;;  %s196_s6 = int_to_ptr.vmem [resolvable:$true] %s195_s6  ;;  %s206_s14 = int_to_ptr.vmem [resolvable:$true] %s205_s14 }
  0x5a   : > { %s1977_s9 = scalar_lea.hbm %s2587_s2, 32 }
  0x5b   : > { %p1978_p4 = scmp.ne.s32.totalorder %s2587_s2, %s1977_s9  ;;  %p1984_p7 = scmp.lt.u32.totalorder %s1977_s9, %s2587_s2 }
  0x5d   : > { %p1980_p8 = pnand %p1978_p4, %p2255_p13 }
  0x5f   : > { %p1981_p11 = pneg %p1980_p8 }
  0x61   : > { %p1986_p2 = pnand %p1984_p7, %p1981_p11 }
  0x63   : > { %1989 = shalt.err (!%p1986_p2)
}
  0x64   : > { %s1990_s17 = scalar_lea.vmem %s196_s6, 32  ;;  %p1998_p6 = scmp.lt.s32.totalorder %s196_s6, %s196_s6 }
  0x65   : > { %p1991_p5 = scmp.ne.s32.totalorder %s196_s6, %s1990_s17  ;;  %p1999_p10 = scmp.lt.s32.totalorder %s1990_s17, %s1990_s17 }
  0x67   : > { %p1993_p12 = pnand %p1991_p5, %p2255_p13  ;;  %p2000_p3 = por %p1999_p10, %p1998_p6 }
  0x69   : > { %p1994_p1 = pneg %p1993_p12 }
  0x6b   : > { %p2001_p0 = pnand %p2000_p3, %p1994_p1 }
  0x6d   : > { %2004 = shalt.err (!%p2001_p0)
}
  0x6e   : > { %p2626_p4 = scmp.ne.s32.totalorder %s2615_s29, 0  ;;  %s1773_s25 = smul.u32 192, %s2141_s21 }
  0x6f   : > { %s2005_s15 = scalar_lea.hbm %s2588_s3, 384 }
  0x70   : > { %1801 = dma.hbm_to_vmem [thread:$0]  (!%p2626_p4), %s2587_s2, 32, %s196_s6, [#allocation6]  }
  0x71   : > { %p2006_p8 = scmp.ne.s32.totalorder %s2588_s3, %s2005_s15  ;;  %p2012_p7 = scmp.lt.u32.totalorder %s2005_s15, %s2588_s3 }
  0x73   : > { %p2008_p0 = pnand %p2006_p8, %p2255_p13 }
  0x75   : > { %p2009_p11 = pneg %p2008_p0 }
  0x77   : > { %p2014_p2 = pnand %p2012_p7, %p2009_p11 }
  0x79   : > { %2017 = shalt.err (!%p2014_p2)
}
  0x7a   : > { %s2018_s6 = scalar_lea.vmem %s206_s14, 384  ;;  %p2026_p6 = scmp.lt.s32.totalorder %s206_s14, %s206_s14 }
  0x7b   : > { %p2019_p5 = scmp.ne.s32.totalorder %s206_s14, %s2018_s6  ;;  %p2027_p10 = scmp.lt.s32.totalorder %s2018_s6, %s2018_s6 }
  0x7d   : > { %p2021_p12 = pnand %p2019_p5, %p2255_p13  ;;  %p2028_p3 = por %p2027_p10, %p2026_p6 }
  0x7f   : > { %p2022_p1 = pneg %p2021_p12 }
  0x81   : > { %p2029_p9 = pnand %p2028_p3, %p2022_p1 }
  0x83   : > { %2032 = shalt.err (!%p2029_p9)
}
  0x84   : > { %s2149_s17 = smov 128   ;;  %s2150_s0 = smov 8  }
  0x85   : > { %1804 = dma.hbm_to_vmem [thread:$0]  (!%p2626_p4), %s2588_s3, 384, %s206_s14, [#allocation9], %s2149_s17, %s2149_s17, %s2150_s0  }
  0x86   : > { %s2379_s13 = scalar_lea.hbm %s2589_s4, %s1773_s25  ;;  %s244_s7 = scalar_lea.vmem [#allocation10], %s2299_s28 }
  0x87   : > { %s251_s8 = sshll.u32 %s244_s7, 4  ;;  %s2033_s11 = scalar_lea.hbm %s2379_s13, 192  ;;  %s2382_s8 = int_to_ptr.vmem [resolvable:$true] %s251_s8 }
  0x88   : > { %p2034_p13 = scmp.ne.s32.totalorder %s2379_s13, %s2033_s11  ;;  %p2627_p9 = scmp.ne.s32.totalorder %s2622_s16, 0 }
  0x89   : > { %s2038_s9 = scalar_lea.hbm %s2589_s4, 384  ;;  %p2039_p4 = scmp.lt.u32.totalorder %s2379_s13, %s2589_s4 }
  0x8a   : > { %p2628_p8 = pneg %p2627_p9  ;;  %p2040_p7 = scmp.lt.u32.totalorder %s2038_s9, %s2033_s11 }
  0x8b   : > { %p2042_p5 = scmp.lt.u32.totalorder %s2033_s11, %s2379_s13 }
  0x8c   : > { %p2036_p0 = pnand %p2034_p13, %p2628_p8  ;;  %p2041_p2 = por %p2040_p7, %p2039_p4 }
  0x8e   : > { %p2037_p11 = pneg %p2036_p0  ;;  %p2043_p12 = por %p2042_p5, %p2041_p2 }
  0x90   : > { %p2044_p1 = pnand %p2043_p12, %p2037_p11 }
  0x92   : > { %2047 = shalt.err (!%p2044_p1)
}
  0x93   : > { %s2048_s28 = scalar_lea.vmem %s2382_s8, 192  ;;  %p2629_p10 = pmov %p2628_p8 }
  0x94   : > { %p2049_p6 = scmp.ne.s32.totalorder %s2382_s8, %s2048_s28  ;;  %s2151_s17 = smov [#allocation10]  }
  0x95   : > { %s2053_s0 = sshll.u32 %s2151_s17, 4  ;;  %s2054_s0 = int_to_ptr.vmem [resolvable:$false] %s2053_s0 }
  0x96   : > { %p2051_p3 = pnand %p2049_p6, %p2629_p10  ;;  %s2055_s20 = scalar_lea.vmem %s2054_s0, 384 }
  0x97   : > { %p2056_p8 = scmp.lt.s32.totalorder %s2382_s8, %s2054_s0  ;;  %p2057_p0 = scmp.lt.s32.totalorder %s2055_s20, %s2048_s28 }
  0x98   : > { %p2052_p13 = pneg %p2051_p3 }
  0x99   : > { %p2058_p4 = por %p2057_p0, %p2056_p8 }
  0x9b   : > { %p2059_p7 = pnand %p2058_p4, %p2052_p13 }
  0x9d   : > { %2062 = shalt.err (!%p2059_p7)
}
  0x9e   : > { %1811 = dma.hbm_to_vmem [thread:$0]  (!%p2627_p9), %s2379_s13, 192, %s2382_s8, %s2308_s23, %s2625_s12, %s2625_s12, %s2624_s1  }
  0x9f   : > { %p2630_p11 = scmp.ne.s32.totalorder %s2614_s26, 0 }
  0xa0   : > { %s265_s30 = sand.u32 (!%p2630_p11), 1, %s2207_s22   ;;  %s2415_s27 = sand.u32 (!%p2630_p11), 1, %s2133_s19  }
  0xa1   : > { %263 = sbr.rel (%p2630_p11) target bundleno = 551 (0x227), region = 40  ;;  %s266_s7 = scalar_lea.sflag (!%p2630_p11), [#allocation3], %s265_s30 }
  0xa2   : > { %s1774_s15 = smul.u32 (!%p2630_p11), 24, %s2415_s27  ;;  %p2631_p2 = scmp.ne.s32.totalorder (!%p2630_p11), %s2611_s24, 0 }
  0xa4   : > { %s2418_s16 = scalar_lea.vmem (!%p2630_p11), [#allocation2], %s1774_s15 }
  0xa8   : > { %2108 = dma.done.wait (%p2631_p2), %s266_s7, 384  }
  0xa9   : > { %2110 = vsyncadd (%p2631_p2), %s266_s7, 4294966912  ;;  %p2632_p9 = scmp.eq.s32.totalorder %s2207_s22, 0 }
  0xab   : > { %2112 = dma.done.wait (%p2632_p9), [#allocation6], 4640   ;;  %p2633_p5 = pmov %p2632_p9 }
  0xad   : > { %2114 = vsyncadd (%p2633_p5), [#allocation6], 4294962656  ;;  %p2634_p12 = pmov %p2633_p5 }
  0xae   : > { %p2635_p1 = pmov %p2633_p5 }
  0xaf   : > { %2116 = dma.done.wait (%p2634_p12), [#allocation9], 384  }
  0xb0   : > { %2118 = vsyncadd (%p2635_p1), [#allocation9], 4294966912  ;;  %s1775_s26 = smul.u32 12, %s2415_s27 }
  0xb2   : > { %s2435_s23 = scalar_lea.vmem [#allocation10], %s1775_s26 }
  0xb3   : > { %2120 = dma.done.wait (%p2631_p2), %s266_s7, 192  }
  0xb4   : > { %2122 = vsyncadd (%p2631_p2), %s266_s7, 4294967104  ;;  %v2152_v0 = vmov 0   ;;  %v1868_v1 = vld [vmem:[#allocation5 + $0x20] sm:$0xff]   ;;  %v1870_v3 = vld [vmem:[#allocation5 + $0x28] sm:$0xff]   ;;  %vm354_vm0 = vsmask.f32 7424 }
  0xb5   : > { %1866 = vset.pattern.permute.xlu0 %v2152_v0  ;;  %1867 = vset.pattern.permute.xlu1 %v2152_v0  ;;  %v1869_v2 = vld [vmem:[#allocation5 + $0x80] sm:$0xff]   ;;  %v1871_v4 = vld [vmem:[#allocation5 + $0x88] sm:$0xff]   ;;  %v1872_v5 = vld [vmem:[#allocation5 + $0x30] sm:$0xff]   ;;  %vm394_vm1 = vcmask 523264   ;;  %vm740_vm2 = vsmask.f32 4352 }
  0xb6   : > { %1631 = vmatprep.subr.bf16.mxu1 %v1868_v1  ;;  %1679 = vmatprep.subr.bf16.mxu0 %v1869_v2  ;;  %v1873_v6 = vld [vmem:[#allocation5 + $0x90] sm:$0xff]   ;;  %v1874_v7 = vld [vmem:[#allocation5 + $0x38] sm:$0xff]   ;;  %v1878_v23 = vld [vmem:[#allocation5] sm:$0xff]   ;;  %vm540_vm3 = vcmask 1046528   ;;  %vm954_vm4 = vcmask 1045504   ;;  %vm642_vm5 = vcmask 1044480  }
  0xb7   : > { %1632 = vmatpush3.bf16.msra.mxu1 %v1868_v1  ;;  %1680 = vmatpush3.bf16.msra.mxu0 %v1869_v2  ;;  %v1875_v8 = vld [vmem:[#allocation5 + $0x98] sm:$0xff]   ;;  %v323_v9 = vld [vmem:[%s2418_s16] sm:$0xf]  ;;  %v2443_v10 = vld [vmem:[%s2418_s16 + $0x4] sm:$0xf]  ;;  %s1776_s24 = smul.u32 192, %s2207_s22 }
  0xb8   : > { %1633 = vmatprep.subr.bf16.mxu1 %v1870_v3  ;;  %1681 = vmatprep.subr.bf16.mxu0 %v1871_v4  ;;  %v2446_v11 = vld [vmem:[%s2418_s16 + $0x8] sm:$0xf]  ;;  %v334_v12 = vld [vmem:[%s2418_s16 + $0xc] sm:$0x1]  ;;  %v1497_v13 = vcombine.low %v323_v9, %v2443_v10  ;;  %v625_v15 = vld [vmem:[%s2418_s16] sm:$0x8] }
  0xb9   : > { %v2451_v14 = vcombine.low %v2446_v11, %v334_v12  ;;  %v2455_v16 = vld [vmem:[%s2418_s16 + $0xc] sm:$0xf]  ;;  %v2458_v19 = vcombine.low %v625_v15, %v2443_v10  ;;  %v1882_v24 = vld [vmem:[#allocation5 + $0xa0] sm:$0xff]   ;;  %v1883_v39 = vld [vmem:[#allocation5 + $0x8] sm:$0xff]   ;;  %v1534_v41 = vcombine.low %v2443_v10, %v2446_v11  ;;  %v1505_v58 = vcombine.low %v2446_v11, %v2446_v11  ;;  %s321_s1 = scalar_lea.vmem [#allocation11], %s1775_s26  ;;  %s2539_s11 = scalar_lea.hbm %s2590_s5, %s1776_s24 }
  0xba   : > { %v356_v17 = vshrl.u32 %v1497_v13, 16  ;;  %v358_v18 = vshll.u32 %v1497_v13, 16  ;;  %v1527_v20 = vcombine.low %v2446_v11, %v2455_v16  ;;  %v1884_v43 = vld [vmem:[#allocation5 + $0xa8] sm:$0xff]   ;;  %v1885_v44 = vld [vmem:[#allocation5 + $0x10] sm:$0xff]   ;;  %v1887_v46 = vld [vmem:[#allocation5 + $0x18] sm:$0xff]   ;;  %v1535_v1 = vcombine.low %v2455_v16, %v2455_v16  ;;  %s1363_s12 = sshll.u32 %s321_s1, 4  ;;  %s2541_s12 = int_to_ptr.vmem [resolvable:$true] %s1363_s12 }
  0xbb   : > { %1634 = vmatpush3.bf16.msra.mxu1 %v1870_v3  ;;  %1682 = vmatpush3.bf16.msra.mxu0 %v1871_v4  ;;  %v363_v21 = vshll.u32 %v2451_v14, 16  ;;  %v367_v22 = vshrl.u32 %v2451_v14, 16  ;;  %v742_v26 = vshrl.u32 %v2458_v19, 16  ;;  %v745_v27 = vshll.u32 %v2458_v19, 16  ;;  %v1886_v45 = vld [vmem:[#allocation5 + $0xb0] sm:$0xff]   ;;  %v1888_v47 = vld [vmem:[#allocation5 + $0xb8] sm:$0xff]  }
  0xbc   : > { %1635 = vmatprep.subr.bf16.mxu1 %v1872_v5  ;;  %1683 = vmatprep.subr.bf16.mxu0 %v1873_v6  ;;  %v360_v25 = vrot.slane %v358_v18, 1  ;;  %v750_v28 = vshrl.u32 %v1527_v20, 16  ;;  %v753_v30 = vshll.u32 %v1527_v20, 16  ;;  %v527_v48 = vld [vmem:[%s2418_s16] sm:$0xe]  ;;  %v1889_v49 = vld [vmem:[#allocation5 + $0x40] sm:$0xff]  }
  0xbd   : > { %v365_v29 = vrot.slane %v363_v21, 1  ;;  %v744_v32 = vrot.slane %v742_v26, 3  ;;  %v747_v33 = vrot.slane %v745_v27, 4  ;;  %v1512_v50 = vcombine.low %v527_v48, %v2443_v10  ;;  %v931_v51 = vld [vmem:[%s2418_s16 + $0x4] sm:$0xc]  ;;  %v1891_v61 = vld [vmem:[#allocation5 + $0xc0] sm:$0xff]  }
  0xbe   : > { %v361_v31 = vor.u32 %v360_v25, %v356_v17  ;;  %v752_v34 = vrot.slane %v750_v28, 3  ;;  %v755_v36 = vrot.slane %v753_v30, 4  ;;  %v2480_v52 = vld [vmem:[%s2418_s16 + $0x8] sm:$0xf]  ;;  %v933_v53 = vld [vmem:[%s2418_s16 + $0xc] sm:$0xf] }
  0xbf   : > { %1636 = vmatpush3.bf16.msra.mxu1 %v1872_v5  ;;  %1684 = vmatpush3.bf16.msra.mxu0 %v1873_v6  ;;  %v369_v35 = vor.u32 %v367_v22, %v365_v29  ;;  %v748_v38 = vor.u32 %v747_v33, %v744_v32  ;;  %v541_v54 = vrot.slane %v1512_v50, 1  ;;  %v542_v55 = vrot.slane %v2451_v14, 1  ;;  %v934_v56 = vld [vmem:[%s2418_s16 + $0x10] sm:$0x3]  ;;  %v1893_v63 = vld [vmem:[#allocation5 + $0x48] sm:$0xff]   ;;  %v1895_v6 = vld [vmem:[#allocation5 + $0x50] sm:$0xff]  }
  0xc0   : > { %1637 = vmatprep.subr.bf16.mxu1 %v1874_v7  ;;  %1685 = vmatprep.subr.bf16.mxu0 %v1875_v8  ;;  %v366_v37 = vsel %vm354_vm0, %v361_v31, %v365_v29  ;;  %v756_v40 = vor.u32 %v755_v36, %v752_v34  ;;  %v1542_v57 = vcombine.low %v931_v51, %v2480_v52  ;;  %v1039_v60 = vld [vmem:[%s2418_s16 + $0x10] sm:$0x7]  ;;  %v1894_v3 = vld [vmem:[#allocation5 + $0xc8] sm:$0xff]   ;;  %v643_v26 = vrot.slane %v2458_v19, 3  ;;  %v1907_v34 = vld [vmem:[#allocation5 + $0x70] sm:$0xff]   ;;  %s1350_s22 = scalar_lea.sflag [#allocation4], %s2415_s27 }
  0xc1   : > { %1639 = vmatprep.mubr.msk.bf16.mxu1 %vm394_vm1, %v366_v37  ;;  %v1543_v59 = vcombine.low %v933_v53, %v934_v56  ;;  %v543_v2 = vsel %vm540_vm3, %v541_v54, %v542_v55  ;;  %v2499_v5 = vcombine.low %v933_v53, %v1039_v60  ;;  %v1897_v15 = vld [vmem:[#allocation5 + $0x58] sm:$0xff]   ;;  %v1248_v17 = vld [vmem:[#allocation8] sm:$0xff]  ;;  %v1249_v28 = vld [vmem:[#allocation8 + $0x8] sm:$0xff]  ;;  %vm1052_vm6 = vsmask.f32 5376  ;;  %s2063_s29 = scalar_lea.vmem %s2541_s12, 192 }
  0xc2   : > { %v757_v42 = vsel %vm740_vm2, %v748_v38, %v756_v40  ;;  %v955_v62 = vrot.slane %v1542_v57, 2  ;;  %v1054_v9 = vshrl.u32 %v1542_v57, 16  ;;  %v1057_v10 = vshll.u32 %v1542_v57, 16  ;;  %v1250_v18 = vld [vmem:[#allocation8 + $0x10] sm:$0xff]  ;;  %v1900_v25 = vld [vmem:[#allocation5 + $0x60] sm:$0xff]   ;;  %1253 = vperm.xlu0 %1866, %v1248_v17   ;;  %v1905_v31 = vld [vmem:[#allocation5 + $0x68] sm:$0xff]   ;;  %p2064_p6 = scmp.ne.s32.totalorder %s2541_s12, %s2063_s29 }
  0xc3   : > { %1638 = vmatpush3.bf16.msra.mxu1 %v1874_v7  ;;  %1686 = vmatpush3.bf16.msra.mxu0 %v1875_v8  ;;  %v2489_v0 = vrot.slane %v1543_v59, 2  ;;  %v1896_v7 = vld [vmem:[#allocation5 + $0xd0] sm:$0xff]   ;;  %v1062_v12 = vshrl.u32 %v2499_v5, 16  ;;  %v1898_v20 = vld [vmem:[#allocation5 + $0xd8] sm:$0xff]   ;;  %v1906_v19 = vld [vmem:[#allocation5 + $0xe8] sm:$0xff]   ;;  %vm1345_vm7 = vcmask 519168  }
  0xc4   : > { %1643 = vmatprep.subr.bf16.mxu1 %v1878_v23  ;;  %1691 = vmatprep.subr.bf16.mxu0 %v1882_v24  ;;  %v626_v8 = vld [vmem:[%s2418_s16 + $0xc] sm:$0x7]  ;;  %v1056_v21 = vrot.slane %v1054_v9, 2  ;;  %v1059_v22 = vrot.slane %v1057_v10, 3  ;;  %v1151_v36 = vld [vmem:[%s2418_s16 + $0x4] sm:$0x8] }
  0xc5   : > { %1687 = vmatprep.mubr.msk.bf16.mxu0 %vm394_vm1, %v757_v42  ;;  %v957_v4 = vsel %vm954_vm4, %v955_v62, %v2489_v0  ;;  %v1520_v16 = vcombine.low %v2446_v11, %v626_v8  ;;  %1263 = vperm.xlu1 %1867, %v1250_v18   ;;  %v1904_v11 = vld [vmem:[#allocation5 + $0xe0] sm:$0xff]   ;;  %v1908_v14 = vld [vmem:[#allocation5 + $0xf0] sm:$0xff]   ;;  %v1910_v37 = vld [vmem:[#allocation5 + $0xf8] sm:$0xff]   ;;  %v1557_v38 = vcombine.low %v1151_v36, %v2480_v52  ;;  %p2636_p10 = scmp.ne.s32.totalorder %s2621_s10, 0  ;;  %s2153_s14 = smov [#allocation11]  }
  0xc6   : > { %1640 = vmatmul.mubr.msk.bf16.vlgmr.msra.gmra.mrb[0].mxu1 %vm394_vm1, %v369_v35  ;;  %1688 = vmatmul.mubr.msk.bf16.vlgmr.msra.gmra.mrb[0].mxu0 %vm394_vm1, %v756_v40  ;;  %v1060_v29 = vor.u32 %v1059_v22, %v1056_v21  ;;  %v1909_v35 = vld [vmem:[#allocation5 + $0x78] sm:$0xff]   ;;  %v1913_v42 = vld [vmem:[#allocation5 + $0x108] sm:$0xff]   ;;  %s2067_s9 = sshll.u32 %s2153_s14, 4  ;;  %s2068_s9 = int_to_ptr.vmem [resolvable:$false] %s2067_s9 }
  0xc7   : > { %1644 = vmatpush3.bf16.msra.mxu1 %v1878_v23  ;;  %1651 = vmatprep.mubr.msk.bf16.mxu1 %vm394_vm1, %v1497_v13  ;;  %v1065_v13 = vshll.u32 %v2499_v5, 16  ;;  %v1064_v23 = vrot.slane %v1062_v12, 2  ;;  %v644_v27 = vrot.slane %v1520_v16, 3  ;;  %v1164_v40 = vrot.slane %v1557_v38, 3  ;;  %p2065_p3 = pnand %p2064_p6, %p2636_p10  ;;  %s2069_s25 = scalar_lea.vmem %s2068_s9, 384 }
  0xc8   : > { %1645 = vmatprep.subr.bf16.mxu1 %v1883_v39  ;;  %1692 = vmatpush3.bf16.msra.mxu0 %v1882_v24  ;;  %p2070_p8 = scmp.lt.s32.totalorder %s2541_s12, %s2068_s9  ;;  %p2071_p0 = scmp.lt.s32.totalorder %s2069_s25, %s2063_s29 }
  0xc9   : > { %1699 = vmatprep.mubr.msk.bf16.mxu0 %vm394_vm1, %v1534_v41  ;;  %1693 = vmatprep.subr.bf16.mxu0 %v1884_v43  ;;  %v1067_v24 = vrot.slane %v1065_v13, 3  ;;  %v645_v32 = vsel %vm642_vm5, %v643_v26, %v644_v27  ;;  %v1165_v41 = vrot.slane %v2499_v5, 3  ;;  %p2066_p13 = pneg %p2065_p3 }
  0xca   : > { %1258 = vperm.xlu0 %1866, %v1249_v28   ;;  %p2072_p4 = por %p2071_p0, %p2070_p8 }
  0xcb   : > { %1646 = vmatpush3.bf16.msra.mxu1 %v1883_v39  ;;  %v1068_v30 = vor.u32 %v1067_v24, %v1064_v23  ;;  %v1912_v39 = vld [vmem:[#allocation5 + $0x100] sm:$0xff]  }
  0xcc   : > { %1647 = vmatprep.subr.bf16.mxu1 %v1885_v44  ;;  %1694 = vmatpush3.bf16.msra.mxu0 %v1884_v43  ;;  %v1166_v43 = vsel %vm642_vm5, %v1164_v40, %v1165_v41  ;;  %p2073_p7 = pnand %p2072_p4, %p2066_p13 }
  0xcd   : > { %1695 = vmatprep.subr.bf16.mxu0 %v1886_v45  ;;  %v1069_v33 = vsel %vm1052_vm6, %v1060_v29, %v1068_v30 }
  0xcf   : > { %1648 = vmatpush3.bf16.msra.mxu1 %v1885_v44  ;;  %v1914_v44 = vld [vmem:[#allocation5 + $0x110] sm:$0xff]  }
  0xd0   : > { %1649 = vmatprep.subr.bf16.mxu1 %v1887_v46  ;;  %1696 = vmatpush3.bf16.msra.mxu0 %v1886_v45  ;;  %v1915_v45 = vld [vmem:[#allocation5 + $0x118] sm:$0xff]  }
  0xd1   : > { %1697 = vmatprep.subr.bf16.mxu0 %v1888_v47 }
  0xd3   : > { %1650 = vmatpush3.bf16.msra.mxu1 %v1887_v46 }
  0xd4   : > { %1655 = vmatprep.subr.bf16.mxu1 %v1889_v49  ;;  %1698 = vmatpush3.bf16.msra.mxu0 %v1888_v47 }
  0xd5   : > { %1703 = vmatprep.subr.bf16.mxu0 %v1891_v61 }
  0xd6   : > { %1652 = vmatmul.mubr.msk.bf16.vlgmr.msra.gmra.mrb[0].mxu1 %vm394_vm1, %v1505_v58 }
  0xd7   : > { %1656 = vmatpush3.bf16.msra.mxu1 %v1889_v49  ;;  %1663 = vmatprep.mubr.msk.bf16.mxu1 %vm394_vm1, %v543_v2 }
  0xd8   : > { %1657 = vmatprep.subr.bf16.mxu1 %v1893_v63  ;;  %1700 = vmatmul.mubr.msk.bf16.vlgmr.msra.gmra.mrb[0].mxu0 %vm394_vm1, %v1535_v1 }
  0xd9   : > { %1704 = vmatpush3.bf16.msra.mxu0 %v1891_v61  ;;  %1711 = vmatprep.mubr.msk.bf16.mxu0 %vm394_vm1, %v957_v4 }
  0xda   : > { %1705 = vmatprep.subr.bf16.mxu0 %v1894_v3 }
  0xdb   : > { %1658 = vmatpush3.bf16.msra.mxu1 %v1893_v63 }
  0xdc   : > { %1659 = vmatprep.subr.bf16.mxu1 %v1895_v6 }
  0xdd   : > { %1706 = vmatpush3.bf16.msra.mxu0 %v1894_v3 }
  0xde   : > { %1707 = vmatprep.subr.bf16.mxu0 %v1896_v7 }
  0xdf   : > { %1660 = vmatpush3.bf16.msra.mxu1 %v1895_v6 }
  0xe0   : > { %1661 = vmatprep.subr.bf16.mxu1 %v1897_v15 }
  0xe1   : > { %1708 = vmatpush3.bf16.msra.mxu0 %v1896_v7 }
  0xe2   : > { %1709 = vmatprep.subr.bf16.mxu0 %v1898_v20 }
  0xe3   : > { %1662 = vmatpush3.bf16.msra.mxu1 %v1897_v15 }
  0xe4   : > { %1667 = vmatprep.subr.bf16.mxu1 %v1900_v25 }
  0xe5   : > { %1710 = vmatpush3.bf16.msra.mxu0 %v1898_v20 }
  0xe6   : > { %1664 = vmatmul.mubr.msk.bf16.vlgmr.msra.gmra.mrb[0].mxu1 %vm394_vm1, %v542_v55  ;;  %1715 = vmatprep.subr.bf16.mxu0 %v1904_v11 }
  0xe7   : > { %1668 = vmatpush3.bf16.msra.mxu1 %v1900_v25  ;;  %1675 = vmatprep.mubr.msk.bf16.mxu1 %vm394_vm1, %v645_v32 }
  0xe8   : > { %1669 = vmatprep.subr.bf16.mxu1 %v1905_v31  ;;  %1712 = vmatmul.mubr.msk.bf16.vlgmr.msra.gmra.mrb[0].mxu0 %vm394_vm1, %v2489_v0 }
  0xe9   : > { %1716 = vmatpush3.bf16.msra.mxu0 %v1904_v11  ;;  %1723 = vmatprep.mubr.msk.bf16.mxu0 %vm394_vm1, %v1069_v33 }
  0xea   : > { %1717 = vmatprep.subr.bf16.mxu0 %v1906_v19 }
  0xeb   : > { %1670 = vmatpush3.bf16.msra.mxu1 %v1905_v31 }
  0xec   : > { %1671 = vmatprep.subr.bf16.mxu1 %v1907_v34 }
  0xed   : > { %1718 = vmatpush3.bf16.msra.mxu0 %v1906_v19 }
  0xee   : > { %1719 = vmatprep.subr.bf16.mxu0 %v1908_v14 }
  0xef   : > { %1672 = vmatpush3.bf16.msra.mxu1 %v1907_v34  ;;  %v1309_v34 = vlaneseq }
  0xf0   : > { %1673 = vmatprep.subr.bf16.mxu1 %v1909_v35 }
  0xf1   : > { %1720 = vmatpush3.bf16.msra.mxu0 %v1908_v14  ;;  %v1310_v14 = vshrl.u32 %v1309_v34, 7 }
  0xf2   : > { %1721 = vmatprep.subr.bf16.mxu0 %v1910_v37 }
  0xf3   : > { %1674 = vmatpush3.bf16.msra.mxu1 %v1909_v35  ;;  %v1302_v35 = vld [vmem:[#allocation7] sm:$0x1]  ;;  %v1311_v36 = vsub.s32 0, %v1310_v14 }
  0xf5   : > { %1722 = vmatpush3.bf16.msra.mxu0 %v1910_v37 }
  0xf6   : > { %1676 = vmatmul.mubr.msk.bf16.vlgmr.msra.gmra.mrb[0].mxu1 %vm394_vm1, %v644_v27  ;;  %1727 = vmatprep.subr.bf16.mxu0 %v1912_v39 }
  0xf8   : > { %1724 = vmatmul.mubr.msk.bf16.vlgmr.msra.gmra.mrb[0].mxu0 %vm394_vm1, %v1068_v30 }
  0xf9   : > { %1728 = vmatpush3.bf16.msra.mxu0 %v1912_v39  ;;  %1735 = vmatprep.mubr.msk.bf16.mxu0 %vm394_vm1, %v1166_v43  ;;  %v1306_v39 = vld [vmem:[#allocation7 + $0x1] sm:$0x1]  ;;  %v1325_v43 = vld [vmem:[%s2435_s23 + $0x8] sm:$0xf] }
  0xfa   : > { %1729 = vmatprep.subr.bf16.mxu0 %v1913_v42 }
  0xfd   : > { %1730 = vmatpush3.bf16.msra.mxu0 %v1913_v42  ;;  %v1574_v42 = vld [vmem:[%s2435_s23] sm:$0xff]  }
  0xfe   : > { %1731 = vmatprep.subr.bf16.mxu0 %v1914_v44 }
 0x101   : > { %1732 = vmatpush3.bf16.msra.mxu0 %v1914_v44 }
 0x102   : > { %1733 = vmatprep.subr.bf16.mxu0 %v1915_v45 }
 0x105   : > { %1734 = vmatpush3.bf16.msra.mxu0 %v1915_v45 }
 0x108   : > { %1736 = vmatmul.mubr.msk.bf16.vlgmr.msra.gmra.mrb[0].mxu0 %vm394_vm1, %v1165_v41 }
 0x141   : > { %v1254_v50 = vpop.permute.xlu0 %1253 }
 0x144   : > { %v1264_v56 = vpop.permute.xlu1 %1263 }
 0x149   : > { %v1259_v62 = vpop.permute.xlu0 %1258 }
 0x1c9   : > { %v1677_v46 = vpop.f32.mrb[0].mxu1 }
 0x1ca   : > { %v710_v47 = vpop.f32.mrb[1].mxu1 }
 0x1cb   : > { %v1678_v48 = vpop.f32.mrb[2].mxu1 }
 0x1cc   : > { %v713_v49 = vpop.f32.mrb[3].mxu1 }
 0x1db   : > { %v1737_v51 = vpop.f32.mrb[0].mxu0 }
 0x1dc   : > { %v1739_v52 = vadd.f32 %v1737_v51, %v1677_v46  ;;  %v1231_v53 = vpop.f32.mrb[1].mxu0  ;;  %v1328_v51 = vunpack.c.l.bf16 %v1325_v43 }
 0x1dd   : > { %v1740_v54 = vadd.f32 %v1231_v53, %v710_v47  ;;  %v1738_v55 = vpop.f32.mrb[2].mxu0 }
 0x1de   : > { %v1234_v57 = vpop.f32.mrb[3].mxu0  ;;  %v1282_v60 = vmul.f32 %v1739_v52, %v1739_v52  ;;  %v1268_v0 = vmul.f32 %v1739_v52, %v1264_v56 }
 0x1df   : > { %v1266_v58 = vmul.f32 %v1740_v54, %v1254_v50  ;;  %v1280_v59 = vmul.f32 %v1740_v54, %v1740_v54  ;;  %v1741_v61 = vadd.f32 %v1234_v57, %v713_v49  ;;  %v1575_v49 = vunpack.c.l.bf16 %v1574_v42 }
 0x1e0   : > { %v1285_v4 = vmul.f32 %v1282_v60, %v1264_v56  ;;  %v1272_v9 = vsel %vm394_vm1, %v1268_v0, 0.0 }
 0x1e1   : > { %v1283_v63 = vmul.f32 %v1280_v59, %v1254_v50  ;;  %v1267_v1 = vmul.f32 %v1741_v61, %v1259_v62  ;;  %v1281_v2 = vmul.f32 %v1741_v61, %v1741_v61  ;;  %v1269_v3 = vsel %vm394_vm1, %v1266_v58, 0.0 }
 0x1e2   : > { %v1289_v15 = vsel %vm394_vm1, %v1285_v4, 0.0  ;;  %v1576_v50 = vunpack.c.h.bf16 %v1574_v42 }
 0x1e3   : > { %v1270_v5 = vsel %vm394_vm1, %v1267_v1, 0.0  ;;  %v1284_v6 = vmul.f32 %v1281_v2, %v1259_v62  ;;  %v1286_v8 = vsel %vm394_vm1, %v1283_v63, 0.0 }
 0x1e4   : > { %v1271_v7 = vadd.f32 %v1270_v5, %v1269_v3 }
 0x1e5   : > { %v1287_v10 = vsel %vm394_vm1, %v1284_v6, 0.0 }
 0x1e6   : > { %v1273_v12 = vadd.f32 %v1272_v9, %v1271_v7  ;;  %v1288_v13 = vadd.f32 %v1287_v10, %v1286_v8 }
 0x1e8   : > { %v1274_v16 = vrot.slane %v1273_v12, 4  ;;  %v1290_v17 = vadd.f32 %v1289_v15, %v1288_v13 }
 0x1ea   : > { %v1275_v18 = vadd.f32 %v1274_v16, %v1273_v12  ;;  %v1291_v20 = vrot.slane %v1290_v17, 4 }
 0x1ec   : > { %v1276_v21 = vrot.slane %v1275_v18, 2  ;;  %v1292_v22 = vadd.f32 %v1291_v20, %v1290_v17 }
 0x1ee   : > { %v1277_v23 = vadd.f32 %v1276_v21, %v1275_v18  ;;  %v1293_v24 = vrot.slane %v1292_v22, 2 }
 0x1f0   : > { %v1278_v25 = vrot.slane %v1277_v23, 1  ;;  %v1294_v26 = vadd.f32 %v1293_v24, %v1292_v22 }
 0x1f2   : > { %v1279_v27 = vadd.f32 %v1278_v25, %v1277_v23  ;;  %v1295_v28 = vrot.slane %v1294_v26, 1 }
 0x1f4   : > { %v1296_v11 = vadd.f32 %v1295_v28, %v1294_v26  ;;  %v1297_v29 = vmul.f32 0.0625, %v1279_v27 }
 0x1f6   : > { %v1298_v30 = vmul.f32 0.0625, %v1296_v11  ;;  %v1299_v31 = vmul.f32 %v1297_v29, %v1297_v29 }
 0x1f8   : > { %v1300_v32 = vsub.f32 %v1298_v30, %v1299_v31 }
 0x1fa   : > { %v1301_v19 = vmax.f32 %v1300_v32, 0.0 }
 0x1fc   : > { %v1303_v33 = vadd.f32 1e-05, %v1301_v19 }
 0x1fe   : > { %1917 = vrsqrt.f32 %v1303_v33 }
 0x208   : > { %v1918_v37 = vpop.eup %1917 }
 0x209   : > { %v1305_v38 = vmul.f32 %v1918_v37, %v1302_v35 }
 0x20b   : > { %v1307_v40 = vmul.f32 %v1305_v38, %v1297_v29  ;;  %v1312_v41 = vrot.slane %v1305_v38, %v1311_v36 }
 0x20d   : > { %v1308_v44 = vsub.f32 %v1306_v39, %v1307_v40  ;;  %v1313_v45 = vmul.f32 %v1740_v54, %v1312_v41  ;;  %v1314_v46 = vmul.f32 %v1741_v61, %v1312_v41  ;;  %v1315_v47 = vmul.f32 %v1739_v52, %v1312_v41 }
 0x20f   : > { %v1319_v48 = vrot.slane %v1308_v44, %v1311_v36 }
 0x211   : > { %v1320_v53 = vadd.f32 %v1319_v48, %v1313_v45  ;;  %v1321_v55 = vadd.f32 %v1319_v48, %v1314_v46  ;;  %v1322_v56 = vadd.f32 %v1319_v48, %v1315_v47 }
 0x213   : > { %v1329_v57 = vadd.f32 %v1575_v49, %v1320_v53  ;;  %v1330_v58 = vadd.f32 %v1576_v50, %v1321_v55  ;;  %v1331_v59 = vadd.f32 %v1328_v51, %v1322_v56 }
 0x215   : > { %v1570_v52 = vpack.c.bf16 %v1329_v57, %v1329_v57  ;;  %v1571_v54 = vpack.c.bf16 %v1330_v58, %v1330_v58  ;;  %v1572_v60 = vpack.c.bf16 %v1331_v59, %v1331_v59 }
 0x217   : > { %1347 = vst.msk [vmem:[%s321_s1 + $0x4] sm:$0xf] %vm1345_vm7, %v1571_v54  ;;  %1346 = vst.msk [vmem:[%s321_s1] sm:$0xf] %vm1345_vm7, %v1570_v52 }
 0x218   : > { %1348 = vst.msk [vmem:[%s321_s1 + $0x8] sm:$0xf] %vm1345_vm7, %v1572_v60 }
 0x219   : > { %2076 = shalt.err (!%p2073_p7)
}
 0x21a   : > { %s2077_s6 = scalar_lea.hbm %s2539_s11, 192  ;;  %s2081_s0 = scalar_lea.hbm %s2590_s5, 384 }
 0x21b   : > { %p2078_p11 = scmp.ne.s32.totalorder %s2539_s11, %s2077_s6  ;;  %p2082_p5 = scmp.lt.u32.totalorder %s2539_s11, %s2590_s5 }
 0x21c   : > { %p2083_p12 = scmp.lt.u32.totalorder %s2081_s0, %s2077_s6  ;;  %p2085_p6 = scmp.lt.u32.totalorder %s2077_s6, %s2539_s11 }
 0x21d   : > { %p2079_p2 = pnand %p2078_p11, %p2636_p10 }
 0x21e   : > { %p2084_p1 = por %p2083_p12, %p2082_p5 }
 0x21f   : > { %p2080_p9 = pneg %p2079_p2 }
 0x220   : > { %p2086_p3 = por %p2085_p6, %p2084_p1 }
 0x222   : > { %p2087_p13 = pnand %p2086_p3, %p2080_p9 }
 0x224   : > { %2090 = shalt.err (!%p2087_p13)
}
 0x225   : > { %s2154_s15 = smov 64   ;;  %s2155_s7 = smov 4  }
 0x226   : > { %1793 = dma.vmem_to_hbm [thread:$0]  (%p2636_p10), %s2541_s12, 192, %s2539_s11, %s1350_s22, %s2154_s15, %s2154_s15, %s2155_s7  }
 0x227 PF: > { %s2637_s16 = sld [smem:[#allocation18_spill]]  ;;  %s1378_s26 = sand.u32 1, %s2129_s18  }
 0x228   : > { %p2639_p0 = scmp.ge.s32.totalorder %s2141_s21, 2  ;;  %s1379_s23 = scalar_lea.sflag [#allocation4], %s1378_s26 }
 0x22d   : > { %p2638_p8 = scmp.ne.s32.totalorder %s2637_s16, 0 }
 0x22f   : > { %p1813_p4 = pnand %p2639_p0, %p2638_p8 }
 0x231   : > { %2124 = dma.done.wait (!%p1813_p4), %s1379_s23, 192  }
 0x232   : > { %2126 = vsyncadd (!%p1813_p4), %s1379_s23, 4294967104  ;;  %s2640_s21 = sld [smem:[#allocation19_spill]]  ;;  %s2641_s24 = sld [smem:[#allocation17_spill]] }
 0x233   : > { %s2642_s20 = sld [smem:[#allocation20_spill]]  ;;  %s2643_s18 = smov %s2133_s19 }
 0x238   : > { %p20_p7 = scmp.ge.s32.totalorder %s2640_s21, 4   ;;  %s2644_s19 = smov %s2641_s24 }
 0x23a   :  { %22 = sbr.rel (!%p20_p7) target bundleno = 10 (0xa), region = 116 }
 0x241   :  { %1384 = vsyncpa [#allocation3], 1 }
 0x242   :  { %1386 = vsyncpa [#allocation3 + $0x1], 1 }
 0x243   :  { %1387 = vsyncpa [#allocation6], 1 }
 0x244   :  { %1388 = vsyncpa [#allocation9], 1 }
 0x245   :  { %1389 = vsyncpa [#allocation4], 1 }
 0x246   :  { %1391 = vsyncpa [#allocation4 + $0x1], 1 }

</bundles_post_ra>
